<compile_context>
chip_gen: v7x
topology: tpu7x:2x2x1
jax: 0.10.0
libtpu: 0.0.40
codegen_flags: <defaults>
</compile_context>

<pallas_src>
import jax
import jax.numpy as jnp
from jax.experimental import pallas as pl
from jax.experimental.pallas import tpu as pltpu


# ----------------------------------------------------------------------------
# Parameter-free LMU state-space setup (host-side glue, plain JAX)
# ----------------------------------------------------------------------------
def lmu_state_space(memory_size, theta):
    """Continuous LMU (A, B), then ZOH discretization via augmented expm."""
    Q = jnp.arange(memory_size)
    Qf = Q.astype(jnp.float32)
    R = ((2.0 * Qf + 1.0) / float(theta))[:, None]                    # [M, 1]
    i = Q[:, None]
    j = Q[None, :]
    sign_ij = jnp.where(((i - j + 1) % 2) == 0, 1.0, -1.0)
    A = R * jnp.where(i < j, -1.0, sign_ij)                           # [M, M]
    sign_q = jnp.where((Q % 2) == 0, 1.0, -1.0)
    B = R * sign_q[:, None]                                           # [M, 1]
    # ZOH:  expm([[A, B], [0, 0]]) = [[Ad, Bd], [0, 1]]
    M = memory_size
    aug = jnp.zeros((M + 1, M + 1), jnp.float32)
    aug = aug.at[:M, :M].set(A).at[:M, M].set(B[:, 0])
    E = jax.scipy.linalg.expm(aug)
    return E[:M, :M], E[:M, M:M + 1]                                  # Ad, Bd


def lmu_impulse(Ad, Bd, seq_len):
    """H[:, t] = Ad^t @ Bd  ->  [memory_size, seq_len]."""
    def step(v, _):
        return Ad @ v, v[:, 0]
    _, cols = jax.lax.scan(step, Bd, xs=None, length=seq_len)         # [N, M]
    return cols.T                                                     # [M, N]


def build_causal_toeplitz(H):
    """G[s, c*N + t] = H[c, t-s] if t >= s else 0   ->  [N, C*N]."""
    C, N = H.shape
    s = jnp.arange(N)[:, None]
    t = jnp.arange(N)[None, :]
    delta = t - s                                                     # [N, N]
    Hg = H[:, jnp.clip(delta, 0, N - 1)]                              # [C, N, N]
    G = jnp.where((delta >= 0)[None, :, :], Hg, 0.0)
    return jnp.transpose(G, (1, 0, 2)).reshape(N, C * N)


# ----------------------------------------------------------------------------
# Pallas kernel: one tile of B_TILE batch rows per grid step
# ----------------------------------------------------------------------------
def lmu_kernel(x_ref, waug_ref, gh_ref, wc_ref, bias_ref, out_ref):
    f32, bf16 = jnp.float32, jnp.bfloat16
    bt, d, n = x_ref.shape
    rows = waug_ref.shape[0] // bt        # padded rows per batch block (>= HD+1, % 8 == 0)
    hd = wc_ref.shape[1] // bt            # hidden size (== d for this module)

    # ---- encoder + hidden x-projection: ONE 2-D MXU matmul ------------------
    #   x [BT, D, N] --free reshape--> [BT*D, N]
    #   waug = blockdiag_BT([W_hx ; W_u ; 0-pad])  (bf16, built host-side)
    xb = x_ref[...].astype(bf16)
    x2 = xb.reshape(bt * d, n)                                        # free (D % 8 == 0)
    haug2 = jnp.dot(waug_ref[...], x2, preferred_element_type=f32)    # [BT*rows, N]
    haug = haug2.reshape(bt, rows, n)                                 # free (rows % 8 == 0)

    # u_t = relu(W_u x_t + b_u)   (row `hd` of each block)            # [BT, N]
    # NOTE: b_u is a true scalar in this module (Linear(dim, 1) bias).
    b_u = bias_ref[0:1, 2:3]
    u = jnp.maximum(haug[:, hd, :] + b_u, 0.0)

    # ---- memory -> hidden path (dominant matmul) ----------------------------
    #   hm[b, h*N + t] = sum_{s<=t} (W_hm H)[h, t-s] * u[b, s]
    hm_flat = jnp.dot(u.astype(bf16), gh_ref[...],
                      preferred_element_type=f32)                     # [BT, HD*N]
    # single remaining lane->sublane relayout (kept f32, see header note)
    hm = hm_flat.reshape(bt, hd, n)                                   # [BT, HD, N]

    # h_t = relu(W_hx x_t + W_hm m_t + b_h)
    b_h = bias_ref[:, 0:1][None]                                      # [1, D, 1]
    h = jnp.maximum(haug[:, :hd, :] + hm + b_h, 0.0)                  # [BT, HD, N]

    # ---- 1x1 Conv1d (+ folded eval-mode BatchNorm): ONE 2-D MXU matmul ------
    h2 = h.reshape(bt * hd, n).astype(bf16)                           # free (HD % 8 == 0)
    y2 = jnp.dot(wc_ref[...], h2, preferred_element_type=f32)         # [BT*D, N]
    out_ref[...] = y2.reshape(bt, d, n) + bias_ref[:, 1:2][None]      # [BT, D, N] f32


def _pick_b_tile(batch):
    """Fill the batch on single-TC chips; keep >=2 parallel steps on v7x."""
    kind = ""
    try:
        kind = jax.devices()[0].device_kind.lower()
    except Exception:
        pass
    bt = min(batch, 16)                 # cap: block-diag weights grow as b_tile^2
    while bt > 1 and batch % bt:
        bt -= 1
    if "v7" in kind and batch // bt < 2 and bt % 2 == 0 and bt > 1:
        bt //= 2                        # 2 TensorCores per chip -> 2 parallel steps
    return bt


def lmu_forward(x, params, H, eps, b_tile=None):
    B, D, N = x.shape
    HD = params["W_hx"].shape[0]
    assert HD == D, "module ties hidden_size = memory_size = dim"
    assert D % 8 == 0 and N % 128 == 0, "dim must be %8==0 and seq_len %128==0 (8,128 tiling)"

    if b_tile is None:
        b_tile = _pick_b_tile(B)
    assert B % b_tile == 0

    rows = ((HD + 1 + 7) // 8) * 8      # [W_hx ; W_u] rows padded to sublane multiple

    # ---- host-side parameter folding (pure algebra, no semantics change) ----
    # (1) fold W_hm into the causal-Toeplitz memory operator:  Hh = W_hm @ H
    #     (kept bf16; for much larger theta/seq_len consider f32 — dynamic range)
    Gh = build_causal_toeplitz(params["W_hm"] @ H).astype(jnp.bfloat16)       # [N, HD*N]
    # (2) block-diagonal (batch-tiled) projection weights: [W_hx ; W_u ; pad]
    W_pad = jnp.zeros((rows, D), jnp.float32)
    W_pad = W_pad.at[:HD, :].set(params["W_hx"]).at[HD, :].set(params["W_u"][0])
    eye = jnp.eye(b_tile, dtype=jnp.float32)
    W_aug_blk = jnp.kron(eye, W_pad).astype(jnp.bfloat16)                     # [bt*rows, bt*D]
    # (3) fold eval-mode BatchNorm into the 1x1 conv, then block-diagonalize
    scale = params["gamma"] * jax.lax.rsqrt(params["var"] + eps)              # [D, 1]
    W_c_f = scale * params["W_c"]                                             # [D, HD]
    b_c_f = scale * (params["b_c"] - params["mean"]) + params["beta"]         # [D, 1]
    W_c_blk = jnp.kron(eye, W_c_f).astype(jnp.bfloat16)                       # [bt*D, bt*HD]
    # (4) pack remaining per-channel vectors into one (D, 3) f32 tile
    bias = jnp.concatenate(
        [params["b_h"], b_c_f, jnp.broadcast_to(params["b_u"], (D, 1))],
        axis=1).astype(jnp.float32)                                           # [D, 3]

    grid = (B // b_tile,)
    in_specs = [
        pl.BlockSpec((b_tile, D, N), lambda i: (i, 0, 0)),            # x (batch tile)
        pl.BlockSpec((b_tile * rows, b_tile * D), lambda i: (0, 0)),  # blkdiag [W_hx;W_u]
        pl.BlockSpec((N, HD * N), lambda i: (0, 0)),                  # Gh Toeplitz (bf16)
        pl.BlockSpec((b_tile * D, b_tile * HD), lambda i: (0, 0)),    # blkdiag BN-folded W_c
        pl.BlockSpec((D, 3), lambda i: (0, 0)),                       # packed biases (f32)
    ]
    out_specs = pl.BlockSpec((b_tile, D, N), lambda i: (i, 0, 0))

    return pl.pallas_call(
        lmu_kernel,
        out_shape=jax.ShapeDtypeStruct((B, D, N), jnp.float32),
        grid_spec=pltpu.PrefetchScalarGridSpec(
            num_scalar_prefetch=0,
            grid=grid,
            in_specs=in_specs,
            out_specs=out_specs,
        ),
        compiler_params=pltpu.CompilerParams(
            dimension_semantics=("parallel",),
            vmem_limit_bytes=32 * 1024 * 1024,
        ),
    )(x, W_aug_blk, Gh, W_c_blk, bias)


# ----------------------------------------------------------------------------
# Pure-JAX reference (mirrors the PyTorch FFT path, full f32) for validation
# ----------------------------------------------------------------------------
def lmu_reference(x, p, H, eps):
    B, D, N = x.shape
    xT = jnp.transpose(x, (0, 2, 1))                                  # [B, N, D]
    u = jax.nn.relu(jnp.einsum("bnd,od->bno", xT, p["W_u"]) + p["b_u"])   # [B,N,1]
    fftH = jnp.fft.rfft(H, n=2 * N, axis=-1)                          # [M, N+1]
    fftu = jnp.fft.rfft(jnp.transpose(u, (0, 2, 1)), n=2 * N, axis=-1)
    m = jnp.fft.irfft(fftu * fftH[None], n=2 * N, axis=-1)[:, :, :N]  # [B, M, N]
    m_seq = jnp.transpose(m, (0, 2, 1))                               # [B, N, M]
    W_h = jnp.concatenate([p["W_hx"], p["W_hm"]], axis=1)
    inp = jnp.concatenate([xT, m_seq], axis=-1)
    h = jax.nn.relu(jnp.einsum("bnf,of->bno", inp, W_h) + p["b_h"][:, 0])
    hT = jnp.transpose(h, (0, 2, 1))                                  # [B, HD, N]
    y = jnp.einsum("oi,bin->bon", p["W_c"], hT) + p["b_c"][None]
    inv = jax.lax.rsqrt(p["var"] + eps)
    return p["gamma"][None] * (y - p["mean"][None]) * inv + p["beta"][None]


# ----------------------------------------------------------------------------
if __name__ == "__main__":
    # seq_len must be 128 (the cell is built with seq_len=theta=128).
    B, dim, N = 16, 32, 128
    theta = 128
    M = dim                      # memory_size = dim
    HD = dim                     # hidden_size = dim
    eps = 1e-5

    key = jax.random.PRNGKey(0)
    ks = jax.random.split(key, 12)
    x = jax.random.normal(ks[0], (B, dim, N), dtype=jnp.float32)

    # Deterministic synthetic parameters (shapes from the module __init__).
    W_u = 0.1 * jax.random.normal(ks[1], (1, dim), jnp.float32)       # Linear(dim, 1)
    b_u = 0.1 * jax.random.normal(ks[2], (1, 1), jnp.float32)
    W_h = 0.1 * jax.random.normal(ks[3], (HD, dim + M), jnp.float32)  # Linear(dim+mem, hidden)
    b_h = 0.1 * jax.random.normal(ks[4], (HD, 1), jnp.float32)
    W_c = 0.1 * jax.random.normal(ks[5], (dim, HD), jnp.float32)      # Conv1d(dim, dim, 1)
    b_c = 0.1 * jax.random.normal(ks[6], (dim, 1), jnp.float32)
    gamma = 1.0 + 0.1 * jax.random.normal(ks[7], (dim, 1), jnp.float32)
    beta = 0.1 * jax.random.normal(ks[8], (dim, 1), jnp.float32)
    mean = 0.1 * jax.random.normal(ks[9], (dim, 1), jnp.float32)
    var = 1.0 + 0.1 * jax.random.uniform(ks[10], (dim, 1), jnp.float32)

    Ad, Bd = lmu_state_space(M, theta)
    H = lmu_impulse(Ad, Bd, N)                     # [M, N] impulse response

    params = dict(W_u=W_u, b_u=b_u,
                  W_hx=W_h[:, :dim], W_hm=W_h[:, dim:],
                  b_h=b_h, W_c=W_c, b_c=b_c,
                  gamma=gamma, beta=beta, mean=mean, var=var)

    out = lmu_forward(x, params, H, eps)
    out = jax.block_until_ready(out)

    ref = lmu_reference(x, params, H, eps)
    assert out.shape == (B, dim, N) and out.dtype == jnp.float32
    # Tolerance budget: the f32 Toeplitz path matches the FFT path to ~1e-4;
    # the remaining difference is bf16 operand rounding (same rounding profile
    # as the previously validated version), so 3e-2 keeps a 2-3x margin.
    if not jnp.allclose(out, ref, atol=3e-2, rtol=3e-2):
        max_err = float(jnp.max(jnp.abs(out - ref)))
        raise AssertionError(f"kernel/reference mismatch, max abs err = {max_err}")

    print("KERNEL_OK")
</pallas_src>

<mosaic_0001>
module attributes {stable_mosaic.version = 11 : i64} {
  func.func @lmu_kernel(%arg0: i32, %arg1: memref<16x32x128xf32, #tpu.memory_space<vmem>>, %arg2: memref<640x512xbf16, #tpu.memory_space<vmem>>, %arg3: memref<128x4096xbf16, #tpu.memory_space<vmem>>, %arg4: memref<512x512xbf16, #tpu.memory_space<vmem>>, %arg5: memref<32x3xf32, #tpu.memory_space<vmem>>, %arg6: memref<16x32x128xf32, #tpu.memory_space<vmem>>) attributes {dimension_semantics = [#tpu.dimension_semantics<parallel>], iteration_bounds = array<i64: 1>, scalar_prefetch = 0 : i64, scratch_operands = 0 : i64, tpu.core_type = #tpu.core_type<tc>, window_params = [{transform_indices = @transform_0, window_bounds = array<i64: 16, 32, 128>}, {pipeline_mode = #tpu.pipeline_mode<synchronous>, transform_indices = @transform_1, window_bounds = array<i64: 640, 512>}, {pipeline_mode = #tpu.pipeline_mode<synchronous>, transform_indices = @transform_2, window_bounds = array<i64: 128, 4096>}, {pipeline_mode = #tpu.pipeline_mode<synchronous>, transform_indices = @transform_3, window_bounds = array<i64: 512, 512>}, {pipeline_mode = #tpu.pipeline_mode<synchronous>, transform_indices = @transform_4, window_bounds = array<i64: 32, 3>}, {transform_indices = @transform_5, window_bounds = array<i64: 16, 32, 128>}]} {
    %c0 = arith.constant 0 : index
    %c0_0 = arith.constant 0 : index
    %c0_1 = arith.constant 0 : index
    %0 = vector.load %arg1[%c0, %c0_0, %c0_1] : memref<16x32x128xf32, #tpu.memory_space<vmem>>, vector<16x32x128xf32>
    %1 = arith.truncf %0 : vector<16x32x128xf32> to vector<16x32x128xbf16>
    %2 = vector.shape_cast %1 : vector<16x32x128xbf16> to vector<512x128xbf16>
    %c0_2 = arith.constant 0 : index
    %c0_3 = arith.constant 0 : index
    %3 = vector.load %arg2[%c0_2, %c0_3] : memref<640x512xbf16, #tpu.memory_space<vmem>>, vector<640x512xbf16>
    %cst = arith.constant dense<0.000000e+00> : vector<640x128xf32>
    %4 = tpu.matmul %3, %2, %cst {dimension_numbers = #tpu.dot_dimension_numbers<[1], [0], [0], [1], [0, 0, 1, 1], [], []>} : vector<640x512xbf16>, vector<512x128xbf16>, vector<640x128xf32> -> vector<640x128xf32>
    %5 = vector.shape_cast %4 : vector<640x128xf32> to vector<16x40x128xf32>
    %c0_4 = arith.constant 0 : index
    %c2 = arith.constant 2 : index
    %6 = vector.load %arg5[%c0_4, %c2] : memref<32x3xf32, #tpu.memory_space<vmem>>, vector<1x1xf32>
    %7 = vector.extract_strided_slice %5 {offsets = [0, 32, 0], sizes = [16, 1, 128], strides = [1, 1, 1]} : vector<16x40x128xf32> to vector<16x1x128xf32>
    %8 = vector.shape_cast %7 : vector<16x1x128xf32> to vector<16x128xf32>
    %9 = vector.broadcast %6 : vector<1x1xf32> to vector<16x128xf32>
    %10 = arith.addf %8, %9 : vector<16x128xf32>
    %cst_5 = arith.constant 0.000000e+00 : f32
    %11 = vector.broadcast %cst_5 : f32 to vector<16x128xf32>
    %12 = arith.maximumf %10, %11 : vector<16x128xf32>
    %13 = arith.truncf %12 : vector<16x128xf32> to vector<16x128xbf16>
    %c0_6 = arith.constant 0 : index
    %c0_7 = arith.constant 0 : index
    %14 = vector.load %arg3[%c0_6, %c0_7] : memref<128x4096xbf16, #tpu.memory_space<vmem>>, vector<128x4096xbf16>
    %cst_8 = arith.constant dense<0.000000e+00> : vector<16x4096xf32>
    %15 = tpu.matmul %13, %14, %cst_8 {dimension_numbers = #tpu.dot_dimension_numbers<[1], [0], [0], [1], [0, 0, 1, 1], [], []>} : vector<16x128xbf16>, vector<128x4096xbf16>, vector<16x4096xf32> -> vector<16x4096xf32>
    %16 = vector.shape_cast %15 : vector<16x4096xf32> to vector<16x32x128xf32>
    %c0_9 = arith.constant 0 : index
    %c0_10 = arith.constant 0 : index
    %17 = vector.load %arg5[%c0_9, %c0_10] : memref<32x3xf32, #tpu.memory_space<vmem>>, vector<32x1xf32>
    %18 = vector.shape_cast %17 : vector<32x1xf32> to vector<1x32x1xf32>
    %19 = vector.extract_strided_slice %5 {offsets = [0, 0, 0], sizes = [16, 32, 128], strides = [1, 1, 1]} : vector<16x40x128xf32> to vector<16x32x128xf32>
    %20 = arith.addf %19, %16 : vector<16x32x128xf32>
    %21 = vector.broadcast %18 : vector<1x32x1xf32> to vector<16x32x128xf32>
    %22 = arith.addf %20, %21 : vector<16x32x128xf32>
    %cst_11 = arith.constant 0.000000e+00 : f32
    %23 = vector.broadcast %cst_11 : f32 to vector<16x32x128xf32>
    %24 = arith.maximumf %22, %23 : vector<16x32x128xf32>
    %25 = vector.shape_cast %24 : vector<16x32x128xf32> to vector<512x128xf32>
    %26 = arith.truncf %25 : vector<512x128xf32> to vector<512x128xbf16>
    %c0_12 = arith.constant 0 : index
    %c0_13 = arith.constant 0 : index
    %27 = vector.load %arg4[%c0_12, %c0_13] : memref<512x512xbf16, #tpu.memory_space<vmem>>, vector<512x512xbf16>
    %cst_14 = arith.constant dense<0.000000e+00> : vector<512x128xf32>
    %28 = tpu.matmul %27, %26, %cst_14 {dimension_numbers = #tpu.dot_dimension_numbers<[1], [0], [0], [1], [0, 0, 1, 1], [], []>} : vector<512x512xbf16>, vector<512x128xbf16>, vector<512x128xf32> -> vector<512x128xf32>
    %29 = vector.shape_cast %28 : vector<512x128xf32> to vector<16x32x128xf32>
    %c0_15 = arith.constant 0 : index
    %c1 = arith.constant 1 : index
    %30 = vector.load %arg5[%c0_15, %c1] : memref<32x3xf32, #tpu.memory_space<vmem>>, vector<32x1xf32>
    %31 = vector.shape_cast %30 : vector<32x1xf32> to vector<1x32x1xf32>
    %32 = vector.broadcast %31 : vector<1x32x1xf32> to vector<16x32x128xf32>
    %33 = arith.addf %29, %32 : vector<16x32x128xf32>
    %c0_16 = arith.constant 0 : index
    %c0_17 = arith.constant 0 : index
    %c0_18 = arith.constant 0 : index
    %34 = vector.load %arg6[%c0_16, %c0_17, %c0_18] : memref<16x32x128xf32, #tpu.memory_space<vmem>>, vector<16x32x128xf32>
    tpu.vector_store %arg6[%c0_16, %c0_17, %c0_18], %33 {strides = array<i32>} : memref<16x32x128xf32, #tpu.memory_space<vmem>>, vector<16x32x128xf32>,
    return
  }
  func.func @transform_0(%arg0: i32) -> (i32, i32, i32) {
    %c0_i32 = arith.constant 0 : i32
    %c0_i32_0 = arith.constant 0 : i32
    %c0_i32_1 = arith.constant 0 : i32
    return %arg0, %c0_i32, %c0_i32_0 : i32, i32, i32
  }
  func.func @transform_1(%arg0: i32) -> (i32, i32) {
    %c0_i32 = arith.constant 0 : i32
    %c0_i32_0 = arith.constant 0 : i32
    %c0_i32_1 = arith.constant 0 : i32
    return %c0_i32, %c0_i32_0 : i32, i32
  }
  func.func @transform_2(%arg0: i32) -> (i32, i32) {
    %c0_i32 = arith.constant 0 : i32
    %c0_i32_0 = arith.constant 0 : i32
    %c0_i32_1 = arith.constant 0 : i32
    return %c0_i32, %c0_i32_0 : i32, i32
  }
  func.func @transform_3(%arg0: i32) -> (i32, i32) {
    %c0_i32 = arith.constant 0 : i32
    %c0_i32_0 = arith.constant 0 : i32
    %c0_i32_1 = arith.constant 0 : i32
    return %c0_i32, %c0_i32_0 : i32, i32
  }
  func.func @transform_4(%arg0: i32) -> (i32, i32) {
    %c0_i32 = arith.constant 0 : i32
    %c0_i32_0 = arith.constant 0 : i32
    %c0_i32_1 = arith.constant 0 : i32
    return %c0_i32, %c0_i32_0 : i32, i32
  }
  func.func @transform_5(%arg0: i32) -> (i32, i32, i32) {
    %c0_i32 = arith.constant 0 : i32
    %c0_i32_0 = arith.constant 0 : i32
    %c0_i32_1 = arith.constant 0 : i32
    return %arg0, %c0_i32, %c0_i32_0 : i32, i32, i32
  }
}

</mosaic_0001>

<bundles_post_ra>
// kernel: tpu_custom_call.1
= control target key start
LH: loop header
LB: loop body
LE: loop exit
PB: predicated region body
PF: predicated region fallthrough
CT: control target
= control target key end

     0   :  { %10 = vsyncpa [#allocation3], 0  ;;  %s9211_s0 = inlined_call_operand.hbm [shape: f32[16,32,128], index: 0, kind: input, shape index: {}]   ;;  %s9212_s1 = inlined_call_operand.hbm [shape: bf16[640,512], index: 1, kind: input, shape index: {}]   ;;  %s9213_s2 = inlined_call_operand.hbm [shape: bf16[128,4096], index: 2, kind: input, shape index: {}]   ;;  %s9214_s3 = inlined_call_operand.hbm [shape: bf16[512,512], index: 3, kind: input, shape index: {}]   ;;  %s9215_s4 = inlined_call_operand.vmem [shape: f32[32,3], index: 4, kind: input, shape index: {}]   ;;  %s9216_s5 = inlined_call_operand.hbm [shape: f32[16,32,128], index: 5, kind: output, shape index: {}]  }
   0x1   :  { %11 = vsyncpa [#allocation6], 0 }
   0x2   :  { %12 = vsyncpa [#allocation9], 0 }
   0x3   :  { %13 = vsyncpa [#allocation4], 0  ;;  %s8151_s18 = smov [#allocation5]   ;;  %s8033_s22 = scalar_lea.hbm %s9212_s1, 20480 }
   0x4   :  { %s31_s19 = sshll.u32 %s8151_s18, 4  ;;  %p8034_p0 = scmp.ne.s32.totalorder %s9212_s1, %s8033_s22  ;;  %s32_s19 = int_to_ptr.vmem [resolvable:$true] %s31_s19 }
   0x5   :  { %p8037_p1 = scmp.lt.u32.totalorder %s8033_s22, %s9212_s1 }
   0x7   :  { %p8039_p2 = pnand %p8037_p1, %p8034_p0 }
   0x9   :  { %8042 = shalt.err (!%p8039_p2)
}
   0xa   :  { %s8043_s27 = scalar_lea.vmem %s32_s19, 20480  ;;  %p8048_p4 = scmp.lt.s32.totalorder %s32_s19, %s32_s19 }
   0xb   :  { %p8044_p3 = scmp.ne.s32.totalorder %s32_s19, %s8043_s27  ;;  %p8049_p5 = scmp.lt.s32.totalorder %s8043_s27, %s8043_s27 }
   0xd   :  { %p8050_p6 = por %p8049_p5, %p8048_p4 }
   0xf   :  { %p8051_p7 = pnand %p8050_p6, %p8044_p3 }
  0x11   :  { %8054 = shalt.err (!%p8051_p7)
}
  0x12   :  { %s8152_s28 = smov 256   ;;  %s8153_s29 = smov 16  }
  0x13   :  { %37 = dma.hbm_to_vmem [thread:$0]  %s9212_s1, 20480, %s32_s19, [#allocation6], %s8152_s28, %s8152_s28, %s8153_s29  }
  0x14   :  { %s8154_s7 = smov [#allocation2]   ;;  %s8055_s11 = scalar_lea.hbm %s9211_s0, 8192 }
  0x15   :  { %s19_s8 = sshll.u32 %s8154_s7, 4  ;;  %p8056_p8 = scmp.ne.s32.totalorder %s9211_s0, %s8055_s11  ;;  %s20_s8 = int_to_ptr.vmem [resolvable:$true] %s19_s8 }
  0x16   :  { %p8059_p9 = scmp.lt.u32.totalorder %s8055_s11, %s9211_s0 }
  0x18   :  { %p8061_p10 = pnand %p8059_p9, %p8056_p8 }
  0x1a   :  { %8064 = shalt.err (!%p8061_p10)
}
  0x1b   :  { %s8065_s16 = scalar_lea.vmem %s20_s8, 8192  ;;  %p8070_p12 = scmp.lt.s32.totalorder %s20_s8, %s20_s8 }
  0x1c   :  { %p8066_p11 = scmp.ne.s32.totalorder %s20_s8, %s8065_s16  ;;  %p8071_p13 = scmp.lt.s32.totalorder %s8065_s16, %s8065_s16 }
  0x1e   :  { %p8072_p0 = por %p8071_p13, %p8070_p12 }
  0x20   :  { %p8073_p1 = pnand %p8072_p0, %p8066_p11 }
  0x22   :  { %8076 = shalt.err (!%p8073_p1)
}
  0x23   :  { %s8155_s1 = smov 128   ;;  %s8156_s17 = smov 8  }
  0x24   :  { %25 = dma.hbm_to_vmem [thread:$0]  %s9211_s0, 8192, %s20_s8, [#allocation3], %s8155_s1, %s8155_s1, %s8156_s17  }
  0x25   :  { %s8157_s20 = smov [#allocation7]   ;;  %s8158_s22 = smov [#allocation8]  }
  0x26   :  { %s43_s21 = sshll.u32 %s8157_s20, 4  ;;  %s55_s23 = sshll.u32 %s8158_s22, 4  ;;  %s44_s21 = int_to_ptr.vmem [resolvable:$true] %s43_s21  ;;  %s56_s23 = int_to_ptr.vmem [resolvable:$true] %s55_s23 }
  0x27   :  { %s8077_s26 = scalar_lea.hbm %s9213_s2, 32768 }
  0x28   :  { %p8078_p2 = scmp.ne.s32.totalorder %s9213_s2, %s8077_s26  ;;  %p8081_p3 = scmp.lt.u32.totalorder %s8077_s26, %s9213_s2 }
  0x2a   :  { %p8083_p4 = pnand %p8081_p3, %p8078_p2 }
  0x2c   :  { %8086 = shalt.err (!%p8083_p4)
}
  0x2d   :  { %s8087_s0 = scalar_lea.vmem %s44_s21, 32768  ;;  %p8092_p6 = scmp.lt.s32.totalorder %s44_s21, %s44_s21 }
  0x2e   :  { %p8088_p5 = scmp.ne.s32.totalorder %s44_s21, %s8087_s0  ;;  %p8093_p7 = scmp.lt.s32.totalorder %s8087_s0, %s8087_s0 }
  0x30   :  { %p8094_p8 = por %p8093_p7, %p8092_p6 }
  0x32   :  { %p8095_p9 = pnand %p8094_p8, %p8088_p5 }
  0x34   :  { %8098 = shalt.err (!%p8095_p9)
}
  0x35   :  { %s8159_s8 = smov 2048   ;;  %s8099_s13 = scalar_lea.hbm %s9214_s3, 16384 }
  0x36   :  { %49 = dma.hbm_to_vmem [thread:$0]  %s9213_s2, 32768, %s44_s21, [#allocation6], %s8159_s8, %s8159_s8, %s8155_s1  }
  0x37   :  { %p8100_p10 = scmp.ne.s32.totalorder %s9214_s3, %s8099_s13  ;;  %p8103_p11 = scmp.lt.u32.totalorder %s8099_s13, %s9214_s3 }
  0x39   :  { %p8105_p12 = pnand %p8103_p11, %p8100_p10 }
  0x3b   :  { %8108 = shalt.err (!%p8105_p12)
}
  0x3c   :  { %s8109_s19 = scalar_lea.vmem %s56_s23, 16384  ;;  %p8114_p0 = scmp.lt.s32.totalorder %s56_s23, %s56_s23 }
  0x3d   :  { %p8110_p13 = scmp.ne.s32.totalorder %s56_s23, %s8109_s19  ;;  %p8115_p1 = scmp.lt.s32.totalorder %s8109_s19, %s8109_s19 }
  0x3f   :  { %p8116_p2 = por %p8115_p1, %p8114_p0 }
  0x41   :  { %p8117_p3 = pnand %p8116_p2, %p8110_p13 }
  0x43   :  { %8120 = shalt.err (!%p8117_p3)
}
  0x44   :  { %61 = dma.hbm_to_vmem [thread:$0]  %s9214_s3, 16384, %s56_s23, [#allocation9], %s8152_s28, %s8152_s28, %s8153_s29  }
  0x45   :  { %8143 = dma.done.wait [#allocation3], 8192  }
  0x46   :  { %8144 = vsyncadd [#allocation3], 4294959104 }
  0x47   :  { %8145 = dma.done.wait [#allocation6], 53248  }
  0x48   :  { %8146 = vsyncadd [#allocation6], 4294914048 }
  0x49   :  { %8147 = dma.done.wait [#allocation9], 16384  }
  0x4a   :  { %8148 = vsyncadd [#allocation9], 4294950912  ;;  %v9217_v0 = vmov 0   ;;  %v77_v1 = vld [vmem:[#allocation2] sm:$0xff]  ;;  %v78_v2 = vld [vmem:[#allocation2 + $0x8] sm:$0xff]  ;;  %s8161_s29 = smov 126  }
  0x4b   :  { %1133 = vmatprep.subr.bf16.mxu0 %v9217_v0  ;;  %1486 = vmatprep.subr.bf16.mxu1 %v9217_v0  ;;  %v109_v3 = vld [vmem:[#allocation2 + $0x100] sm:$0xff]  ;;  %v141_v4 = vpack.c.bf16 %v78_v2, %v77_v1  ;;  %v110_v5 = vld [vmem:[#allocation2 + $0x108] sm:$0xff]  ;;  %v79_v6 = vld [vmem:[#allocation2 + $0x10] sm:$0xff]  ;;  %vm2183_vm0 = vcmask 1041409   ;;  %vm2186_vm1 = vcmask 1042434   ;;  %vm2189_vm2 = vcmask 1043459  }
  0x4c   :  { %7593 = vset.pattern.permute.xlu0 %v9217_v0  ;;  %7594 = vset.pattern.permute.xlu1 %v9217_v0  ;;  %v80_v7 = vld [vmem:[#allocation2 + $0x18] sm:$0xff]  ;;  %v157_v8 = vpack.c.bf16 %v110_v5, %v109_v3  ;;  %v111_v9 = vld [vmem:[#allocation2 + $0x110] sm:$0xff]  ;;  %v81_v13 = vld [vmem:[#allocation2 + $0x20] sm:$0xff]  ;;  %vm2192_vm3 = vcmask 1044484   ;;  %vm2195_vm4 = vcmask 1045509   ;;  %vm2198_vm5 = vcmask 1046534  }
  0x4d   :  { %v112_v10 = vld [vmem:[#allocation2 + $0x118] sm:$0xff]  ;;  %1134 = vmatpush1.bf16.msra.mxu0 %v141_v4  ;;  %v142_v11 = vpack.c.bf16 %v80_v7, %v79_v6  ;;  %v82_v14 = vld [vmem:[#allocation2 + $0x28] sm:$0xff]  ;;  %v113_v15 = vld [vmem:[#allocation2 + $0x120] sm:$0xff]  ;;  %vm2201_vm6 = vcmask 1047559  }
  0x4e   :  { %1487 = vmatpush1.bf16.msra.mxu1 %v157_v8  ;;  %1135 = vmatprep.subr.bf16.mxu0 %v9217_v0  ;;  %v158_v12 = vpack.c.bf16 %v112_v10, %v111_v9  ;;  %v114_v16 = vld [vmem:[#allocation2 + $0x128] sm:$0xff]  ;;  %v143_v17 = vpack.c.bf16 %v82_v14, %v81_v13  ;;  %v83_v19 = vld [vmem:[#allocation2 + $0x30] sm:$0xff]  ;;  %v84_v20 = vld [vmem:[#allocation2 + $0x38] sm:$0xff] }
  0x4f   :  { %1488 = vmatprep.subr.bf16.mxu1 %v9217_v0  ;;  %v159_v18 = vpack.c.bf16 %v114_v16, %v113_v15  ;;  %v115_v21 = vld [vmem:[#allocation2 + $0x130] sm:$0xff]  ;;  %v116_v22 = vld [vmem:[#allocation2 + $0x138] sm:$0xff]  ;;  %v144_v23 = vpack.c.bf16 %v84_v20, %v83_v19  ;;  %v85_v25 = vld [vmem:[#allocation2 + $0x40] sm:$0xff] }
  0x50   :  { %v160_v24 = vpack.c.bf16 %v116_v22, %v115_v21  ;;  %v86_v26 = vld [vmem:[#allocation2 + $0x48] sm:$0xff]  ;;  %v117_v27 = vld [vmem:[#allocation2 + $0x140] sm:$0xff]  ;;  %v87_v31 = vld [vmem:[#allocation2 + $0x50] sm:$0xff] }
  0x51   :  { %1136 = vmatpush1.bf16.msra.mxu0 %v142_v11  ;;  %v118_v28 = vld [vmem:[#allocation2 + $0x148] sm:$0xff]  ;;  %v145_v29 = vpack.c.bf16 %v86_v26, %v85_v25  ;;  %v88_v32 = vld [vmem:[#allocation2 + $0x58] sm:$0xff]  ;;  %v119_v33 = vld [vmem:[#allocation2 + $0x150] sm:$0xff] }
  0x52   :  { %1489 = vmatpush1.bf16.msra.mxu1 %v158_v12  ;;  %1137 = vmatprep.subr.bf16.mxu0 %v9217_v0  ;;  %v161_v30 = vpack.c.bf16 %v118_v28, %v117_v27  ;;  %v120_v34 = vld [vmem:[#allocation2 + $0x158] sm:$0xff]  ;;  %v146_v35 = vpack.c.bf16 %v88_v32, %v87_v31  ;;  %v89_v37 = vld [vmem:[#allocation2 + $0x60] sm:$0xff]  ;;  %v90_v38 = vld [vmem:[#allocation2 + $0x68] sm:$0xff] }
  0x53   :  { %1490 = vmatprep.subr.bf16.mxu1 %v9217_v0  ;;  %v162_v36 = vpack.c.bf16 %v120_v34, %v119_v33  ;;  %v121_v39 = vld [vmem:[#allocation2 + $0x160] sm:$0xff]  ;;  %v122_v40 = vld [vmem:[#allocation2 + $0x168] sm:$0xff]  ;;  %v91_v41 = vld [vmem:[#allocation2 + $0x70] sm:$0xff]  ;;  %v147_v43 = vpack.c.bf16 %v90_v38, %v89_v37 }
  0x54   :  { %v7599_v42 = vld [vmem:[#allocation5 + $0x4] ss:$16 sps:$4 sm:$0xff]   ;;  %v92_v44 = vld [vmem:[#allocation2 + $0x78] sm:$0xff]  ;;  %v163_v46 = vpack.c.bf16 %v122_v40, %v121_v39  ;;  %v94_v52 = vld [vmem:[#allocation2 + $0x88] sm:$0xff] }
  0x55   :  { %1138 = vmatpush1.bf16.msra.mxu0 %v143_v17  ;;  %v7602_v45 = vld [vmem:[#allocation5 + $0xc] ss:$16 sps:$4 sm:$0xff]   ;;  %v123_v47 = vld [vmem:[#allocation2 + $0x170] sm:$0xff]  ;;  %1165 = vmatprep.mubr.bf16.mxu0 %v7599_v42  ;;  %v148_v49 = vpack.c.bf16 %v92_v44, %v91_v41  ;;  %v93_v50 = vld [vmem:[#allocation2 + $0x80] sm:$0xff] }
  0x56   :  { %1491 = vmatpush1.bf16.msra.mxu1 %v159_v18  ;;  %1139 = vmatprep.subr.bf16.mxu0 %v9217_v0  ;;  %v124_v48 = vld [vmem:[#allocation2 + $0x178] sm:$0xff]  ;;  %v125_v53 = vld [vmem:[#allocation2 + $0x180] sm:$0xff]  ;;  %v126_v54 = vld [vmem:[#allocation2 + $0x188] sm:$0xff]  ;;  %v149_v55 = vpack.c.bf16 %v94_v52, %v93_v50 }
  0x57   :  { %1492 = vmatprep.subr.bf16.mxu1 %v9217_v0  ;;  %1518 = vmatprep.mubr.bf16.mxu1 %v7602_v45  ;;  %v164_v51 = vpack.c.bf16 %v124_v48, %v123_v47  ;;  %v95_v56 = vld [vmem:[#allocation2 + $0x90] sm:$0xff]  ;;  %v96_v57 = vld [vmem:[#allocation2 + $0x98] sm:$0xff]  ;;  %v165_v58 = vpack.c.bf16 %v126_v54, %v125_v53  ;;  %v97_v62 = vld [vmem:[#allocation2 + $0xa0] sm:$0xff] }
  0x58   :  { %v127_v59 = vld [vmem:[#allocation2 + $0x190] sm:$0xff]  ;;  %v128_v60 = vld [vmem:[#allocation2 + $0x198] sm:$0xff]  ;;  %v150_v61 = vpack.c.bf16 %v96_v57, %v95_v56  ;;  %v98_v1 = vld [vmem:[#allocation2 + $0xa8] sm:$0xff] }
  0x59   :  { %1140 = vmatpush1.bf16.msra.mxu0 %v144_v23  ;;  %v166_v63 = vpack.c.bf16 %v128_v60, %v127_v59  ;;  %v129_v2 = vld [vmem:[#allocation2 + $0x1a0] sm:$0xff]  ;;  %v130_v3 = vld [vmem:[#allocation2 + $0x1a8] sm:$0xff]  ;;  %v151_v4 = vpack.c.bf16 %v98_v1, %v97_v62  ;;  %v99_v5 = vld [vmem:[#allocation2 + $0xb0] sm:$0xff] }
  0x5a   :  { %1493 = vmatpush1.bf16.msra.mxu1 %v160_v24  ;;  %1141 = vmatprep.subr.bf16.mxu0 %v9217_v0  ;;  %v100_v6 = vld [vmem:[#allocation2 + $0xb8] sm:$0xff]  ;;  %v167_v7 = vpack.c.bf16 %v130_v3, %v129_v2  ;;  %v131_v8 = vld [vmem:[#allocation2 + $0x1b0] sm:$0xff]  ;;  %v101_v11 = vld [vmem:[#allocation2 + $0xc0] sm:$0xff] }
  0x5b   :  { %1494 = vmatprep.subr.bf16.mxu1 %v9217_v0  ;;  %v132_v9 = vld [vmem:[#allocation2 + $0x1b8] sm:$0xff]  ;;  %v152_v10 = vpack.c.bf16 %v100_v6, %v99_v5  ;;  %v102_v13 = vld [vmem:[#allocation2 + $0xc8] sm:$0xff]  ;;  %v1839_v14 = vld [vmem:[%s9215_s4] sm:$0x1] }
  0x5c   :  { %v168_v12 = vpack.c.bf16 %v132_v9, %v131_v8  ;;  %v133_v15 = vld [vmem:[#allocation2 + $0x1c0] sm:$0xff]  ;;  %v134_v16 = vld [vmem:[#allocation2 + $0x1c8] sm:$0xff]  ;;  %1841 = vrot.lane.b32.xlu0 %v1839_v14, %s8161_s29  ;;  %v153_v17 = vpack.c.bf16 %v102_v13, %v101_v11  ;;  %v103_v18 = vld [vmem:[#allocation2 + $0xd0] sm:$0xff] }
  0x5d   :  { %1142 = vmatpush1.bf16.msra.mxu0 %v145_v29  ;;  %v104_v19 = vld [vmem:[#allocation2 + $0xd8] sm:$0xff]  ;;  %v169_v20 = vpack.c.bf16 %v134_v16, %v133_v15  ;;  %v135_v21 = vld [vmem:[#allocation2 + $0x1d0] sm:$0xff]  ;;  %v105_v24 = vld [vmem:[#allocation2 + $0xe0] sm:$0xff] }
  0x5e   :  { %1495 = vmatpush1.bf16.msra.mxu1 %v161_v30  ;;  %1143 = vmatprep.subr.bf16.mxu0 %v9217_v0  ;;  %v136_v22 = vld [vmem:[#allocation2 + $0x1d8] sm:$0xff]  ;;  %v154_v23 = vpack.c.bf16 %v104_v19, %v103_v18  ;;  %v106_v26 = vld [vmem:[#allocation2 + $0xe8] sm:$0xff]  ;;  %v137_v27 = vld [vmem:[#allocation2 + $0x1e0] sm:$0xff] }
  0x5f   :  { %1496 = vmatprep.subr.bf16.mxu1 %v9217_v0  ;;  %v170_v25 = vpack.c.bf16 %v136_v22, %v135_v21  ;;  %v138_v28 = vld [vmem:[#allocation2 + $0x1e8] sm:$0xff]  ;;  %v155_v29 = vpack.c.bf16 %v106_v26, %v105_v24  ;;  %v107_v30 = vld [vmem:[#allocation2 + $0xf0] sm:$0xff]  ;;  %v108_v31 = vld [vmem:[#allocation2 + $0xf8] sm:$0xff] }
  0x60   :  { %v171_v32 = vpack.c.bf16 %v138_v28, %v137_v27  ;;  %v139_v33 = vld [vmem:[#allocation2 + $0x1f0] sm:$0xff]  ;;  %v140_v34 = vld [vmem:[#allocation2 + $0x1f8] sm:$0xff]  ;;  %v1894_v26 = vld [vmem:[#allocation7] sm:$0xff] }
  0x61   :  { %1144 = vmatpush1.bf16.msra.mxu0 %v146_v35  ;;  %v156_v35 = vpack.c.bf16 %v108_v31, %v107_v30  ;;  %v7597_v37 = vld [vmem:[#allocation5] ss:$16 sps:$4 sm:$0xff]   ;;  %v7600_v38 = vld [vmem:[#allocation5 + $0x8] ss:$16 sps:$4 sm:$0xff]   ;;  %v7603_v39 = vld [vmem:[#allocation5 + $0x24] ss:$16 sps:$4 sm:$0xff]  }
  0x62   :  { %1497 = vmatpush1.bf16.msra.mxu1 %v162_v36  ;;  %1145 = vmatprep.subr.bf16.mxu0 %v9217_v0  ;;  %v172_v36 = vpack.c.bf16 %v140_v34, %v139_v33  ;;  %v7605_v40 = vld [vmem:[#allocation5 + $0x2c] ss:$16 sps:$4 sm:$0xff]   ;;  %v7607_v41 = vld [vmem:[#allocation5 + $0x20] ss:$16 sps:$4 sm:$0xff]   ;;  %v7608_v42 = vld [vmem:[#allocation5 + $0x28] ss:$16 sps:$4 sm:$0xff]  }
  0x63   :  { %1498 = vmatprep.subr.bf16.mxu1 %v9217_v0  ;;  %v7611_v44 = vld [vmem:[#allocation5 + $0x4c] ss:$16 sps:$4 sm:$0xff]   ;;  %v7613_v45 = vld [vmem:[#allocation5 + $0x40] ss:$16 sps:$4 sm:$0xff]   ;;  %v7615_v47 = vld [vmem:[#allocation5 + $0x64] ss:$16 sps:$4 sm:$0xff]  }
  0x64   :  { %v7617_v48 = vld [vmem:[#allocation5 + $0x6c] ss:$16 sps:$4 sm:$0xff]   ;;  %v7620_v50 = vld [vmem:[#allocation5 + $0x68] ss:$16 sps:$4 sm:$0xff]   ;;  %v7625_v53 = vld [vmem:[#allocation5 + $0x80] ss:$16 sps:$4 sm:$0xff]  }
  0x65   :  { %1146 = vmatpush1.bf16.msra.mxu0 %v147_v43  ;;  %v7609_v43 = vld [vmem:[#allocation5 + $0x44] ss:$16 sps:$4 sm:$0xff]   ;;  %v7623_v52 = vld [vmem:[#allocation5 + $0x8c] ss:$16 sps:$4 sm:$0xff]   ;;  %v7626_v54 = vld [vmem:[#allocation5 + $0x88] ss:$16 sps:$4 sm:$0xff]  }
  0x66   :  { %1499 = vmatpush1.bf16.msra.mxu1 %v163_v46  ;;  %1147 = vmatprep.subr.bf16.mxu0 %v9217_v0  ;;  %v7614_v46 = vld [vmem:[#allocation5 + $0x48] ss:$16 sps:$4 sm:$0xff]   ;;  %v7629_v56 = vld [vmem:[#allocation5 + $0xac] ss:$16 sps:$4 sm:$0xff]   ;;  %v7631_v57 = vld [vmem:[#allocation5 + $0xa0] ss:$16 sps:$4 sm:$0xff]  }
  0x67   :  { %1500 = vmatprep.subr.bf16.mxu1 %v9217_v0  ;;  %v7633_v59 = vld [vmem:[#allocation5 + $0xc4] ss:$16 sps:$4 sm:$0xff]   ;;  %v7635_v60 = vld [vmem:[#allocation5 + $0xcc] ss:$16 sps:$4 sm:$0xff]   ;;  %v7638_v62 = vld [vmem:[#allocation5 + $0xc8] ss:$16 sps:$4 sm:$0xff]  }
  0x68   :  { %v7641_v1 = vld [vmem:[#allocation5 + $0xec] ss:$16 sps:$4 sm:$0xff]   ;;  %v7643_v2 = vld [vmem:[#allocation5 + $0xe0] ss:$16 sps:$4 sm:$0xff]   ;;  %v7644_v3 = vld [vmem:[#allocation5 + $0xe8] ss:$16 sps:$4 sm:$0xff]  }
  0x69   :  { %1148 = vmatpush1.bf16.msra.mxu0 %v148_v49  ;;  %v7619_v49 = vld [vmem:[#allocation5 + $0x60] ss:$16 sps:$4 sm:$0xff]   ;;  %v7647_v5 = vld [vmem:[#allocation5 + $0x10c] ss:$16 sps:$4 sm:$0xff]   ;;  %v7651_v8 = vld [vmem:[#allocation5 + $0x124] ss:$16 sps:$4 sm:$0xff]  }
  0x6a   :  { %1501 = vmatpush1.bf16.msra.mxu1 %v164_v51  ;;  %1149 = vmatprep.subr.bf16.mxu0 %v9217_v0  ;;  %v7621_v51 = vld [vmem:[#allocation5 + $0x84] ss:$16 sps:$4 sm:$0xff]   ;;  %v7649_v6 = vld [vmem:[#allocation5 + $0x100] ss:$16 sps:$4 sm:$0xff]   ;;  %v7653_v9 = vld [vmem:[#allocation5 + $0x12c] ss:$16 sps:$4 sm:$0xff]  }
  0x6b   :  { %1502 = vmatprep.subr.bf16.mxu1 %v9217_v0  ;;  %v7656_v11 = vld [vmem:[#allocation5 + $0x128] ss:$16 sps:$4 sm:$0xff]   ;;  %v7659_v13 = vld [vmem:[#allocation5 + $0x14c] ss:$16 sps:$4 sm:$0xff]   ;;  %v7661_v14 = vld [vmem:[#allocation5 + $0x140] ss:$16 sps:$4 sm:$0xff]  }
  0x6c   :  { %v7662_v15 = vld [vmem:[#allocation5 + $0x148] ss:$16 sps:$4 sm:$0xff]   ;;  %v7663_v16 = vld [vmem:[#allocation5 + $0x164] ss:$16 sps:$4 sm:$0xff]   ;;  %v7667_v18 = vld [vmem:[#allocation5 + $0x160] ss:$16 sps:$4 sm:$0xff]  }
  0x6d   :  { %1150 = vmatpush1.bf16.msra.mxu0 %v149_v55  ;;  %v7627_v55 = vld [vmem:[#allocation5 + $0xa4] ss:$16 sps:$4 sm:$0xff]   ;;  %v7668_v19 = vld [vmem:[#allocation5 + $0x168] ss:$16 sps:$4 sm:$0xff]   ;;  %v7671_v21 = vld [vmem:[#allocation5 + $0x18c] ss:$16 sps:$4 sm:$0xff]  }
  0x6e   :  { %1503 = vmatpush1.bf16.msra.mxu1 %v165_v58  ;;  %1151 = vmatprep.subr.bf16.mxu0 %v9217_v0  ;;  %v7632_v58 = vld [vmem:[#allocation5 + $0xa8] ss:$16 sps:$4 sm:$0xff]   ;;  %v7673_v22 = vld [vmem:[#allocation5 + $0x180] ss:$16 sps:$4 sm:$0xff]   ;;  %v7675_v24 = vld [vmem:[#allocation5 + $0x1a4] ss:$16 sps:$4 sm:$0xff]  }
  0x6f   :  { %1504 = vmatprep.subr.bf16.mxu1 %v9217_v0  ;;  %v1910_v27 = vld [vmem:[#allocation7 + $0x80] sm:$0xff]  ;;  %v1895_v28 = vld [vmem:[#allocation7 + $0x8] sm:$0xff] }
  0x70   :  { %v7193_v30 = vcombine.high %v1894_v26, %v1910_v27  ;;  %v1911_v31 = vld [vmem:[#allocation7 + $0x88] sm:$0xff] }
  0x71   :  { %1152 = vmatpush1.bf16.msra.mxu0 %v150_v61  ;;  %v7637_v61 = vld [vmem:[#allocation5 + $0xc0] ss:$16 sps:$4 sm:$0xff]   ;;  %v7194_v33 = vcombine.low %v1895_v28, %v1911_v31  ;;  %v7195_v34 = vcombine.high %v1895_v28, %v1911_v31  ;;  %v7743_v31 = vld [vmem:[#allocation5 + $0x30c] ss:$16 sps:$4 sm:$0xff]  }
  0x72   :  { %1505 = vmatpush1.bf16.msra.mxu1 %v166_v63  ;;  %1153 = vmatprep.subr.bf16.mxu0 %v9217_v0  ;;  %v7639_v63 = vld [vmem:[#allocation5 + $0xe4] ss:$16 sps:$4 sm:$0xff]   ;;  %v7739_v28 = vld [vmem:[#allocation5 + $0x2e0] ss:$16 sps:$4 sm:$0xff]  }
  0x73   :  { %1506 = vmatprep.subr.bf16.mxu1 %v9217_v0 }
  0x75   :  { %1154 = vmatpush1.bf16.msra.mxu0 %v151_v4  ;;  %v7645_v4 = vld [vmem:[#allocation5 + $0x104] ss:$16 sps:$4 sm:$0xff]  }
  0x76   :  { %1507 = vmatpush1.bf16.msra.mxu1 %v167_v7  ;;  %1155 = vmatprep.subr.bf16.mxu0 %v9217_v0  ;;  %v7650_v7 = vld [vmem:[#allocation5 + $0x108] ss:$16 sps:$4 sm:$0xff]  }
  0x77   :  { %1508 = vmatprep.subr.bf16.mxu1 %v9217_v0 }
  0x79   :  { %1156 = vmatpush1.bf16.msra.mxu0 %v152_v10  ;;  %v7655_v10 = vld [vmem:[#allocation5 + $0x120] ss:$16 sps:$4 sm:$0xff]  }
  0x7a   :  { %1509 = vmatpush1.bf16.msra.mxu1 %v168_v12  ;;  %1157 = vmatprep.subr.bf16.mxu0 %v9217_v0  ;;  %v7657_v12 = vld [vmem:[#allocation5 + $0x144] ss:$16 sps:$4 sm:$0xff]  }
  0x7b   :  { %1510 = vmatprep.subr.bf16.mxu1 %v9217_v0 }
  0x7d   :  { %1158 = vmatpush1.bf16.msra.mxu0 %v153_v17  ;;  %v7665_v17 = vld [vmem:[#allocation5 + $0x16c] ss:$16 sps:$4 sm:$0xff]  }
  0x7e   :  { %1511 = vmatpush1.bf16.msra.mxu1 %v169_v20  ;;  %1159 = vmatprep.subr.bf16.mxu0 %v9217_v0  ;;  %v7669_v20 = vld [vmem:[#allocation5 + $0x184] ss:$16 sps:$4 sm:$0xff]  }
  0x7f   :  { %1512 = vmatprep.subr.bf16.mxu1 %v9217_v0 }
  0x81   :  { %1160 = vmatpush1.bf16.msra.mxu0 %v154_v23  ;;  %v7674_v23 = vld [vmem:[#allocation5 + $0x188] ss:$16 sps:$4 sm:$0xff]  }
  0x82   :  { %1513 = vmatpush1.bf16.msra.mxu1 %v170_v25  ;;  %1161 = vmatprep.subr.bf16.mxu0 %v9217_v0 }
  0x83   :  { %1514 = vmatprep.subr.bf16.mxu1 %v9217_v0 }
  0x85   :  { %1162 = vmatpush1.bf16.msra.mxu0 %v155_v29  ;;  %v7677_v29 = vld [vmem:[#allocation5 + $0x1ac] ss:$16 sps:$4 sm:$0xff]  }
  0x86   :  { %1515 = vmatpush1.bf16.msra.mxu1 %v171_v32  ;;  %1163 = vmatprep.subr.bf16.mxu0 %v9217_v0  ;;  %v7192_v32 = vcombine.low %v1894_v26, %v1910_v27 }
  0x87   :  { %1516 = vmatprep.subr.bf16.mxu1 %v9217_v0 }
  0x89   :  { %1164 = vmatpush1.bf16.msra.mxu0 %v156_v35  ;;  %v7679_v35 = vld [vmem:[#allocation5 + $0x1a0] ss:$16 sps:$4 sm:$0xff]  }
  0x8a   :  { %1517 = vmatpush1.bf16.msra.mxu1 %v172_v36  ;;  %3499 = vmatprep.subr.bf16.mxu0 %v7193_v30  ;;  %v7680_v36 = vld [vmem:[#allocation5 + $0x1a8] ss:$16 sps:$4 sm:$0xff]   ;;  %v7741_v30 = vld [vmem:[#allocation5 + $0x304] ss:$16 sps:$4 sm:$0xff]  }
  0x8b   :  { %3542 = vmatprep.subr.bf16.mxu1 %v7195_v34  ;;  %v7747_v34 = vld [vmem:[#allocation5 + $0x324] ss:$16 sps:$4 sm:$0xff]  }
  0x8c   :  { %1166 = vmatmul.mubr.bf16.vlgmr.msra.gmra.mrb[0].mxu0 %v7597_v37  ;;  %v7681_v37 = vld [vmem:[#allocation5 + $0x1c4] ss:$16 sps:$4 sm:$0xff]  }
  0x8d   :  { %1519 = vmatmul.mubr.bf16.vlgmr.msra.gmra.mrb[0].mxu1 %v7600_v38  ;;  %1173 = vmatprep.mubr.bf16.mxu0 %v7603_v39  ;;  %v7683_v38 = vld [vmem:[#allocation5 + $0x1cc] ss:$16 sps:$4 sm:$0xff]   ;;  %v7685_v39 = vld [vmem:[#allocation5 + $0x1c0] ss:$16 sps:$4 sm:$0xff]  }
  0x8e   :  { %1526 = vmatprep.mubr.bf16.mxu1 %v7605_v40  ;;  %3500 = vmatpush1.bf16.msra.mxu0 %v7192_v32  ;;  %v7686_v40 = vld [vmem:[#allocation5 + $0x1c8] ss:$16 sps:$4 sm:$0xff]   ;;  %v7745_v32 = vld [vmem:[#allocation5 + $0x300] ss:$16 sps:$4 sm:$0xff]  }
  0x8f   :  { %3543 = vmatpush1.bf16.msra.mxu1 %v7194_v33  ;;  %v7746_v33 = vld [vmem:[#allocation5 + $0x308] ss:$16 sps:$4 sm:$0xff]  }
  0x94   :  { %1174 = vmatmul.mubr.bf16.gmra.mrb[4].mxu0 %v7607_v41  ;;  %v7687_v41 = vld [vmem:[#allocation5 + $0x1e4] ss:$16 sps:$4 sm:$0xff]  }
  0x95   :  { %1527 = vmatmul.mubr.bf16.gmra.mrb[4].mxu1 %v7608_v42  ;;  %1181 = vmatprep.mubr.bf16.mxu0 %v7609_v43  ;;  %v7689_v42 = vld [vmem:[#allocation5 + $0x1ec] ss:$16 sps:$4 sm:$0xff]   ;;  %v7691_v43 = vld [vmem:[#allocation5 + $0x1e0] ss:$16 sps:$4 sm:$0xff]  }
  0x96   :  { %1534 = vmatprep.mubr.bf16.mxu1 %v7611_v44  ;;  %v7692_v44 = vld [vmem:[#allocation5 + $0x1e8] ss:$16 sps:$4 sm:$0xff]  }
  0x9c   :  { %1182 = vmatmul.mubr.bf16.gmra.mrb[8].mxu0 %v7613_v45  ;;  %v7693_v45 = vld [vmem:[#allocation5 + $0x204] ss:$16 sps:$4 sm:$0xff]  }
  0x9d   :  { %1535 = vmatmul.mubr.bf16.gmra.mrb[8].mxu1 %v7614_v46  ;;  %1189 = vmatprep.mubr.bf16.mxu0 %v7615_v47  ;;  %v7695_v46 = vld [vmem:[#allocation5 + $0x20c] ss:$16 sps:$4 sm:$0xff]   ;;  %v7697_v47 = vld [vmem:[#allocation5 + $0x200] ss:$16 sps:$4 sm:$0xff]  }
  0x9e   :  { %1542 = vmatprep.mubr.bf16.mxu1 %v7617_v48  ;;  %v7698_v48 = vld [vmem:[#allocation5 + $0x208] ss:$16 sps:$4 sm:$0xff]  }
  0xa4   :  { %1190 = vmatmul.mubr.bf16.gmra.mrb[12].mxu0 %v7619_v49  ;;  %v7699_v49 = vld [vmem:[#allocation5 + $0x224] ss:$16 sps:$4 sm:$0xff]  }
  0xa5   :  { %1543 = vmatmul.mubr.bf16.gmra.mrb[12].mxu1 %v7620_v50  ;;  %1197 = vmatprep.mubr.bf16.mxu0 %v7621_v51  ;;  %v7701_v50 = vld [vmem:[#allocation5 + $0x22c] ss:$16 sps:$4 sm:$0xff]   ;;  %v7703_v51 = vld [vmem:[#allocation5 + $0x220] ss:$16 sps:$4 sm:$0xff]  }
  0xa6   :  { %1550 = vmatprep.mubr.bf16.mxu1 %v7623_v52  ;;  %v7704_v52 = vld [vmem:[#allocation5 + $0x228] ss:$16 sps:$4 sm:$0xff]  }
  0xac   :  { %1198 = vmatmul.mubr.bf16.gmra.mrb[16].mxu0 %v7625_v53  ;;  %v7705_v53 = vld [vmem:[#allocation5 + $0x244] ss:$16 sps:$4 sm:$0xff]  }
  0xad   :  { %1551 = vmatmul.mubr.bf16.gmra.mrb[16].mxu1 %v7626_v54  ;;  %1205 = vmatprep.mubr.bf16.mxu0 %v7627_v55  ;;  %v1926_v54 = vld [vmem:[#allocation7 + $0x100] sm:$0xff] }
  0xae   :  { %1558 = vmatprep.mubr.bf16.mxu1 %v7629_v56  ;;  %v1942_v55 = vld [vmem:[#allocation7 + $0x180] sm:$0xff]  ;;  %v1927_v56 = vld [vmem:[#allocation7 + $0x108] sm:$0xff] }
  0xb4   :  { %1206 = vmatmul.mubr.bf16.gmra.mrb[20].mxu0 %v7631_v57  ;;  %v7707_v57 = vld [vmem:[#allocation5 + $0x24c] ss:$16 sps:$4 sm:$0xff]  }
  0xb5   :  { %1559 = vmatmul.mubr.bf16.gmra.mrb[20].mxu1 %v7632_v58  ;;  %1213 = vmatprep.mubr.bf16.mxu0 %v7633_v59  ;;  %v7225_v58 = vcombine.high %v1926_v54, %v1942_v55  ;;  %v1943_v59 = vld [vmem:[#allocation7 + $0x188] sm:$0xff] }
  0xb6   :  { %1566 = vmatprep.mubr.bf16.mxu1 %v7635_v60  ;;  %v7224_v60 = vcombine.low %v1926_v54, %v1942_v55  ;;  %v2006_v54 = vld [vmem:[#allocation7 + $0x380] sm:$0xff]  ;;  %v1991_v55 = vld [vmem:[#allocation7 + $0x308] sm:$0xff] }
  0xb7   :  { %3501 = vmatprep.subr.bf16.mxu0 %v7225_v58  ;;  %v7767_v58 = vld [vmem:[#allocation5 + $0x38c] ss:$16 sps:$4 sm:$0xff]  }
  0xb8   :  { %3502 = vmatpush1.bf16.msra.mxu0 %v7224_v60  ;;  %v2007_v60 = vld [vmem:[#allocation7 + $0x388] sm:$0xff] }
  0xbc   :  { %1214 = vmatmul.mubr.bf16.gmra.mrb[24].mxu0 %v7637_v61  ;;  %v7226_v61 = vcombine.low %v1927_v56, %v1943_v59 }
  0xbd   :  { %1567 = vmatmul.mubr.bf16.gmra.mrb[24].mxu1 %v7638_v62  ;;  %1221 = vmatprep.mubr.bf16.mxu0 %v7639_v63  ;;  %v7227_v62 = vcombine.high %v1927_v56, %v1943_v59  ;;  %v7709_v63 = vld [vmem:[#allocation5 + $0x240] ss:$16 sps:$4 sm:$0xff]  }
  0xbe   :  { %1574 = vmatprep.mubr.bf16.mxu1 %v7641_v1  ;;  %v7710_v1 = vld [vmem:[#allocation5 + $0x248] ss:$16 sps:$4 sm:$0xff]  }
  0xbf   :  { %3544 = vmatprep.subr.bf16.mxu1 %v7227_v62 }
  0xc0   :  { %3545 = vmatpush1.bf16.msra.mxu1 %v7226_v61 }
  0xc4   :  { %1222 = vmatmul.mubr.bf16.gmra.mrb[28].mxu0 %v7643_v2  ;;  %v7711_v2 = vld [vmem:[#allocation5 + $0x264] ss:$16 sps:$4 sm:$0xff]  }
  0xc5   :  { %1575 = vmatmul.mubr.bf16.gmra.mrb[28].mxu1 %v7644_v3  ;;  %1229 = vmatprep.mubr.bf16.mxu0 %v7645_v4  ;;  %v7713_v3 = vld [vmem:[#allocation5 + $0x26c] ss:$16 sps:$4 sm:$0xff]   ;;  %v7715_v4 = vld [vmem:[#allocation5 + $0x260] ss:$16 sps:$4 sm:$0xff]  }
  0xc6   :  { %1582 = vmatprep.mubr.bf16.mxu1 %v7647_v5  ;;  %v7716_v5 = vld [vmem:[#allocation5 + $0x268] ss:$16 sps:$4 sm:$0xff]  }
  0xcc   :  { %1230 = vmatmul.mubr.bf16.gmra.mrb[32].mxu0 %v7649_v6  ;;  %v7717_v6 = vld [vmem:[#allocation5 + $0x284] ss:$16 sps:$4 sm:$0xff]  }
  0xcd   :  { %1583 = vmatmul.mubr.bf16.gmra.mrb[32].mxu1 %v7650_v7  ;;  %1237 = vmatprep.mubr.bf16.mxu0 %v7651_v8  ;;  %v7719_v7 = vld [vmem:[#allocation5 + $0x28c] ss:$16 sps:$4 sm:$0xff]   ;;  %v7721_v8 = vld [vmem:[#allocation5 + $0x280] ss:$16 sps:$4 sm:$0xff]  }
  0xce   :  { %1590 = vmatprep.mubr.bf16.mxu1 %v7653_v9  ;;  %v1842_v25 = vpop.permute.xlu0 %1841  ;;  %v7722_v9 = vld [vmem:[#allocation5 + $0x288] ss:$16 sps:$4 sm:$0xff]  }
  0xcf   :  { %7576 = vpush %v1842_v25 }
  0xd4   :  { %1238 = vmatmul.mubr.bf16.gmra.mrb[36].mxu0 %v7655_v10  ;;  %v7723_v10 = vld [vmem:[#allocation5 + $0x2a4] ss:$16 sps:$4 sm:$0xff]  }
  0xd5   :  { %1591 = vmatmul.mubr.bf16.gmra.mrb[36].mxu1 %v7656_v11  ;;  %1245 = vmatprep.mubr.bf16.mxu0 %v7657_v12  ;;  %v7725_v11 = vld [vmem:[#allocation5 + $0x2ac] ss:$16 sps:$4 sm:$0xff]   ;;  %v7727_v12 = vld [vmem:[#allocation5 + $0x2a0] ss:$16 sps:$4 sm:$0xff]  }
  0xd6   :  { %1598 = vmatprep.mubr.bf16.mxu1 %v7659_v13  ;;  %v7728_v13 = vld [vmem:[#allocation5 + $0x2a8] ss:$16 sps:$4 sm:$0xff]  }
  0xdc   :  { %1246 = vmatmul.mubr.bf16.gmra.mrb[40].mxu0 %v7661_v14  ;;  %v7729_v14 = vld [vmem:[#allocation5 + $0x2c4] ss:$16 sps:$4 sm:$0xff]  }
  0xdd   :  { %1599 = vmatmul.mubr.bf16.gmra.mrb[40].mxu1 %v7662_v15  ;;  %1253 = vmatprep.mubr.bf16.mxu0 %v7663_v16  ;;  %v7731_v15 = vld [vmem:[#allocation5 + $0x2cc] ss:$16 sps:$4 sm:$0xff]   ;;  %v7733_v16 = vld [vmem:[#allocation5 + $0x2c0] ss:$16 sps:$4 sm:$0xff]  }
  0xde   :  { %1606 = vmatprep.mubr.bf16.mxu1 %v7665_v17  ;;  %v7734_v17 = vld [vmem:[#allocation5 + $0x2c8] ss:$16 sps:$4 sm:$0xff]  }
  0xe4   :  { %1254 = vmatmul.mubr.bf16.gmra.mrb[44].mxu0 %v7667_v18  ;;  %v7735_v18 = vld [vmem:[#allocation5 + $0x2e4] ss:$16 sps:$4 sm:$0xff]  }
  0xe5   :  { %1607 = vmatmul.mubr.bf16.gmra.mrb[44].mxu1 %v7668_v19  ;;  %1261 = vmatprep.mubr.bf16.mxu0 %v7669_v20  ;;  %v1958_v19 = vld [vmem:[#allocation7 + $0x200] sm:$0xff] }
  0xe6   :  { %1614 = vmatprep.mubr.bf16.mxu1 %v7671_v21  ;;  %v1974_v20 = vld [vmem:[#allocation7 + $0x280] sm:$0xff]  ;;  %v1959_v21 = vld [vmem:[#allocation7 + $0x208] sm:$0xff] }
  0xe7   :  { %v7256_v25 = vcombine.low %v1958_v19, %v1974_v20 }
  0xec   :  { %1262 = vmatmul.mubr.bf16.gmra.mrb[48].mxu0 %v7673_v22  ;;  %v7737_v22 = vld [vmem:[#allocation5 + $0x2ec] ss:$16 sps:$4 sm:$0xff]  }
  0xed   :  { %1615 = vmatmul.mubr.bf16.gmra.mrb[48].mxu1 %v7674_v23  ;;  %1269 = vmatprep.mubr.bf16.mxu0 %v7675_v24  ;;  %v7257_v23 = vcombine.high %v1958_v19, %v1974_v20  ;;  %v1975_v24 = vld [vmem:[#allocation7 + $0x288] sm:$0xff]  ;;  %v7775_v20 = vld [vmem:[#allocation5 + $0x3a0] ss:$16 sps:$4 sm:$0xff]  }
  0xee   :  { %1622 = vmatprep.mubr.bf16.mxu1 %v7677_v29  ;;  %v7258_v26 = vcombine.low %v1959_v21, %v1975_v24  ;;  %v7259_v27 = vcombine.high %v1959_v21, %v1975_v24  ;;  %v7740_v29 = vld [vmem:[#allocation5 + $0x2e8] ss:$16 sps:$4 sm:$0xff]  }
  0xef   :  { %3503 = vmatprep.subr.bf16.mxu0 %v7257_v23  ;;  %v7776_v24 = vld [vmem:[#allocation5 + $0x3a8] ss:$16 sps:$4 sm:$0xff]  }
  0xf0   :  { %3546 = vmatprep.subr.bf16.mxu1 %v7259_v27  ;;  %3504 = vmatpush1.bf16.msra.mxu0 %v7256_v25  ;;  %v7777_v25 = vld [vmem:[#allocation5 + $0x3c4] ss:$16 sps:$4 sm:$0xff]  }
  0xf1   :  { %3547 = vmatpush1.bf16.msra.mxu1 %v7258_v26 }
  0xf4   :  { %1270 = vmatmul.mubr.bf16.gmra.mrb[52].mxu0 %v7679_v35  ;;  %v7749_v35 = vld [vmem:[#allocation5 + $0x32c] ss:$16 sps:$4 sm:$0xff]  }
  0xf5   :  { %1623 = vmatmul.mubr.bf16.gmra.mrb[52].mxu1 %v7680_v36  ;;  %1277 = vmatprep.mubr.bf16.mxu0 %v7681_v37  ;;  %v7751_v36 = vld [vmem:[#allocation5 + $0x320] ss:$16 sps:$4 sm:$0xff]   ;;  %v7752_v37 = vld [vmem:[#allocation5 + $0x328] ss:$16 sps:$4 sm:$0xff]  }
  0xf6   :  { %1630 = vmatprep.mubr.bf16.mxu1 %v7683_v38  ;;  %v7753_v38 = vld [vmem:[#allocation5 + $0x344] ss:$16 sps:$4 sm:$0xff]  }
  0xfc   :  { %1278 = vmatmul.mubr.bf16.gmra.mrb[56].mxu0 %v7685_v39  ;;  %v7755_v39 = vld [vmem:[#allocation5 + $0x34c] ss:$16 sps:$4 sm:$0xff]  }
  0xfd   :  { %1631 = vmatmul.mubr.bf16.gmra.mrb[56].mxu1 %v7686_v40  ;;  %1285 = vmatprep.mubr.bf16.mxu0 %v7687_v41  ;;  %v7757_v40 = vld [vmem:[#allocation5 + $0x340] ss:$16 sps:$4 sm:$0xff]   ;;  %v7758_v41 = vld [vmem:[#allocation5 + $0x348] ss:$16 sps:$4 sm:$0xff]  }
  0xfe   :  { %1638 = vmatprep.mubr.bf16.mxu1 %v7689_v42  ;;  %v7759_v42 = vld [vmem:[#allocation5 + $0x364] ss:$16 sps:$4 sm:$0xff]  }
 0x100   :  { %s7577_s21 = spop %7576 }
 0x104   :  { %1286 = vmatmul.mubr.bf16.gmra.mrb[60].mxu0 %v7691_v43  ;;  %v7761_v43 = vld [vmem:[#allocation5 + $0x36c] ss:$16 sps:$4 sm:$0xff]  }
 0x105   :  { %1639 = vmatmul.mubr.bf16.gmra.mrb[60].mxu1 %v7692_v44  ;;  %1293 = vmatprep.mubr.bf16.mxu0 %v7693_v45  ;;  %v7763_v45 = vld [vmem:[#allocation5 + $0x360] ss:$16 sps:$4 sm:$0xff]  }
 0x106   :  { %1646 = vmatprep.mubr.bf16.mxu1 %v7695_v46 }
 0x10c   :  { %1294 = vmatmul.mubr.bf16.gmra.mrb[64].mxu0 %v7697_v47 }
 0x10d   :  { %1647 = vmatmul.mubr.bf16.gmra.mrb[64].mxu1 %v7698_v48  ;;  %1301 = vmatprep.mubr.bf16.mxu0 %v7699_v49  ;;  %v7764_v48 = vld [vmem:[#allocation5 + $0x368] ss:$16 sps:$4 sm:$0xff]   ;;  %v7765_v49 = vld [vmem:[#allocation5 + $0x384] ss:$16 sps:$4 sm:$0xff]  }
 0x10e   :  { %1654 = vmatprep.mubr.bf16.mxu1 %v7701_v50 }
 0x114   :  { %1302 = vmatmul.mubr.bf16.gmra.mrb[68].mxu0 %v7703_v51 }
 0x115   :  { %1655 = vmatmul.mubr.bf16.gmra.mrb[68].mxu1 %v7704_v52  ;;  %1309 = vmatprep.mubr.bf16.mxu0 %v7705_v53  ;;  %v1990_v53 = vld [vmem:[#allocation7 + $0x300] sm:$0xff] }
 0x116   :  { %1662 = vmatprep.mubr.bf16.mxu1 %v7707_v57  ;;  %v7289_v59 = vcombine.high %v1990_v53, %v2006_v54 }
 0x118   :  { %3505 = vmatprep.subr.bf16.mxu0 %v7289_v59  ;;  %v7791_v59 = vld [vmem:[#allocation5 + $0x40c] ss:$16 sps:$4 sm:$0xff]  }
 0x11c   :  { %1310 = vmatmul.mubr.bf16.gmra.mrb[72].mxu0 %v7709_v63  ;;  %v7288_v63 = vcombine.low %v1990_v53, %v2006_v54  ;;  %v7788_v54 = vld [vmem:[#allocation5 + $0x3e8] ss:$16 sps:$4 sm:$0xff]  }
 0x11d   :  { %1663 = vmatmul.mubr.bf16.gmra.mrb[72].mxu1 %v7710_v1  ;;  %1317 = vmatprep.mubr.bf16.mxu0 %v7711_v2  ;;  %v7290_v1 = vcombine.low %v1991_v55, %v2007_v60  ;;  %v7291_v2 = vcombine.high %v1991_v55, %v2007_v60  ;;  %v7789_v55 = vld [vmem:[#allocation5 + $0x404] ss:$16 sps:$4 sm:$0xff]  }
 0x11e   :  { %1670 = vmatprep.mubr.bf16.mxu1 %v7713_v3  ;;  %3506 = vmatpush1.bf16.msra.mxu0 %v7288_v63 }
 0x11f   :  { %3548 = vmatprep.subr.bf16.mxu1 %v7291_v2 }
 0x120   :  { %3549 = vmatpush1.bf16.msra.mxu1 %v7290_v1 }
 0x124   :  { %1318 = vmatmul.mubr.bf16.gmra.mrb[76].mxu0 %v7715_v4 }
 0x125   :  { %1671 = vmatmul.mubr.bf16.gmra.mrb[76].mxu1 %v7716_v5  ;;  %1325 = vmatprep.mubr.bf16.mxu0 %v7717_v6  ;;  %v7769_v6 = vld [vmem:[#allocation5 + $0x380] ss:$16 sps:$4 sm:$0xff]  }
 0x126   :  { %1678 = vmatprep.mubr.bf16.mxu1 %v7719_v7 }
 0x12c   :  { %1326 = vmatmul.mubr.bf16.gmra.mrb[80].mxu0 %v7721_v8 }
 0x12d   :  { %1679 = vmatmul.mubr.bf16.gmra.mrb[80].mxu1 %v7722_v9  ;;  %1333 = vmatprep.mubr.bf16.mxu0 %v7723_v10  ;;  %v7770_v10 = vld [vmem:[#allocation5 + $0x388] ss:$16 sps:$4 sm:$0xff]  }
 0x12e   :  { %1686 = vmatprep.mubr.bf16.mxu1 %v7725_v11  ;;  %v7771_v11 = vld [vmem:[#allocation5 + $0x3a4] ss:$16 sps:$4 sm:$0xff]  }
 0x134   :  { %1334 = vmatmul.mubr.bf16.gmra.mrb[84].mxu0 %v7727_v12 }
 0x135   :  { %1687 = vmatmul.mubr.bf16.gmra.mrb[84].mxu1 %v7728_v13  ;;  %1341 = vmatprep.mubr.bf16.mxu0 %v7729_v14  ;;  %v7773_v14 = vld [vmem:[#allocation5 + $0x3ac] ss:$16 sps:$4 sm:$0xff]  }
 0x136   :  { %1694 = vmatprep.mubr.bf16.mxu1 %v7731_v15 }
 0x13c   :  { %1342 = vmatmul.mubr.bf16.gmra.mrb[88].mxu0 %v7733_v16 }
 0x13d   :  { %1695 = vmatmul.mubr.bf16.gmra.mrb[88].mxu1 %v7734_v17  ;;  %1349 = vmatprep.mubr.bf16.mxu0 %v7735_v18 }
 0x13e   :  { %1702 = vmatprep.mubr.bf16.mxu1 %v7737_v22 }
 0x144   :  { %1350 = vmatmul.mubr.bf16.gmra.mrb[92].mxu0 %v7739_v28  ;;  %v7779_v28 = vld [vmem:[#allocation5 + $0x3cc] ss:$16 sps:$4 sm:$0xff]  }
 0x145   :  { %1703 = vmatmul.mubr.bf16.gmra.mrb[92].mxu1 %v7740_v29  ;;  %1357 = vmatprep.mubr.bf16.mxu0 %v7741_v30 }
 0x146   :  { %1710 = vmatprep.mubr.bf16.mxu1 %v7743_v31 }
 0x14c   :  { %1358 = vmatmul.mubr.bf16.gmra.mrb[96].mxu0 %v7745_v32 }
 0x14d   :  { %1711 = vmatmul.mubr.bf16.gmra.mrb[96].mxu1 %v7746_v33  ;;  %1365 = vmatprep.mubr.bf16.mxu0 %v7747_v34  ;;  %v7781_v34 = vld [vmem:[#allocation5 + $0x3c0] ss:$16 sps:$4 sm:$0xff]  }
 0x14e   :  { %1718 = vmatprep.mubr.bf16.mxu1 %v7749_v35 }
 0x154   :  { %1366 = vmatmul.mubr.bf16.gmra.mrb[100].mxu0 %v7751_v36 }
 0x155   :  { %1719 = vmatmul.mubr.bf16.gmra.mrb[100].mxu1 %v7752_v37  ;;  %1373 = vmatprep.mubr.bf16.mxu0 %v7753_v38  ;;  %v7782_v38 = vld [vmem:[#allocation5 + $0x3c8] ss:$16 sps:$4 sm:$0xff]  }
 0x156   :  { %1726 = vmatprep.mubr.bf16.mxu1 %v7755_v39  ;;  %v7783_v39 = vld [vmem:[#allocation5 + $0x3e4] ss:$16 sps:$4 sm:$0xff]  }
 0x15c   :  { %1374 = vmatmul.mubr.bf16.gmra.mrb[104].mxu0 %v7757_v40 }
 0x15d   :  { %1727 = vmatmul.mubr.bf16.gmra.mrb[104].mxu1 %v7758_v41  ;;  %1381 = vmatprep.mubr.bf16.mxu0 %v7759_v42  ;;  %v7785_v42 = vld [vmem:[#allocation5 + $0x3ec] ss:$16 sps:$4 sm:$0xff]  }
 0x15e   :  { %1734 = vmatprep.mubr.bf16.mxu1 %v7761_v43 }
 0x15f   :  { %v1167_v44 = vpop.f32.mrb[0].mxu0 }
 0x160   :  { %v1520_v46 = vpop.f32.mrb[0].mxu1  ;;  %v1169_v47 = vpop.f32.mrb[1].mxu0 }
 0x161   :  { %v8291_v50 = vadd.f32 %v1520_v46, %v1167_v44  ;;  %v1522_v51 = vpop.f32.mrb[1].mxu1  ;;  %v1170_v52 = vpop.f32.mrb[2].mxu0 }
 0x162   :  { %v1523_v56 = vpop.f32.mrb[2].mxu1  ;;  %v1172_v57 = vpop.f32.mrb[3].mxu0 }
 0x163   :  { %v8293_v61 = vadd.f32 %v1523_v56, %v1170_v52  ;;  %v1525_v62 = vpop.f32.mrb[3].mxu1 }
 0x164   :  { %1382 = vmatmul.mubr.bf16.gmra.mrb[108].mxu0 %v7763_v45  ;;  %v8305_v45 = vstv %s7577_s21 }
 0x165   :  { %1735 = vmatmul.mubr.bf16.gmra.mrb[108].mxu1 %v7764_v48  ;;  %1389 = vmatprep.mubr.bf16.mxu0 %v7765_v49  ;;  %v7787_v49 = vld [vmem:[#allocation5 + $0x3e0] ss:$16 sps:$4 sm:$0xff]  }
 0x166   :  { %1742 = vmatprep.mubr.bf16.mxu1 %v7767_v58 }
 0x167   :  { %v1175_v3 = vpop.f32.mrb[4].mxu0 }
 0x168   :  { %v1528_v4 = vpop.f32.mrb[4].mxu1  ;;  %v1177_v5 = vpop.f32.mrb[5].mxu0 }
 0x169   :  { %v8295_v7 = vadd.f32 %v1528_v4, %v1175_v3  ;;  %v1530_v8 = vpop.f32.mrb[5].mxu1  ;;  %v1178_v9 = vpop.f32.mrb[6].mxu0  ;;  %v7793_v4 = vld [vmem:[#allocation5 + $0x400] ss:$16 sps:$4 sm:$0xff]  }
 0x16a   :  { %v1531_v12 = vpop.f32.mrb[6].mxu1  ;;  %v1180_v13 = vpop.f32.mrb[7].mxu0  ;;  %v7794_v8 = vld [vmem:[#allocation5 + $0x408] ss:$16 sps:$4 sm:$0xff]  }
 0x16b   :  { %9222 = vst [vmem:[#allocation15_spill] sm:$0xff] %v8295_v7  ;;  %v8297_v15 = vadd.f32 %v1531_v12, %v1178_v9  ;;  %v1533_v16 = vpop.f32.mrb[7].mxu1  ;;  %v7795_v9 = vld [vmem:[#allocation5 + $0x424] ss:$16 sps:$4 sm:$0xff]  }
 0x16c   :  { %1390 = vmatmul.mubr.bf16.gmra.mrb[112].mxu0 %v7769_v6  ;;  %v2022_v16 = vld [vmem:[#allocation7 + $0x400] sm:$0xff] }
 0x16d   :  { %9223 = vst [vmem:[#allocation16_spill] sm:$0xff] %v8297_v15  ;;  %1743 = vmatmul.mubr.bf16.gmra.mrb[112].mxu1 %v7770_v10  ;;  %1397 = vmatprep.mubr.bf16.mxu0 %v7771_v11 }
 0x16e   :  { %1750 = vmatprep.mubr.bf16.mxu1 %v7773_v14 }
 0x16f   :  { %v1183_v17 = vpop.f32.mrb[8].mxu0 }
 0x170   :  { %v1536_v18 = vpop.f32.mrb[8].mxu1  ;;  %v1185_v19 = vpop.f32.mrb[9].mxu0 }
 0x171   :  { %v1537_v21 = vadd.f32 %v1536_v18, %v1183_v17  ;;  %v1538_v22 = vpop.f32.mrb[9].mxu1  ;;  %v1186_v23 = vpop.f32.mrb[10].mxu0  ;;  %v2038_v17 = vld [vmem:[#allocation7 + $0x480] sm:$0xff]  ;;  %v2023_v18 = vld [vmem:[#allocation7 + $0x408] sm:$0xff] }
 0x172   :  { %v1539_v26 = vpop.f32.mrb[10].mxu1  ;;  %v1188_v27 = vpop.f32.mrb[11].mxu0  ;;  %v7320_v22 = vcombine.low %v2022_v16, %v2038_v17 }
 0x173   :  { %v8299_v29 = vadd.f32 %v1539_v26, %v1186_v23  ;;  %v1541_v30 = vpop.f32.mrb[11].mxu1  ;;  %v1846_v56 = vadd.f32 %v8305_v45, %v1537_v21  ;;  %v7797_v21 = vld [vmem:[#allocation5 + $0x42c] ss:$16 sps:$4 sm:$0xff]   ;;  %v7321_v23 = vcombine.high %v2022_v16, %v2038_v17 }
 0x174   :  { %1398 = vmatmul.mubr.bf16.gmra.mrb[116].mxu0 %v7775_v20 }
 0x175   :  { %1751 = vmatmul.mubr.bf16.gmra.mrb[116].mxu1 %v7776_v24  ;;  %1405 = vmatprep.mubr.bf16.mxu0 %v7777_v25  ;;  %v1862_v1 = vmax.f32 %v1846_v56, 0.0  ;;  %v2039_v24 = vld [vmem:[#allocation7 + $0x488] sm:$0xff]  ;;  %v7805_v56 = vld [vmem:[#allocation5 + $0x440] ss:$16 sps:$4 sm:$0xff]  }
 0x176   :  { %1758 = vmatprep.mubr.bf16.mxu1 %v7779_v28  ;;  %v7322_v28 = vcombine.low %v2023_v18, %v2039_v24  ;;  %v7323_v30 = vcombine.high %v2023_v18, %v2039_v24  ;;  %3507 = vmatprep.subr.bf16.mxu0 %v7321_v23  ;;  %v7815_v23 = vld [vmem:[#allocation5 + $0x48c] ss:$16 sps:$4 sm:$0xff]  }
 0x177   :  { %v1191_v31 = vpop.f32.mrb[12].mxu0  ;;  %v1878_v14 = vpack.c.bf16 %v1862_v1, %v1862_v1  ;;  %3508 = vmatpush1.bf16.msra.mxu0 %v7320_v22 }
 0x178   :  { %v1544_v32 = vpop.f32.mrb[12].mxu1  ;;  %v1193_v33 = vpop.f32.mrb[13].mxu0  ;;  %3550 = vmatprep.subr.bf16.mxu1 %v7323_v30 }
 0x179   :  { %v8301_v35 = vadd.f32 %v1544_v32, %v1191_v31  ;;  %v1546_v36 = vpop.f32.mrb[13].mxu1  ;;  %v1194_v37 = vpop.f32.mrb[14].mxu0  ;;  %v2166_v32 = vunpack.c.l.b16 %v1878_v14  ;;  %3551 = vmatpush1.bf16.msra.mxu1 %v7322_v28 }
 0x17a   :  { %v1547_v40 = vpop.f32.mrb[14].mxu1  ;;  %v1196_v41 = vpop.f32.mrb[15].mxu0 }
 0x17b   :  { %v8303_v43 = vadd.f32 %v1547_v40, %v1194_v37  ;;  %v1549_v44 = vpop.f32.mrb[15].mxu1 }
 0x17c   :  { %1406 = vmatmul.mubr.bf16.gmra.mrb[120].mxu0 %v7781_v34  ;;  %v7801_v44 = vld [vmem:[#allocation5 + $0x444] ss:$16 sps:$4 sm:$0xff]  }
 0x17d   :  { %9224 = vst [vmem:[#allocation17_spill] sm:$0xff] %v8303_v43  ;;  %1759 = vmatmul.mubr.bf16.gmra.mrb[120].mxu1 %v7782_v38  ;;  %1413 = vmatprep.mubr.bf16.mxu0 %v7783_v39  ;;  %v7799_v38 = vld [vmem:[#allocation5 + $0x420] ss:$16 sps:$4 sm:$0xff]  }
 0x17e   :  { %1766 = vmatprep.mubr.bf16.mxu1 %v7785_v42  ;;  %v7800_v42 = vld [vmem:[#allocation5 + $0x428] ss:$16 sps:$4 sm:$0xff]  }
 0x17f   :  { %v1199_v46 = vpop.f32.mrb[16].mxu0 }
 0x180   :  { %v1552_v47 = vpop.f32.mrb[16].mxu1  ;;  %v1201_v48 = vpop.f32.mrb[17].mxu0 }
 0x181   :  { %v8307_v51 = vadd.f32 %v1552_v47, %v1199_v46  ;;  %v1554_v52 = vpop.f32.mrb[17].mxu1  ;;  %v1202_v53 = vpop.f32.mrb[18].mxu0  ;;  %v7803_v48 = vld [vmem:[#allocation5 + $0x44c] ss:$16 sps:$4 sm:$0xff]  }
 0x182   :  { %v1555_v57 = vpop.f32.mrb[18].mxu1  ;;  %v1204_v58 = vpop.f32.mrb[19].mxu0 }
 0x183   :  { %9225 = vst [vmem:[#allocation18_spill] sm:$0xff] %v8307_v51  ;;  %v1556_v60 = vadd.f32 %v1555_v57, %v1202_v53  ;;  %v1557_v62 = vpop.f32.mrb[19].mxu1 }
 0x184   :  { %1414 = vmatmul.mubr.bf16.gmra.mrb[124].mxu0 %v7787_v49  ;;  %v7807_v62 = vld [vmem:[#allocation5 + $0x464] ss:$16 sps:$4 sm:$0xff]  }
 0x185   :  { %v1847_v63 = vadd.f32 %v8305_v45, %v1556_v60  ;;  %1767 = vmatmul.mubr.bf16.gmra.mrb[124].mxu1 %v7788_v54  ;;  %1421 = vmatprep.mubr.bf16.mxu0 %v7789_v55  ;;  %v7806_v60 = vld [vmem:[#allocation5 + $0x448] ss:$16 sps:$4 sm:$0xff]  }
 0x186   :  { %1774 = vmatprep.mubr.bf16.mxu1 %v7791_v59 }
 0x187   :  { %v1863_v2 = vmax.f32 %v1847_v63, 0.0  ;;  %v1207_v3 = vpop.f32.mrb[20].mxu0 }
 0x188   :  { %v1560_v5 = vpop.f32.mrb[20].mxu1  ;;  %v1209_v6 = vpop.f32.mrb[21].mxu0 }
 0x189   :  { %v1879_v10 = vpack.c.bf16 %v1863_v2, %v1863_v2  ;;  %v8311_v11 = vadd.f32 %v1560_v5, %v1207_v3  ;;  %v1562_v12 = vpop.f32.mrb[21].mxu1  ;;  %v1210_v13 = vpop.f32.mrb[22].mxu0  ;;  %v7809_v2 = vld [vmem:[#allocation5 + $0x46c] ss:$16 sps:$4 sm:$0xff]  }
 0x18a   :  { %v1563_v19 = vpop.f32.mrb[22].mxu1  ;;  %v1212_v20 = vpop.f32.mrb[23].mxu0 }
 0x18b   :  { %v2167_v25 = vunpack.c.l.b16 %v1879_v10  ;;  %v8313_v26 = vadd.f32 %v1563_v19, %v1210_v13  ;;  %v1565_v27 = vpop.f32.mrb[23].mxu1  ;;  %v7811_v13 = vld [vmem:[#allocation5 + $0x460] ss:$16 sps:$4 sm:$0xff]   ;;  %v7812_v19 = vld [vmem:[#allocation5 + $0x468] ss:$16 sps:$4 sm:$0xff]  }
 0x18c   :  { %1422 = vmatmul.mubr.bf16.gmra.mrb[128].mxu0 %v7793_v4  ;;  %v7813_v20 = vld [vmem:[#allocation5 + $0x484] ss:$16 sps:$4 sm:$0xff]  }
 0x18d   :  { %v2182_v31 = vrot.slane %v2167_v25, 7  ;;  %1775 = vmatmul.mubr.bf16.gmra.mrb[128].mxu1 %v7794_v8  ;;  %1429 = vmatprep.mubr.bf16.mxu0 %v7795_v9 }
 0x18e   :  { %1782 = vmatprep.mubr.bf16.mxu1 %v7797_v21 }
 0x18f   :  { %v1215_v33 = vpop.f32.mrb[24].mxu0  ;;  %v2184_v34 = vsel %vm2183_vm0, %v2182_v31, %v2166_v32 }
 0x190   :  { %v1568_v36 = vpop.f32.mrb[24].mxu1  ;;  %v1217_v37 = vpop.f32.mrb[25].mxu0 }
 0x191   :  { %v8316_v39 = vadd.f32 %v1568_v36, %v1215_v33  ;;  %v1570_v40 = vpop.f32.mrb[25].mxu1  ;;  %v1218_v41 = vpop.f32.mrb[26].mxu0  ;;  %v7817_v33 = vld [vmem:[#allocation5 + $0x480] ss:$16 sps:$4 sm:$0xff]  }
 0x192   :  { %v1571_v46 = vpop.f32.mrb[26].mxu1  ;;  %v1220_v47 = vpop.f32.mrb[27].mxu0  ;;  %v7818_v40 = vld [vmem:[#allocation5 + $0x488] ss:$16 sps:$4 sm:$0xff]  }
 0x193   :  { %9226 = vst [vmem:[#allocation19_spill] sm:$0xff] %v8316_v39  ;;  %v8318_v49 = vadd.f32 %v1571_v46, %v1218_v41  ;;  %v1573_v52 = vpop.f32.mrb[27].mxu1  ;;  %v7819_v41 = vld [vmem:[#allocation5 + $0x4a4] ss:$16 sps:$4 sm:$0xff]   ;;  %v7821_v46 = vld [vmem:[#allocation5 + $0x4ac] ss:$16 sps:$4 sm:$0xff]  }
 0x194   :  { %1430 = vmatmul.mubr.bf16.gmra.mrb[132].mxu0 %v7799_v38 }
 0x195   :  { %9227 = vst [vmem:[#allocation20_spill] sm:$0xff] %v8318_v49  ;;  %1783 = vmatmul.mubr.bf16.gmra.mrb[132].mxu1 %v7800_v42  ;;  %1437 = vmatprep.mubr.bf16.mxu0 %v7801_v44 }
 0x196   :  { %1790 = vmatprep.mubr.bf16.mxu1 %v7803_v48 }
 0x197   :  { %v1223_v53 = vpop.f32.mrb[28].mxu0 }
 0x198   :  { %v1576_v54 = vpop.f32.mrb[28].mxu1  ;;  %v1225_v55 = vpop.f32.mrb[29].mxu0 }
 0x199   :  { %v1577_v57 = vadd.f32 %v1576_v54, %v1223_v53  ;;  %v1578_v58 = vpop.f32.mrb[29].mxu1  ;;  %v1226_v59 = vpop.f32.mrb[30].mxu0  ;;  %v7823_v54 = vld [vmem:[#allocation5 + $0x4a0] ss:$16 sps:$4 sm:$0xff]  }
 0x19a   :  { %v1579_v63 = vpop.f32.mrb[30].mxu1  ;;  %v1228_v1 = vpop.f32.mrb[31].mxu0  ;;  %v7825_v58 = vld [vmem:[#allocation5 + $0x4c4] ss:$16 sps:$4 sm:$0xff]  }
 0x19b   :  { %v1848_v3 = vadd.f32 %v8305_v45, %v1577_v57  ;;  %v8321_v4 = vadd.f32 %v1579_v63, %v1226_v59  ;;  %v1581_v5 = vpop.f32.mrb[31].mxu1  ;;  %v7824_v57 = vld [vmem:[#allocation5 + $0x4a8] ss:$16 sps:$4 sm:$0xff]   ;;  %v2054_v1 = vld [vmem:[#allocation7 + $0x500] sm:$0xff] }
 0x19c   :  { %1438 = vmatmul.mubr.bf16.gmra.mrb[136].mxu0 %v7805_v56 }
 0x19d   :  { %v1864_v6 = vmax.f32 %v1848_v3, 0.0  ;;  %1791 = vmatmul.mubr.bf16.gmra.mrb[136].mxu1 %v7806_v60  ;;  %1445 = vmatprep.mubr.bf16.mxu0 %v7807_v62  ;;  %v2055_v3 = vld [vmem:[#allocation7 + $0x508] sm:$0xff] }
 0x19e   :  { %1798 = vmatprep.mubr.bf16.mxu1 %v7809_v2  ;;  %v2070_v2 = vld [vmem:[#allocation7 + $0x580] sm:$0xff] }
 0x19f   :  { %v1880_v8 = vpack.c.bf16 %v1864_v6, %v1864_v6  ;;  %v1231_v9 = vpop.f32.mrb[32].mxu0 }
 0x1a0   :  { %v1584_v10 = vpop.f32.mrb[32].mxu1  ;;  %v1233_v12 = vpop.f32.mrb[33].mxu0 }
 0x1a1   :  { %v2168_v14 = vunpack.c.l.b16 %v1880_v8  ;;  %v8323_v16 = vadd.f32 %v1584_v10, %v1231_v9  ;;  %v1586_v17 = vpop.f32.mrb[33].mxu1  ;;  %v1234_v18 = vpop.f32.mrb[34].mxu0  ;;  %v7827_v8 = vld [vmem:[#allocation5 + $0x4cc] ss:$16 sps:$4 sm:$0xff]   ;;  %v7352_v9 = vcombine.low %v2054_v1, %v2070_v2  ;;  %v7353_v10 = vcombine.high %v2054_v1, %v2070_v2 }
 0x1a2   :  { %v1587_v21 = vpop.f32.mrb[34].mxu1  ;;  %v1236_v22 = vpop.f32.mrb[35].mxu0  ;;  %v2071_v12 = vld [vmem:[#allocation7 + $0x588] sm:$0xff] }
 0x1a3   :  { %v2185_v24 = vrot.slane %v2168_v14, 6  ;;  %v8325_v25 = vadd.f32 %v1587_v21, %v1234_v18  ;;  %v1589_v27 = vpop.f32.mrb[35].mxu1  ;;  %v7354_v18 = vcombine.low %v2055_v3, %v2071_v12  ;;  %3509 = vmatprep.subr.bf16.mxu0 %v7353_v10 }
 0x1a4   :  { %1446 = vmatmul.mubr.bf16.gmra.mrb[140].mxu0 %v7811_v13  ;;  %v7829_v27 = vld [vmem:[#allocation5 + $0x4c0] ss:$16 sps:$4 sm:$0xff]  }
 0x1a5   :  { %9228 = vst [vmem:[#allocation21_spill] sm:$0xff] %v8325_v25  ;;  %1799 = vmatmul.mubr.bf16.gmra.mrb[140].mxu1 %v7812_v19  ;;  %1453 = vmatprep.mubr.bf16.mxu0 %v7813_v20  ;;  %v2187_v28 = vsel %vm2186_vm1, %v2185_v24, %v2184_v34  ;;  %v7355_v19 = vcombine.high %v2055_v3, %v2071_v12  ;;  %v2132_v25 = vld [vmem:[#allocation7 + $0x770] sm:$0xff] }
 0x1a6   :  { %1806 = vmatprep.mubr.bf16.mxu1 %v7815_v23  ;;  %3510 = vmatpush1.bf16.msra.mxu0 %v7352_v9 }
 0x1a7   :  { %v1239_v30 = vpop.f32.mrb[36].mxu0  ;;  %3552 = vmatprep.subr.bf16.mxu1 %v7355_v19 }
 0x1a8   :  { %v1592_v31 = vpop.f32.mrb[36].mxu1  ;;  %v1241_v32 = vpop.f32.mrb[37].mxu0  ;;  %3553 = vmatpush1.bf16.msra.mxu1 %v7354_v18 }
 0x1a9   :  { %v8328_v36 = vadd.f32 %v1592_v31, %v1239_v30  ;;  %v1594_v37 = vpop.f32.mrb[37].mxu1  ;;  %v1242_v38 = vpop.f32.mrb[38].mxu0 }
 0x1aa   :  { %v1595_v42 = vpop.f32.mrb[38].mxu1  ;;  %v1244_v44 = vpop.f32.mrb[39].mxu0  ;;  %v7831_v37 = vld [vmem:[#allocation5 + $0x4e4] ss:$16 sps:$4 sm:$0xff]  }
 0x1ab   :  { %9229 = vst [vmem:[#allocation22_spill] sm:$0xff] %v8328_v36  ;;  %v1596_v47 = vadd.f32 %v1595_v42, %v1242_v38  ;;  %v1597_v48 = vpop.f32.mrb[39].mxu1 }
 0x1ac   :  { %1454 = vmatmul.mubr.bf16.gmra.mrb[144].mxu0 %v7817_v33  ;;  %v7830_v33 = vld [vmem:[#allocation5 + $0x4c8] ss:$16 sps:$4 sm:$0xff]   ;;  %v7835_v48 = vld [vmem:[#allocation5 + $0x4e0] ss:$16 sps:$4 sm:$0xff]  }
 0x1ad   :  { %v1849_v52 = vadd.f32 %v8305_v45, %v1596_v47  ;;  %1807 = vmatmul.mubr.bf16.gmra.mrb[144].mxu1 %v7818_v40  ;;  %1461 = vmatprep.mubr.bf16.mxu0 %v7819_v41  ;;  %v7833_v41 = vld [vmem:[#allocation5 + $0x4ec] ss:$16 sps:$4 sm:$0xff]  }
 0x1ae   :  { %1814 = vmatprep.mubr.bf16.mxu1 %v7821_v46 }
 0x1af   :  { %v1865_v34 = vmax.f32 %v1849_v52, 0.0  ;;  %v1247_v53 = vpop.f32.mrb[40].mxu0 }
 0x1b0   :  { %v1600_v55 = vpop.f32.mrb[40].mxu1  ;;  %v1249_v56 = vpop.f32.mrb[41].mxu0 }
 0x1b1   :  { %v1881_v59 = vpack.c.bf16 %v1865_v34, %v1865_v34  ;;  %v8331_v60 = vadd.f32 %v1600_v55, %v1247_v53  ;;  %v1602_v62 = vpop.f32.mrb[41].mxu1  ;;  %v1250_v63 = vpop.f32.mrb[42].mxu0 }
 0x1b2   :  { %v1603_v5 = vpop.f32.mrb[42].mxu1  ;;  %v1252_v6 = vpop.f32.mrb[43].mxu0 }
 0x1b3   :  { %v2169_v13 = vunpack.c.l.b16 %v1881_v59  ;;  %v8333_v14 = vadd.f32 %v1603_v5, %v1250_v63  ;;  %v1605_v17 = vpop.f32.mrb[43].mxu1 }
 0x1b4   :  { %1462 = vmatmul.mubr.bf16.gmra.mrb[148].mxu0 %v7823_v54  ;;  %v7836_v54 = vld [vmem:[#allocation5 + $0x4e8] ss:$16 sps:$4 sm:$0xff]  }
 0x1b5   :  { %v2188_v20 = vrot.slane %v2169_v13, 5  ;;  %1815 = vmatmul.mubr.bf16.gmra.mrb[148].mxu1 %v7824_v57  ;;  %1469 = vmatprep.mubr.bf16.mxu0 %v7825_v58 }
 0x1b6   :  { %1822 = vmatprep.mubr.bf16.mxu1 %v7827_v8 }
 0x1b7   :  { %v1255_v21 = vpop.f32.mrb[44].mxu0  ;;  %v2190_v22 = vsel %vm2189_vm2, %v2188_v20, %v2187_v28 }
 0x1b8   :  { %v1608_v23 = vpop.f32.mrb[44].mxu1  ;;  %v1257_v24 = vpop.f32.mrb[45].mxu0 }
 0x1b9   :  { %v8336_v30 = vadd.f32 %v1608_v23, %v1255_v21  ;;  %v1610_v31 = vpop.f32.mrb[45].mxu1  ;;  %v1258_v32 = vpop.f32.mrb[46].mxu0 }
 0x1ba   :  { %v1611_v38 = vpop.f32.mrb[46].mxu1  ;;  %v1260_v40 = vpop.f32.mrb[47].mxu0 }
 0x1bb   :  { %9230 = vst [vmem:[#allocation23_spill] sm:$0xff] %v8336_v30  ;;  %v8338_v42 = vadd.f32 %v1611_v38, %v1258_v32  ;;  %v1613_v44 = vpop.f32.mrb[47].mxu1 }
 0x1bc   :  { %1470 = vmatmul.mubr.bf16.gmra.mrb[152].mxu0 %v7829_v27 }
 0x1bd   :  { %9231 = vst [vmem:[#allocation24_spill] sm:$0xff] %v8338_v42  ;;  %1823 = vmatmul.mubr.bf16.gmra.mrb[152].mxu1 %v7830_v33  ;;  %1477 = vmatprep.mubr.bf16.mxu0 %v7831_v37 }
 0x1be   :  { %1830 = vmatprep.mubr.bf16.mxu1 %v7833_v41 }
 0x1bf   :  { %v1263_v28 = vpop.f32.mrb[48].mxu0 }
 0x1c0   :  { %v1616_v46 = vpop.f32.mrb[48].mxu1  ;;  %v1265_v47 = vpop.f32.mrb[49].mxu0 }
 0x1c1   :  { %v1617_v52 = vadd.f32 %v1616_v46, %v1263_v28  ;;  %v1618_v34 = vpop.f32.mrb[49].mxu1  ;;  %v1266_v53 = vpop.f32.mrb[50].mxu0 }
 0x1c2   :  { %v1619_v55 = vpop.f32.mrb[50].mxu1  ;;  %v1268_v56 = vpop.f32.mrb[51].mxu0  ;;  %v2086_v34 = vld [vmem:[#allocation7 + $0x600] sm:$0xff] }
 0x1c3   :  { %v1850_v57 = vadd.f32 %v8305_v45, %v1617_v52  ;;  %v8341_v58 = vadd.f32 %v1619_v55, %v1266_v53  ;;  %v1621_v59 = vpop.f32.mrb[51].mxu1  ;;  %v2102_v53 = vld [vmem:[#allocation7 + $0x680] sm:$0xff] }
 0x1c4   :  { %1478 = vmatmul.mubr.bf16.gmra.mrb[156].mxu0 %v7835_v48  ;;  %v7385_v59 = vcombine.high %v2086_v34, %v2102_v53 }
 0x1c5   :  { %v1866_v62 = vmax.f32 %v1850_v57, 0.0  ;;  %1831 = vmatmul.mubr.bf16.gmra.mrb[156].mxu1 %v7836_v54  ;;  %3531 = vmatprep.mubr.bf16.mxu0 %v9217_v0  ;;  %v2087_v54 = vld [vmem:[#allocation7 + $0x608] sm:$0xff]  ;;  %v7384_v57 = vcombine.low %v2086_v34, %v2102_v53 }
 0x1c6   :  { %3574 = vmatprep.mubr.bf16.mxu1 %v9217_v0  ;;  %3511 = vmatprep.subr.bf16.mxu0 %v7385_v59 }
 0x1c7   :  { %v1882_v63 = vpack.c.bf16 %v1866_v62, %v1866_v62  ;;  %v1271_v1 = vpop.f32.mrb[52].mxu0  ;;  %v2103_v62 = vld [vmem:[#allocation7 + $0x688] sm:$0xff]  ;;  %3512 = vmatpush1.bf16.msra.mxu0 %v7384_v57 }
 0x1c8   :  { %v1624_v2 = vpop.f32.mrb[52].mxu1  ;;  %v1273_v3 = vpop.f32.mrb[53].mxu0 }
 0x1c9   :  { %v2170_v5 = vunpack.c.l.b16 %v1882_v63  ;;  %v8345_v6 = vadd.f32 %v1624_v2, %v1271_v1  ;;  %v1626_v8 = vpop.f32.mrb[53].mxu1  ;;  %v1274_v9 = vpop.f32.mrb[54].mxu0  ;;  %v7386_v3 = vcombine.low %v2087_v54, %v2103_v62 }
 0x1ca   :  { %v1627_v10 = vpop.f32.mrb[54].mxu1  ;;  %v1276_v12 = vpop.f32.mrb[55].mxu0 }
 0x1cb   :  { %v2191_v13 = vrot.slane %v2170_v5, 4  ;;  %v8347_v17 = vadd.f32 %v1627_v10, %v1274_v9  ;;  %v1629_v18 = vpop.f32.mrb[55].mxu1  ;;  %v7387_v5 = vcombine.high %v2087_v54, %v2103_v62 }
 0x1cd   :  { %9232 = vst [vmem:[#allocation25_spill] sm:$0xff] %v8347_v17  ;;  %v2193_v19 = vsel %vm2192_vm3, %v2191_v13, %v2190_v22  ;;  %3554 = vmatprep.subr.bf16.mxu1 %v7387_v5 }
 0x1ce   :  { %3555 = vmatpush1.bf16.msra.mxu1 %v7386_v3 }
 0x1cf   :  { %v1279_v20 = vpop.f32.mrb[56].mxu0 }
 0x1d0   :  { %v1632_v21 = vpop.f32.mrb[56].mxu1  ;;  %v1281_v23 = vpop.f32.mrb[57].mxu0 }
 0x1d1   :  { %v8350_v24 = vadd.f32 %v1632_v21, %v1279_v20  ;;  %v1634_v27 = vpop.f32.mrb[57].mxu1  ;;  %v1282_v31 = vpop.f32.mrb[58].mxu0 }
 0x1d2   :  { %v1635_v32 = vpop.f32.mrb[58].mxu1  ;;  %v1284_v33 = vpop.f32.mrb[59].mxu0 }
 0x1d3   :  { %9233 = vst [vmem:[#allocation26_spill] sm:$0xff] %v8350_v24  ;;  %v1636_v37 = vadd.f32 %v1635_v32, %v1282_v31  ;;  %v1637_v38 = vpop.f32.mrb[59].mxu1 }
 0x1d5   :  { %v1851_v40 = vadd.f32 %v8305_v45, %v1636_v37 }
 0x1d7   :  { %v1867_v41 = vmax.f32 %v1851_v40, 0.0  ;;  %v1287_v44 = vpop.f32.mrb[60].mxu0 }
 0x1d8   :  { %v1640_v28 = vpop.f32.mrb[60].mxu1  ;;  %v1289_v46 = vpop.f32.mrb[61].mxu0 }
 0x1d9   :  { %v1883_v47 = vpack.c.bf16 %v1867_v41, %v1867_v41  ;;  %v8353_v48 = vadd.f32 %v1640_v28, %v1287_v44  ;;  %v1642_v22 = vpop.f32.mrb[61].mxu1  ;;  %v1290_v52 = vpop.f32.mrb[62].mxu0 }
 0x1da   :  { %v1643_v55 = vpop.f32.mrb[62].mxu1  ;;  %v1292_v56 = vpop.f32.mrb[63].mxu0 }
 0x1db   :  { %v2171_v63 = vunpack.c.l.b16 %v1883_v47  ;;  %v8355_v1 = vadd.f32 %v1643_v55, %v1290_v52  ;;  %v1645_v2 = vpop.f32.mrb[63].mxu1 }
 0x1dd   :  { %v2194_v8 = vrot.slane %v2171_v63, 3 }
 0x1df   :  { %v1295_v9 = vpop.f32.mrb[64].mxu0  ;;  %v2196_v10 = vsel %vm2195_vm4, %v2194_v8, %v2193_v19 }
 0x1e0   :  { %v1648_v12 = vpop.f32.mrb[64].mxu1  ;;  %v1297_v13 = vpop.f32.mrb[65].mxu0 }
 0x1e1   :  { %v8358_v18 = vadd.f32 %v1648_v12, %v1295_v9  ;;  %v1650_v20 = vpop.f32.mrb[65].mxu1  ;;  %v1298_v21 = vpop.f32.mrb[66].mxu0 }
 0x1e2   :  { %v1651_v23 = vpop.f32.mrb[66].mxu1  ;;  %v1300_v27 = vpop.f32.mrb[67].mxu0 }
 0x1e3   :  { %9234 = vst [vmem:[#allocation27_spill] sm:$0xff] %v8358_v18  ;;  %v8360_v31 = vadd.f32 %v1651_v23, %v1298_v21  ;;  %v1653_v32 = vpop.f32.mrb[67].mxu1 }
 0x1e5   :  { %9235 = vst [vmem:[#allocation28_spill] sm:$0xff] %v8360_v31 }
 0x1e7   :  { %v1303_v33 = vpop.f32.mrb[68].mxu0 }
 0x1e8   :  { %v1656_v37 = vpop.f32.mrb[68].mxu1  ;;  %v1305_v38 = vpop.f32.mrb[69].mxu0 }
 0x1e9   :  { %v1657_v40 = vadd.f32 %v1656_v37, %v1303_v33  ;;  %v1658_v41 = vpop.f32.mrb[69].mxu1  ;;  %v1306_v44 = vpop.f32.mrb[70].mxu0 }
 0x1ea   :  { %v1659_v28 = vpop.f32.mrb[70].mxu1  ;;  %v1308_v46 = vpop.f32.mrb[71].mxu0 }
 0x1eb   :  { %v1852_v19 = vadd.f32 %v8305_v45, %v1657_v40  ;;  %v8363_v47 = vadd.f32 %v1659_v28, %v1306_v44  ;;  %v1661_v22 = vpop.f32.mrb[71].mxu1 }
 0x1ed   :  { %v1868_v52 = vmax.f32 %v1852_v19, 0.0 }
 0x1ef   :  { %v1884_v34 = vpack.c.bf16 %v1868_v52, %v1868_v52  ;;  %v1311_v53 = vpop.f32.mrb[72].mxu0 }
 0x1f0   :  { %v1664_v54 = vpop.f32.mrb[72].mxu1  ;;  %v1313_v55 = vpop.f32.mrb[73].mxu0 }
 0x1f1   :  { %v2172_v56 = vunpack.c.l.b16 %v1884_v34  ;;  %v8365_v57 = vadd.f32 %v1664_v54, %v1311_v53  ;;  %v1666_v59 = vpop.f32.mrb[73].mxu1  ;;  %v1314_v62 = vpop.f32.mrb[74].mxu0  ;;  %v2118_v34 = vld [vmem:[#allocation7 + $0x700] sm:$0xff]  ;;  %v2119_v54 = vld [vmem:[#allocation7 + $0x708] sm:$0xff] }
 0x1f2   :  { %v1667_v63 = vpop.f32.mrb[74].mxu1  ;;  %v1316_v2 = vpop.f32.mrb[75].mxu0  ;;  %v2134_v53 = vld [vmem:[#allocation7 + $0x780] sm:$0xff] }
 0x1f3   :  { %v2197_v3 = vrot.slane %v2172_v56, 2  ;;  %v8367_v5 = vadd.f32 %v1667_v63, %v1314_v62  ;;  %v1669_v8 = vpop.f32.mrb[75].mxu1  ;;  %v7416_v59 = vcombine.low %v2118_v34, %v2134_v53  ;;  %v7417_v62 = vcombine.high %v2118_v34, %v2134_v53  ;;  %v2135_v63 = vld [vmem:[#allocation7 + $0x788] sm:$0xff] }
 0x1f5   :  { %9236 = vst [vmem:[#allocation29_spill] sm:$0xff] %v8367_v5  ;;  %v2199_v9 = vsel %vm2198_vm5, %v2197_v3, %v2196_v10  ;;  %3513 = vmatprep.subr.bf16.mxu0 %v7417_v62 }
 0x1f6   :  { %3514 = vmatpush1.bf16.msra.mxu0 %v7416_v59 }
 0x1f7   :  { %v1319_v12 = vpop.f32.mrb[76].mxu0 }
 0x1f8   :  { %v1672_v13 = vpop.f32.mrb[76].mxu1  ;;  %v1321_v20 = vpop.f32.mrb[77].mxu0 }
 0x1f9   :  { %v8370_v21 = vadd.f32 %v1672_v13, %v1319_v12  ;;  %v1674_v23 = vpop.f32.mrb[77].mxu1  ;;  %v1322_v27 = vpop.f32.mrb[78].mxu0  ;;  %v7418_v12 = vcombine.low %v2119_v54, %v2135_v63  ;;  %v7419_v13 = vcombine.high %v2119_v54, %v2135_v63 }
 0x1fa   :  { %v1675_v32 = vpop.f32.mrb[78].mxu1  ;;  %v1324_v33 = vpop.f32.mrb[79].mxu0 }
 0x1fb   :  { %9237 = vst [vmem:[#allocation30_spill] sm:$0xff] %v8370_v21  ;;  %v1676_v37 = vadd.f32 %v1675_v32, %v1322_v27  ;;  %v1677_v38 = vpop.f32.mrb[79].mxu1  ;;  %3556 = vmatprep.subr.bf16.mxu1 %v7419_v13 }
 0x1fc   :  { %3557 = vmatpush1.bf16.msra.mxu1 %v7418_v12 }
 0x1fd   :  { %v1853_v40 = vadd.f32 %v8305_v45, %v1676_v37 }
 0x1ff   :  { %v1869_v41 = vmax.f32 %v1853_v40, 0.0  ;;  %v1327_v44 = vpop.f32.mrb[80].mxu0 }
 0x200   :  { %v1680_v28 = vpop.f32.mrb[80].mxu1  ;;  %v1329_v46 = vpop.f32.mrb[81].mxu0 }
 0x201   :  { %v1885_v19 = vpack.c.bf16 %v1869_v41, %v1869_v41  ;;  %v8373_v22 = vadd.f32 %v1680_v28, %v1327_v44  ;;  %v1682_v10 = vpop.f32.mrb[81].mxu1  ;;  %v1330_v52 = vpop.f32.mrb[82].mxu0 }
 0x202   :  { %v1683_v55 = vpop.f32.mrb[82].mxu1  ;;  %v1332_v56 = vpop.f32.mrb[83].mxu0 }
 0x203   :  { %v2173_v2 = vunpack.c.l.b16 %v1885_v19  ;;  %v8375_v3 = vadd.f32 %v1683_v55, %v1330_v52  ;;  %v1685_v8 = vpop.f32.mrb[83].mxu1 }
 0x205   :  { %v2200_v20 = vrot.slane %v2173_v2, 1 }
 0x207   :  { %v8378_v23 = vsel %vm2201_vm6, %v2200_v20, %v2199_v9  ;;  %v1335_v27 = vpop.f32.mrb[84].mxu0 }
 0x208   :  { %v1688_v32 = vpop.f32.mrb[84].mxu1  ;;  %v1337_v33 = vpop.f32.mrb[85].mxu0 }
 0x209   :  { %v8380_v37 = vadd.f32 %v1688_v32, %v1335_v27  ;;  %v1690_v38 = vpop.f32.mrb[85].mxu1  ;;  %v1338_v40 = vpop.f32.mrb[86].mxu0 }
 0x20a   :  { %v1691_v41 = vpop.f32.mrb[86].mxu1  ;;  %v1340_v44 = vpop.f32.mrb[87].mxu0 }
 0x20b   :  { %9238 = vst [vmem:[#allocation31_spill] sm:$0xff] %v8380_v37  ;;  %v8382_v28 = vadd.f32 %v1691_v41, %v1338_v40  ;;  %v1693_v46 = vpop.f32.mrb[87].mxu1 }
 0x20d   :  { %9239 = vst [vmem:[#allocation32_spill] sm:$0xff] %v8382_v28 }
 0x20f   :  { %v1343_v19 = vpop.f32.mrb[88].mxu0 }
 0x210   :  { %v1696_v10 = vpop.f32.mrb[88].mxu1  ;;  %v1345_v52 = vpop.f32.mrb[89].mxu0 }
 0x211   :  { %v1697_v34 = vadd.f32 %v1696_v10, %v1343_v19  ;;  %v1698_v53 = vpop.f32.mrb[89].mxu1  ;;  %v1346_v54 = vpop.f32.mrb[90].mxu0 }
 0x212   :  { %v1699_v9 = vpop.f32.mrb[90].mxu1  ;;  %v1348_v55 = vpop.f32.mrb[91].mxu0 }
 0x213   :  { %v8384_v56 = vadd.f32 %v1699_v9, %v1346_v54  ;;  %v1701_v59 = vpop.f32.mrb[91].mxu1  ;;  %v1854_v44 = vadd.f32 %v8305_v45, %v1697_v34 }
 0x215   :  { %v1870_v55 = vmax.f32 %v1854_v44, 0.0 }
 0x217   :  { %v1351_v62 = vpop.f32.mrb[92].mxu0  ;;  %v1886_v44 = vpack.c.bf16 %v1870_v55, %v1870_v55 }
 0x218   :  { %v1704_v63 = vpop.f32.mrb[92].mxu1  ;;  %v1353_v2 = vpop.f32.mrb[93].mxu0 }
 0x219   :  { %v8386_v8 = vadd.f32 %v1704_v63, %v1351_v62  ;;  %v1706_v12 = vpop.f32.mrb[93].mxu1  ;;  %v1354_v13 = vpop.f32.mrb[94].mxu0  ;;  %v8394_v62 = vld [vmem:[#allocation7 + $0x10] sm:$0xff]  ;;  %v8398_v2 = vld [vmem:[#allocation7 + $0x18] sm:$0xff] }
 0x21a   :  { %v1707_v20 = vpop.f32.mrb[94].mxu1  ;;  %v1356_v27 = vpop.f32.mrb[95].mxu0  ;;  %v8396_v63 = vld [vmem:[#allocation7 + $0x90] sm:$0xff] }
 0x21b   :  { %v8388_v32 = vadd.f32 %v1707_v20, %v1354_v13  ;;  %v1709_v33 = vpop.f32.mrb[95].mxu1  ;;  %v7197_v34 = vcombine.high %v8394_v62, %v8396_v63  ;;  %v8402_v20 = vld [vmem:[#allocation7 + $0x98] sm:$0xff] }
 0x21d   :  { %9240 = vst [vmem:[#allocation33_spill] sm:$0xff] %v8388_v32  ;;  %3585 = vmatprep.subr.bf16.mxu0 %v7197_v34 }
 0x21f   :  { %v1359_v38 = vpop.f32.mrb[96].mxu0 }
 0x220   :  { %v1712_v40 = vpop.f32.mrb[96].mxu1  ;;  %v1361_v41 = vpop.f32.mrb[97].mxu0 }
 0x221   :  { %v8391_v46 = vadd.f32 %v1712_v40, %v1359_v38  ;;  %v1714_v19 = vpop.f32.mrb[97].mxu1  ;;  %v1362_v10 = vpop.f32.mrb[98].mxu0  ;;  %v7199_v41 = vcombine.high %v8398_v2, %v8402_v20  ;;  %v2174_v38 = vunpack.c.l.b16 %v1886_v44 }
 0x222   :  { %v1715_v52 = vpop.f32.mrb[98].mxu1  ;;  %v1364_v53 = vpop.f32.mrb[99].mxu0 }
 0x223   :  { %9241 = vst [vmem:[#allocation34_spill] sm:$0xff] %v8391_v46  ;;  %v1716_v54 = vadd.f32 %v1715_v52, %v1362_v10  ;;  %v1717_v9 = vpop.f32.mrb[99].mxu1  ;;  %3628 = vmatprep.subr.bf16.mxu1 %v7199_v41 }
 0x225   :  { %v1855_v59 = vadd.f32 %v8305_v45, %v1716_v54 }
 0x227   :  { %v1871_v12 = vmax.f32 %v1855_v59, 0.0  ;;  %v1367_v13 = vpop.f32.mrb[100].mxu0 }
 0x228   :  { %v1720_v27 = vpop.f32.mrb[100].mxu1  ;;  %v1369_v33 = vpop.f32.mrb[101].mxu0 }
 0x229   :  { %v1887_v19 = vpack.c.bf16 %v1871_v12, %v1871_v12  ;;  %v8410_v10 = vadd.f32 %v1720_v27, %v1367_v13  ;;  %v1722_v52 = vpop.f32.mrb[101].mxu1  ;;  %v1370_v53 = vpop.f32.mrb[102].mxu0 }
 0x22a   :  { %v1723_v54 = vpop.f32.mrb[102].mxu1  ;;  %v1372_v9 = vpop.f32.mrb[103].mxu0 }
 0x22b   :  { %v2175_v59 = vunpack.c.l.b16 %v1887_v19  ;;  %v8412_v33 = vadd.f32 %v1723_v54, %v1370_v53  ;;  %v1725_v0 = vpop.f32.mrb[103].mxu1 }
 0x22d   :  { %v2203_v46 = vrot.slane %v2175_v59, 7 }
 0x22f   :  { %v2204_v40 = vsel %vm2183_vm0, %v2203_v46, %v2174_v38  ;;  %v1375_v28 = vpop.f32.mrb[104].mxu0 }
 0x230   :  { %v1728_v21 = vpop.f32.mrb[104].mxu1  ;;  %v1377_v55 = vpop.f32.mrb[105].mxu0 }
 0x231   :  { %v8415_v12 = vadd.f32 %v1728_v21, %v1375_v28  ;;  %v1730_v13 = vpop.f32.mrb[105].mxu1  ;;  %v1378_v27 = vpop.f32.mrb[106].mxu0 }
 0x232   :  { %v1731_v52 = vpop.f32.mrb[106].mxu1  ;;  %v1380_v34 = vpop.f32.mrb[107].mxu0 }
 0x233   :  { %9242 = vst [vmem:[#allocation35_spill] sm:$0xff] %v8415_v12  ;;  %v8417_v31 = vadd.f32 %v1731_v52, %v1378_v27  ;;  %v1733_v41 = vpop.f32.mrb[107].mxu1 }
 0x235   :  { %9243 = vst [vmem:[#allocation36_spill] sm:$0xff] %v8417_v31 }
 0x237   :  { %v1383_v19 = vpop.f32.mrb[108].mxu0 }
 0x238   :  { %v1736_v53 = vpop.f32.mrb[108].mxu1  ;;  %v1385_v54 = vpop.f32.mrb[109].mxu0 }
 0x239   :  { %v1737_v0 = vadd.f32 %v1736_v53, %v1383_v19  ;;  %v1738_v44 = vpop.f32.mrb[109].mxu1  ;;  %v1386_v9 = vpop.f32.mrb[110].mxu0 }
 0x23a   :  { %v1739_v59 = vpop.f32.mrb[110].mxu1  ;;  %v1388_v46 = vpop.f32.mrb[111].mxu0 }
 0x23b   :  { %v1856_v38 = vadd.f32 %v8305_v45, %v1737_v0  ;;  %v8420_v55 = vadd.f32 %v1739_v59, %v1386_v9  ;;  %v1741_v21 = vpop.f32.mrb[111].mxu1 }
 0x23d   :  { %v1872_v28 = vmax.f32 %v1856_v38, 0.0 }
 0x23f   :  { %v1888_v13 = vpack.c.bf16 %v1872_v28, %v1872_v28  ;;  %v1391_v24 = vpop.f32.mrb[112].mxu0 }
 0x240   :  { %v1744_v34 = vpop.f32.mrb[112].mxu1  ;;  %v1393_v27 = vpop.f32.mrb[113].mxu0 }
 0x241   :  { %v2176_v52 = vunpack.c.l.b16 %v1888_v13  ;;  %v8422_v41 = vadd.f32 %v1744_v34, %v1391_v24  ;;  %v1746_v31 = vpop.f32.mrb[113].mxu1  ;;  %v1394_v54 = vpop.f32.mrb[114].mxu0 }
 0x242   :  { %v1747_v19 = vpop.f32.mrb[114].mxu1  ;;  %v1396_v53 = vpop.f32.mrb[115].mxu0 }
 0x243   :  { %v2205_v44 = vrot.slane %v2176_v52, 6  ;;  %v8424_v42 = vadd.f32 %v1747_v19, %v1394_v54  ;;  %v1749_v46 = vpop.f32.mrb[115].mxu1 }
 0x245   :  { %9244 = vst [vmem:[#allocation37_spill] sm:$0xff] %v8424_v42  ;;  %v2206_v0 = vsel %vm2186_vm1, %v2205_v44, %v2204_v40 }
 0x247   :  { %v1399_v9 = vpop.f32.mrb[116].mxu0 }
 0x248   :  { %v1752_v59 = vpop.f32.mrb[116].mxu1  ;;  %v1401_v38 = vpop.f32.mrb[117].mxu0 }
 0x249   :  { %v8427_v21 = vadd.f32 %v1752_v59, %v1399_v9  ;;  %v1754_v28 = vpop.f32.mrb[117].mxu1  ;;  %v1402_v27 = vpop.f32.mrb[118].mxu0 }
 0x24a   :  { %v1755_v13 = vpop.f32.mrb[118].mxu1  ;;  %v1404_v24 = vpop.f32.mrb[119].mxu0 }
 0x24b   :  { %9245 = vst [vmem:[#allocation38_spill] sm:$0xff] %v8427_v21  ;;  %v1756_v34 = vadd.f32 %v1755_v13, %v1402_v27  ;;  %v1757_v31 = vpop.f32.mrb[119].mxu1 }
 0x24d   :  { %v1857_v36 = vadd.f32 %v8305_v45, %v1756_v34 }
 0x24f   :  { %v1873_v53 = vmax.f32 %v1857_v36, 0.0  ;;  %v1407_v52 = vpop.f32.mrb[120].mxu0 }
 0x250   :  { %v1760_v54 = vpop.f32.mrb[120].mxu1  ;;  %v1409_v19 = vpop.f32.mrb[121].mxu0 }
 0x251   :  { %v1889_v46 = vpack.c.bf16 %v1873_v53, %v1873_v53  ;;  %v8430_v49 = vadd.f32 %v1760_v54, %v1407_v52  ;;  %v1762_v40 = vpop.f32.mrb[121].mxu1  ;;  %v1410_v44 = vpop.f32.mrb[122].mxu0 }
 0x252   :  { %v1763_v38 = vpop.f32.mrb[122].mxu1  ;;  %v1412_v9 = vpop.f32.mrb[123].mxu0 }
 0x253   :  { %v2177_v59 = vunpack.c.l.b16 %v1889_v46  ;;  %v8432_v28 = vadd.f32 %v1763_v38, %v1410_v44  ;;  %v1765_v21 = vpop.f32.mrb[123].mxu1 }
 0x255   :  { %v2207_v24 = vrot.slane %v2177_v59, 5 }
 0x257   :  { %v2208_v27 = vsel %vm2189_vm2, %v2207_v24, %v2206_v0  ;;  %v1415_v13 = vpop.f32.mrb[124].mxu0 }
 0x258   :  { %v1768_v34 = vpop.f32.mrb[124].mxu1  ;;  %v1417_v36 = vpop.f32.mrb[125].mxu0 }
 0x259   :  { %v8435_v31 = vadd.f32 %v1768_v34, %v1415_v13  ;;  %v1770_v19 = vpop.f32.mrb[125].mxu1  ;;  %v1418_v53 = vpop.f32.mrb[126].mxu0 }
 0x25a   :  { %v1771_v52 = vpop.f32.mrb[126].mxu1  ;;  %v1420_v54 = vpop.f32.mrb[127].mxu0 }
 0x25b   :  { %9246 = vst [vmem:[#allocation39_spill] sm:$0xff] %v8435_v31  ;;  %v8437_v40 = vadd.f32 %v1771_v52, %v1418_v53  ;;  %v1773_v51 = vpop.f32.mrb[127].mxu1 }
 0x25d   :  { %9247 = vst [vmem:[#allocation40_spill] sm:$0xff] %v8437_v40 }
 0x25f   :  { %v1423_v9 = vpop.f32.mrb[128].mxu0 }
 0x260   :  { %v1776_v46 = vpop.f32.mrb[128].mxu1  ;;  %v1425_v44 = vpop.f32.mrb[129].mxu0 }
 0x261   :  { %v1777_v38 = vadd.f32 %v1776_v46, %v1423_v9  ;;  %v1778_v21 = vpop.f32.mrb[129].mxu1  ;;  %v1426_v59 = vpop.f32.mrb[130].mxu0 }
 0x262   :  { %v1779_v15 = vpop.f32.mrb[130].mxu1  ;;  %v1428_v0 = vpop.f32.mrb[131].mxu0 }
 0x263   :  { %v1858_v24 = vadd.f32 %v8305_v45, %v1777_v38  ;;  %v8440_v36 = vadd.f32 %v1779_v15, %v1426_v59  ;;  %v1781_v13 = vpop.f32.mrb[131].mxu1 }
 0x265   :  { %v1874_v34 = vmax.f32 %v1858_v24, 0.0 }
 0x267   :  { %v1890_v19 = vpack.c.bf16 %v1874_v34, %v1874_v34  ;;  %v1431_v31 = vpop.f32.mrb[132].mxu0 }
 0x268   :  { %v1784_v54 = vpop.f32.mrb[132].mxu1  ;;  %v1433_v53 = vpop.f32.mrb[133].mxu0 }
 0x269   :  { %v2178_v52 = vunpack.c.l.b16 %v1890_v19  ;;  %v8442_v51 = vadd.f32 %v1784_v54, %v1431_v31  ;;  %v1786_v40 = vpop.f32.mrb[133].mxu1  ;;  %v1434_v44 = vpop.f32.mrb[134].mxu0 }
 0x26a   :  { %v1787_v9 = vpop.f32.mrb[134].mxu1  ;;  %v1436_v46 = vpop.f32.mrb[135].mxu0 }
 0x26b   :  { %v2209_v21 = vrot.slane %v2178_v52, 4  ;;  %v8444_v42 = vadd.f32 %v1787_v9, %v1434_v44  ;;  %v1789_v0 = vpop.f32.mrb[135].mxu1 }
 0x26d   :  { %9248 = vst [vmem:[#allocation41_spill] sm:$0xff] %v8444_v42  ;;  %v2210_v15 = vsel %vm2192_vm3, %v2209_v21, %v2208_v27 }
 0x26f   :  { %v1439_v38 = vpop.f32.mrb[136].mxu0 }
 0x270   :  { %v1792_v59 = vpop.f32.mrb[136].mxu1  ;;  %v1441_v24 = vpop.f32.mrb[137].mxu0 }
 0x271   :  { %v8447_v13 = vadd.f32 %v1792_v59, %v1439_v38  ;;  %v1794_v34 = vpop.f32.mrb[137].mxu1  ;;  %v1442_v53 = vpop.f32.mrb[138].mxu0 }
 0x272   :  { %v1795_v19 = vpop.f32.mrb[138].mxu1  ;;  %v1444_v31 = vpop.f32.mrb[139].mxu0 }
 0x273   :  { %9249 = vst [vmem:[#allocation42_spill] sm:$0xff] %v8447_v13  ;;  %v1796_v54 = vadd.f32 %v1795_v19, %v1442_v53  ;;  %v1797_v40 = vpop.f32.mrb[139].mxu1 }
 0x275   :  { %v1859_v12 = vadd.f32 %v8305_v45, %v1796_v54 }
 0x277   :  { %v1875_v46 = vmax.f32 %v1859_v12, 0.0  ;;  %v1447_v52 = vpop.f32.mrb[140].mxu0 }
 0x278   :  { %v1800_v44 = vpop.f32.mrb[140].mxu1  ;;  %v1449_v9 = vpop.f32.mrb[141].mxu0 }
 0x279   :  { %v1891_v0 = vpack.c.bf16 %v1875_v46, %v1875_v46  ;;  %v8450_v42 = vadd.f32 %v1800_v44, %v1447_v52  ;;  %v1802_v27 = vpop.f32.mrb[141].mxu1  ;;  %v1450_v21 = vpop.f32.mrb[142].mxu0 }
 0x27a   :  { %v1803_v24 = vpop.f32.mrb[142].mxu1  ;;  %v1452_v38 = vpop.f32.mrb[143].mxu0 }
 0x27b   :  { %v2179_v59 = vunpack.c.l.b16 %v1891_v0  ;;  %v8452_v34 = vadd.f32 %v1803_v24, %v1450_v21  ;;  %v1805_v13 = vpop.f32.mrb[143].mxu1 }
 0x27d   :  { %9250 = vst [vmem:[#allocation43_spill] sm:$0xff] %v8452_v34  ;;  %v2211_v31 = vrot.slane %v2179_v59, 3 }
 0x27f   :  { %v2212_v53 = vsel %vm2195_vm4, %v2211_v31, %v2210_v15  ;;  %v1455_v19 = vpop.f32.mrb[144].mxu0 }
 0x280   :  { %v1808_v54 = vpop.f32.mrb[144].mxu1  ;;  %v1457_v12 = vpop.f32.mrb[145].mxu0 }
 0x281   :  { %v8455_v40 = vadd.f32 %v1808_v54, %v1455_v19  ;;  %v1810_v9 = vpop.f32.mrb[145].mxu1  ;;  %v1458_v46 = vpop.f32.mrb[146].mxu0 }
 0x282   :  { %v1811_v52 = vpop.f32.mrb[146].mxu1  ;;  %v1460_v44 = vpop.f32.mrb[147].mxu0 }
 0x283   :  { %9251 = vst [vmem:[#allocation44_spill] sm:$0xff] %v8455_v40  ;;  %v8457_v27 = vadd.f32 %v1811_v52, %v1458_v46  ;;  %v1813_v32 = vpop.f32.mrb[147].mxu1 }
 0x285   :  { %9252 = vst [vmem:[#allocation45_spill] sm:$0xff] %v8457_v27 }
 0x287   :  { %v1463_v38 = vpop.f32.mrb[148].mxu0 }
 0x288   :  { %v1816_v0 = vpop.f32.mrb[148].mxu1  ;;  %v1465_v21 = vpop.f32.mrb[149].mxu0 }
 0x289   :  { %v1817_v24 = vadd.f32 %v1816_v0, %v1463_v38  ;;  %v1818_v13 = vpop.f32.mrb[149].mxu1  ;;  %v1466_v59 = vpop.f32.mrb[150].mxu0 }
 0x28a   :  { %v1819_v37 = vpop.f32.mrb[150].mxu1  ;;  %v1468_v15 = vpop.f32.mrb[151].mxu0 }
 0x28b   :  { %v1860_v31 = vadd.f32 %v8305_v45, %v1817_v24  ;;  %v8460_v12 = vadd.f32 %v1819_v37, %v1466_v59  ;;  %v1821_v19 = vpop.f32.mrb[151].mxu1 }
 0x28d   :  { %v1876_v54 = vmax.f32 %v1860_v31, 0.0 }
 0x28f   :  { %v1892_v9 = vpack.c.bf16 %v1876_v54, %v1876_v54  ;;  %v1471_v40 = vpop.f32.mrb[152].mxu0 }
 0x290   :  { %v1824_v44 = vpop.f32.mrb[152].mxu1  ;;  %v1473_v46 = vpop.f32.mrb[153].mxu0 }
 0x291   :  { %v2180_v52 = vunpack.c.l.b16 %v1892_v9  ;;  %v8462_v32 = vadd.f32 %v1824_v44, %v1471_v40  ;;  %v1826_v27 = vpop.f32.mrb[153].mxu1  ;;  %v1474_v21 = vpop.f32.mrb[154].mxu0 }
 0x292   :  { %v1827_v38 = vpop.f32.mrb[154].mxu1  ;;  %v1476_v0 = vpop.f32.mrb[155].mxu0 }
 0x293   :  { %9253 = vst [vmem:[#allocation46_spill] sm:$0xff] %v8462_v32  ;;  %v2213_v13 = vrot.slane %v2180_v52, 2  ;;  %v8464_v5 = vadd.f32 %v1827_v38, %v1474_v21  ;;  %v1829_v15 = vpop.f32.mrb[155].mxu1  ;;  %v1928_v38 = vld [vmem:[#allocation7 + $0x110] sm:$0xff] }
 0x295   :  { %9254 = vst [vmem:[#allocation47_spill] sm:$0xff] %v8464_v5  ;;  %v2214_v37 = vsel %vm2198_vm5, %v2213_v13, %v2212_v53  ;;  %v1944_v5 = vld [vmem:[#allocation7 + $0x190] sm:$0xff]  ;;  %v1929_v53 = vld [vmem:[#allocation7 + $0x118] sm:$0xff] }
 0x296   :  { %v1945_v13 = vld [vmem:[#allocation7 + $0x198] sm:$0xff] }
 0x297   :  { %v1479_v24 = vpop.f32.mrb[156].mxu0 }
 0x298   :  { %v1832_v59 = vpop.f32.mrb[156].mxu1  ;;  %v1481_v31 = vpop.f32.mrb[157].mxu0 }
 0x299   :  { %v8467_v19 = vadd.f32 %v1832_v59, %v1479_v24  ;;  %v1834_v54 = vpop.f32.mrb[157].mxu1  ;;  %v1482_v46 = vpop.f32.mrb[158].mxu0  ;;  %v7229_v59 = vcombine.high %v1928_v38, %v1944_v5 }
 0x29a   :  { %v1835_v9 = vpop.f32.mrb[158].mxu1  ;;  %v1484_v40 = vpop.f32.mrb[159].mxu0  ;;  %v7231_v54 = vcombine.high %v1929_v53, %v1945_v13 }
 0x29b   :  { %9255 = vst [vmem:[#allocation48_spill] sm:$0xff] %v8467_v19  ;;  %v1836_v44 = vadd.f32 %v1835_v9, %v1482_v46  ;;  %v1837_v27 = vpop.f32.mrb[159].mxu1  ;;  %v1960_v40 = vld [vmem:[#allocation7 + $0x210] sm:$0xff]  ;;  %v1961_v9 = vld [vmem:[#allocation7 + $0x218] sm:$0xff] }
 0x29c   :  { %v1976_v46 = vld [vmem:[#allocation7 + $0x290] sm:$0xff]  ;;  %v1977_v27 = vld [vmem:[#allocation7 + $0x298] sm:$0xff] }
 0x29d   :  { %v1861_v18 = vadd.f32 %v8305_v45, %v1836_v44  ;;  %v9256_v45 = vcombine.low %v8394_v62, %v8396_v63  ;;  %v5275_v44 = vld [vmem:[%s9215_s4] sm:$0xff]  ;;  %v2009_v19 = vld [vmem:[#allocation7 + $0x398] sm:$0xff]  ;;  %v9258_v62 = vmov 0   ;;  %v7262_v63 = vcombine.low %v1961_v9, %v1977_v27 }
 0x29e   :  { %5345 = vperm.xlu0 %7593, %v5275_v44  }
 0x29f   :  { %v1877_v0 = vmax.f32 %v1861_v18, 0.0  ;;  %v9257_v18 = vcombine.low %v8398_v2, %v8402_v20 }
 0x2a1   :  { %v1893_v52 = vpack.c.bf16 %v1877_v0, %v1877_v0  ;;  %v7261_v0 = vcombine.high %v1960_v40, %v1976_v46 }
 0x2a3   :  { %v2181_v21 = vunpack.c.l.b16 %v1893_v52  ;;  %v7263_v52 = vcombine.high %v1961_v9, %v1977_v27 }
 0x2a5   :  { %v2215_v15 = vrot.slane %v2181_v21, 1  ;;  %v1992_v21 = vld [vmem:[#allocation7 + $0x310] sm:$0xff] }
 0x2a7   :  { %v2216_v31 = vsel %vm2201_vm6, %v2215_v15, %v2214_v37  ;;  %v7230_v37 = vcombine.low %v1929_v53, %v1945_v13  ;;  %v2008_v15 = vld [vmem:[#allocation7 + $0x390] sm:$0xff]  ;;  %v2025_v13 = vld [vmem:[#allocation7 + $0x418] sm:$0xff] }
 0x2a8   :  { %v8472_v24 = vpack.c.b16 %v2216_v31, %v8378_v23  ;;  %v7228_v23 = vcombine.low %v1928_v38, %v1944_v5  ;;  %v1993_v31 = vld [vmem:[#allocation7 + $0x318] sm:$0xff]  ;;  %v7260_v5 = vcombine.low %v1960_v40, %v1976_v46  ;;  %v7293_v2 = vcombine.high %v1992_v21, %v2008_v15  ;;  %v2024_v38 = vld [vmem:[#allocation7 + $0x410] sm:$0xff] }
 0x2a9   :  { %v7295_v20 = vcombine.high %v1993_v31, %v2009_v19  ;;  %v2040_v53 = vld [vmem:[#allocation7 + $0x490] sm:$0xff]  ;;  %v2057_v40 = vld [vmem:[#allocation7 + $0x518] sm:$0xff] }
 0x2aa   :  { %3532 = vmatmul.mubr.bf16.vlgmr.msra.gmra.mrb[160].mxu0 %v8472_v24  ;;  %3575 = vmatmul.mubr.bf16.vlgmr.msra.gmra.mrb[160].mxu1 %v8472_v24  ;;  %v2073_v46 = vld [vmem:[#allocation7 + $0x598] sm:$0xff]  ;;  %v7324_v9 = vcombine.low %v2024_v38, %v2040_v53 }
 0x2ab   :  { %3586 = vmatpush1.bf16.msra.mxu0 %v9256_v45  ;;  %3629 = vmatpush1.bf16.msra.mxu1 %v9257_v18  ;;  %v7294_v45 = vcombine.low %v1993_v31, %v2009_v19  ;;  %v7325_v18 = vcombine.high %v2024_v38, %v2040_v53  ;;  %v2105_v19 = vld [vmem:[#allocation7 + $0x698] sm:$0xff]  ;;  %v7358_v31 = vcombine.low %v2057_v40, %v2073_v46 }
 0x2ac   :  { %3587 = vmatprep.subr.bf16.mxu0 %v7229_v59  ;;  %3630 = vmatprep.subr.bf16.mxu1 %v7231_v54  ;;  %v2041_v59 = vld [vmem:[#allocation7 + $0x498] sm:$0xff]  ;;  %v7292_v54 = vcombine.low %v1992_v21, %v2008_v15 }
 0x2ad   :  { %3617 = vmatprep.mubr.bf16.mxu0 %v9258_v62  ;;  %3660 = vmatprep.mubr.bf16.mxu1 %v9258_v62  ;;  %v7327_v44 = vcombine.high %v2025_v13, %v2041_v59  ;;  %v7326_v27 = vcombine.low %v2025_v13, %v2041_v59  ;;  %v2089_v21 = vld [vmem:[#allocation7 + $0x618] sm:$0xff] }
 0x2ae   :  { %v2121_v38 = vld [vmem:[#allocation7 + $0x718] sm:$0xff]  ;;  %v7390_v59 = vcombine.low %v2089_v21, %v2105_v19 }
 0x2af   :  { %3588 = vmatpush1.bf16.msra.mxu0 %v7228_v23  ;;  %3631 = vmatpush1.bf16.msra.mxu1 %v7230_v37  ;;  %v2056_v23 = vld [vmem:[#allocation7 + $0x510] sm:$0xff]  ;;  %v2137_v53 = vld [vmem:[#allocation7 + $0x798] sm:$0xff] }
 0x2b0   :  { %3589 = vmatprep.subr.bf16.mxu0 %v7261_v0  ;;  %3632 = vmatprep.subr.bf16.mxu1 %v7263_v52  ;;  %v2072_v37 = vld [vmem:[#allocation7 + $0x590] sm:$0xff]  ;;  %v7359_v52 = vcombine.high %v2057_v40, %v2073_v46  ;;  %v7422_v46 = vcombine.low %v2121_v38, %v2137_v53 }
 0x2b1   :  { %v7357_v0 = vcombine.high %v2056_v23, %v2072_v37  ;;  %v7356_v15 = vcombine.low %v2056_v23, %v2072_v37  ;;  %v1899_v23 = vld [vmem:[#allocation7 + $0x28] sm:$0xff] }
 0x2b2   :  { %v1915_v37 = vld [vmem:[#allocation7 + $0xa8] sm:$0xff] }
 0x2b3   :  { %3590 = vmatpush1.bf16.msra.mxu0 %v7260_v5  ;;  %3633 = vmatpush1.bf16.msra.mxu1 %v7262_v63  ;;  %v2088_v5 = vld [vmem:[#allocation7 + $0x610] sm:$0xff] }
 0x2b4   :  { %3591 = vmatprep.subr.bf16.mxu0 %v7293_v2  ;;  %3634 = vmatprep.subr.bf16.mxu1 %v7295_v20  ;;  %v2104_v63 = vld [vmem:[#allocation7 + $0x690] sm:$0xff]  ;;  %v7391_v20 = vcombine.high %v2089_v21, %v2105_v19  ;;  %v7202_v19 = vcombine.low %v1899_v23, %v1915_v37 }
 0x2b5   :  { %v7389_v2 = vcombine.high %v2088_v5, %v2104_v63  ;;  %v7388_v13 = vcombine.low %v2088_v5, %v2104_v63  ;;  %v1931_v5 = vld [vmem:[#allocation7 + $0x128] sm:$0xff] }
 0x2b6   :  { %v1947_v63 = vld [vmem:[#allocation7 + $0x1a8] sm:$0xff] }
 0x2b7   :  { %3592 = vmatpush1.bf16.msra.mxu0 %v7292_v54  ;;  %3635 = vmatpush1.bf16.msra.mxu1 %v7294_v45  ;;  %v2120_v54 = vld [vmem:[#allocation7 + $0x710] sm:$0xff] }
 0x2b8   :  { %3593 = vmatprep.subr.bf16.mxu0 %v7325_v18  ;;  %3636 = vmatprep.subr.bf16.mxu1 %v7327_v44  ;;  %v2136_v45 = vld [vmem:[#allocation7 + $0x790] sm:$0xff]  ;;  %v7423_v44 = vcombine.high %v2121_v38, %v2137_v53  ;;  %v7234_v53 = vcombine.low %v1931_v5, %v1947_v63 }
 0x2b9   :  { %v7421_v18 = vcombine.high %v2120_v54, %v2136_v45  ;;  %v7420_v40 = vcombine.low %v2120_v54, %v2136_v45  ;;  %v1963_v54 = vld [vmem:[#allocation7 + $0x228] sm:$0xff] }
 0x2ba   :  { %v1979_v45 = vld [vmem:[#allocation7 + $0x2a8] sm:$0xff] }
 0x2bb   :  { %3594 = vmatpush1.bf16.msra.mxu0 %v7324_v9  ;;  %3637 = vmatpush1.bf16.msra.mxu1 %v7326_v27  ;;  %v1898_v9 = vld [vmem:[#allocation7 + $0x20] sm:$0xff] }
 0x2bc   :  { %3595 = vmatprep.subr.bf16.mxu0 %v7357_v0  ;;  %3638 = vmatprep.subr.bf16.mxu1 %v7359_v52  ;;  %v1914_v27 = vld [vmem:[#allocation7 + $0xa0] sm:$0xff]  ;;  %v7203_v52 = vcombine.high %v1899_v23, %v1915_v37  ;;  %v1995_v23 = vld [vmem:[#allocation7 + $0x328] sm:$0xff] }
 0x2bd   :  { %v7201_v0 = vcombine.high %v1898_v9, %v1914_v27  ;;  %v7200_v21 = vcombine.low %v1898_v9, %v1914_v27  ;;  %v1994_v9 = vld [vmem:[#allocation7 + $0x320] sm:$0xff]  ;;  %v2011_v37 = vld [vmem:[#allocation7 + $0x3a8] sm:$0xff] }
 0x2be   :  { %v2010_v27 = vld [vmem:[#allocation7 + $0x3a0] sm:$0xff] }
 0x2bf   :  { %3596 = vmatpush1.bf16.msra.mxu0 %v7356_v15  ;;  %3639 = vmatpush1.bf16.msra.mxu1 %v7358_v31  ;;  %v1930_v15 = vld [vmem:[#allocation7 + $0x120] sm:$0xff] }
 0x2c0   :  { %3597 = vmatprep.subr.bf16.mxu0 %v7389_v2  ;;  %3640 = vmatprep.subr.bf16.mxu1 %v7391_v20  ;;  %v1946_v31 = vld [vmem:[#allocation7 + $0x1a0] sm:$0xff]  ;;  %v7235_v20 = vcombine.high %v1931_v5, %v1947_v63  ;;  %v2027_v5 = vld [vmem:[#allocation7 + $0x428] sm:$0xff] }
 0x2c1   :  { %v7233_v2 = vcombine.high %v1930_v15, %v1946_v31  ;;  %v7232_v38 = vcombine.low %v1930_v15, %v1946_v31  ;;  %v2026_v15 = vld [vmem:[#allocation7 + $0x420] sm:$0xff]  ;;  %v2043_v63 = vld [vmem:[#allocation7 + $0x4a8] sm:$0xff] }
 0x2c2   :  { %v2042_v31 = vld [vmem:[#allocation7 + $0x4a0] sm:$0xff] }
 0x2c3   :  { %3598 = vmatpush1.bf16.msra.mxu0 %v7388_v13  ;;  %3641 = vmatpush1.bf16.msra.mxu1 %v7390_v59  ;;  %v1962_v13 = vld [vmem:[#allocation7 + $0x220] sm:$0xff] }
 0x2c4   :  { %3599 = vmatprep.subr.bf16.mxu0 %v7421_v18  ;;  %3642 = vmatprep.subr.bf16.mxu1 %v7423_v44  ;;  %v1978_v59 = vld [vmem:[#allocation7 + $0x2a0] sm:$0xff]  ;;  %v7267_v44 = vcombine.high %v1963_v54, %v1979_v45 }
 0x2c5   :  { %v7265_v18 = vcombine.high %v1962_v13, %v1978_v59 }
 0x2c7   :  { %3600 = vmatpush1.bf16.msra.mxu0 %v7420_v40  ;;  %3643 = vmatpush1.bf16.msra.mxu1 %v7422_v46  ;;  %v7264_v40 = vcombine.low %v1962_v13, %v1978_v59  ;;  %v7266_v46 = vcombine.low %v1963_v54, %v1979_v45  ;;  %v2059_v13 = vld [vmem:[#allocation7 + $0x528] sm:$0xff]  ;;  %v7328_v54 = vcombine.low %v2026_v15, %v2042_v31 }
 0x2c8   :  { %3671 = vmatprep.subr.bf16.mxu0 %v7201_v0  ;;  %3714 = vmatprep.subr.bf16.mxu1 %v7203_v52  ;;  %v7297_v0 = vcombine.high %v1994_v9, %v2010_v27  ;;  %v7299_v52 = vcombine.high %v1995_v23, %v2011_v37  ;;  %v2075_v59 = vld [vmem:[#allocation7 + $0x5a8] sm:$0xff]  ;;  %v7330_v45 = vcombine.low %v2027_v5, %v2043_v63 }
 0x2ca   :  { %3618 = vmatmul.mubr.bf16.vlgmr.msra.gmra.mrb[164].mxu0 %v8472_v24  ;;  %3661 = vmatmul.mubr.bf16.vlgmr.msra.gmra.mrb[164].mxu1 %v8472_v24 }
 0x2cb   :  { %3672 = vmatpush1.bf16.msra.mxu0 %v7200_v21  ;;  %3715 = vmatpush1.bf16.msra.mxu1 %v7202_v19  ;;  %v7296_v21 = vcombine.low %v1994_v9, %v2010_v27  ;;  %v7298_v19 = vcombine.low %v1995_v23, %v2011_v37  ;;  %v2091_v9 = vld [vmem:[#allocation7 + $0x628] sm:$0xff]  ;;  %v7362_v37 = vcombine.low %v2059_v13, %v2075_v59 }
 0x2cc   :  { %3673 = vmatprep.subr.bf16.mxu0 %v7233_v2  ;;  %3716 = vmatprep.subr.bf16.mxu1 %v7235_v20  ;;  %v7329_v2 = vcombine.high %v2026_v15, %v2042_v31  ;;  %v7331_v20 = vcombine.high %v2027_v5, %v2043_v63  ;;  %v2107_v27 = vld [vmem:[#allocation7 + $0x6a8] sm:$0xff] }
 0x2cd   :  { %3703 = vmatprep.mubr.bf16.mxu0 %v9258_v62  ;;  %3746 = vmatprep.mubr.bf16.mxu1 %v9258_v62  ;;  %v2123_v15 = vld [vmem:[#allocation7 + $0x728] sm:$0xff]  ;;  %v7394_v63 = vcombine.low %v2091_v9, %v2107_v27 }
 0x2ce   :  { %v2139_v31 = vld [vmem:[#allocation7 + $0x7a8] sm:$0xff] }
 0x2cf   :  { %3674 = vmatpush1.bf16.msra.mxu0 %v7232_v38  ;;  %3717 = vmatpush1.bf16.msra.mxu1 %v7234_v53  ;;  %v2058_v38 = vld [vmem:[#allocation7 + $0x520] sm:$0xff] }
 0x2d0   :  { %3675 = vmatprep.subr.bf16.mxu0 %v7265_v18  ;;  %3718 = vmatprep.subr.bf16.mxu1 %v7267_v44  ;;  %v2074_v53 = vld [vmem:[#allocation7 + $0x5a0] sm:$0xff]  ;;  %v7363_v44 = vcombine.high %v2059_v13, %v2075_v59  ;;  %v7426_v59 = vcombine.low %v2123_v15, %v2139_v31 }
 0x2d1   :  { %v7361_v18 = vcombine.high %v2058_v38, %v2074_v53  ;;  %v7360_v23 = vcombine.low %v2058_v38, %v2074_v53  ;;  %v1901_v38 = vld [vmem:[#allocation7 + $0x38] sm:$0xff] }
 0x2d2   :  { %v1917_v53 = vld [vmem:[#allocation7 + $0xb8] sm:$0xff] }
 0x2d3   :  { %3676 = vmatpush1.bf16.msra.mxu0 %v7264_v40  ;;  %3719 = vmatpush1.bf16.msra.mxu1 %v7266_v46  ;;  %v2090_v40 = vld [vmem:[#allocation7 + $0x620] sm:$0xff] }
 0x2d4   :  { %3677 = vmatprep.subr.bf16.mxu0 %v7297_v0  ;;  %3720 = vmatprep.subr.bf16.mxu1 %v7299_v52  ;;  %v2106_v46 = vld [vmem:[#allocation7 + $0x6a0] sm:$0xff]  ;;  %v7395_v52 = vcombine.high %v2091_v9, %v2107_v27  ;;  %v7206_v27 = vcombine.low %v1901_v38, %v1917_v53 }
 0x2d5   :  { %v7393_v0 = vcombine.high %v2090_v40, %v2106_v46  ;;  %v7392_v5 = vcombine.low %v2090_v40, %v2106_v46  ;;  %v1933_v40 = vld [vmem:[#allocation7 + $0x138] sm:$0xff] }
 0x2d6   :  { %v1949_v46 = vld [vmem:[#allocation7 + $0x1b8] sm:$0xff] }
 0x2d7   :  { %3678 = vmatpush1.bf16.msra.mxu0 %v7296_v21  ;;  %3721 = vmatpush1.bf16.msra.mxu1 %v7298_v19  ;;  %v2122_v21 = vld [vmem:[#allocation7 + $0x720] sm:$0xff] }
 0x2d8   :  { %3679 = vmatprep.subr.bf16.mxu0 %v7329_v2  ;;  %3722 = vmatprep.subr.bf16.mxu1 %v7331_v20  ;;  %v2138_v19 = vld [vmem:[#allocation7 + $0x7a0] sm:$0xff]  ;;  %v7427_v20 = vcombine.high %v2123_v15, %v2139_v31  ;;  %v7238_v31 = vcombine.low %v1933_v40, %v1949_v46 }
 0x2d9   :  { %v7425_v2 = vcombine.high %v2122_v21, %v2138_v19  ;;  %v7424_v13 = vcombine.low %v2122_v21, %v2138_v19  ;;  %v1965_v21 = vld [vmem:[#allocation7 + $0x238] sm:$0xff] }
 0x2da   :  { %v1981_v19 = vld [vmem:[#allocation7 + $0x2b8] sm:$0xff] }
 0x2db   :  { %3680 = vmatpush1.bf16.msra.mxu0 %v7328_v54  ;;  %3723 = vmatpush1.bf16.msra.mxu1 %v7330_v45  ;;  %v1900_v54 = vld [vmem:[#allocation7 + $0x30] sm:$0xff] }
 0x2dc   :  { %3681 = vmatprep.subr.bf16.mxu0 %v7361_v18  ;;  %3724 = vmatprep.subr.bf16.mxu1 %v7363_v44  ;;  %v1916_v45 = vld [vmem:[#allocation7 + $0xb0] sm:$0xff]  ;;  %v7207_v44 = vcombine.high %v1901_v38, %v1917_v53  ;;  %v1997_v53 = vld [vmem:[#allocation7 + $0x338] sm:$0xff] }
 0x2dd   :  { %v7205_v18 = vcombine.high %v1900_v54, %v1916_v45  ;;  %v7204_v9 = vcombine.low %v1900_v54, %v1916_v45  ;;  %v7271_v54 = vcombine.high %v1965_v21, %v1981_v19  ;;  %v1996_v45 = vld [vmem:[#allocation7 + $0x330] sm:$0xff] }
 0x2de   :  { %v2012_v38 = vld [vmem:[#allocation7 + $0x3b0] sm:$0xff] }
 0x2df   :  { %3682 = vmatpush1.bf16.msra.mxu0 %v7360_v23  ;;  %3725 = vmatpush1.bf16.msra.mxu1 %v7362_v37  ;;  %v1932_v23 = vld [vmem:[#allocation7 + $0x130] sm:$0xff] }
 0x2e0   :  { %3683 = vmatprep.subr.bf16.mxu0 %v7393_v0  ;;  %3726 = vmatprep.subr.bf16.mxu1 %v7395_v52  ;;  %v1948_v37 = vld [vmem:[#allocation7 + $0x1b0] sm:$0xff]  ;;  %v7239_v52 = vcombine.high %v1933_v40, %v1949_v46  ;;  %v2029_v46 = vld [vmem:[#allocation7 + $0x438] sm:$0xff] }
 0x2e1   :  { %v7237_v0 = vcombine.high %v1932_v23, %v1948_v37  ;;  %v7236_v15 = vcombine.low %v1932_v23, %v1948_v37  ;;  %v2028_v37 = vld [vmem:[#allocation7 + $0x430] sm:$0xff] }
 0x2e2   :  { %v2044_v40 = vld [vmem:[#allocation7 + $0x4b0] sm:$0xff] }
 0x2e3   :  { %3684 = vmatpush1.bf16.msra.mxu0 %v7392_v5  ;;  %3727 = vmatpush1.bf16.msra.mxu1 %v7394_v63  ;;  %v1964_v5 = vld [vmem:[#allocation7 + $0x230] sm:$0xff] }
 0x2e4   :  { %3685 = vmatprep.subr.bf16.mxu0 %v7425_v2  ;;  %3728 = vmatprep.subr.bf16.mxu1 %v7427_v20  ;;  %v1980_v63 = vld [vmem:[#allocation7 + $0x2b0] sm:$0xff]  ;;  %v5276_v2 = vld [vmem:[%s9215_s4 + $0x8] sm:$0xff] }
 0x2e5   :  { %v7269_v20 = vcombine.high %v1964_v5, %v1980_v63  ;;  %5350 = vperm.xlu1 %7594, %v5276_v2  }
 0x2e7   :  { %3686 = vmatpush1.bf16.msra.mxu0 %v7424_v13  ;;  %3729 = vmatpush1.bf16.msra.mxu1 %v7426_v59  ;;  %v2013_v13 = vld [vmem:[#allocation7 + $0x3b8] sm:$0xff]  ;;  %v7268_v59 = vcombine.low %v1964_v5, %v1980_v63 }
 0x2e8   :  { %3757 = vmatprep.subr.bf16.mxu0 %v7205_v18  ;;  %3800 = vmatprep.subr.bf16.mxu1 %v7207_v44  ;;  %v7270_v18 = vcombine.low %v1965_v21, %v1981_v19  ;;  %v7301_v44 = vcombine.high %v1996_v45, %v2012_v38  ;;  %v7303_v23 = vcombine.high %v1997_v53, %v2013_v13  ;;  %v2061_v5 = vld [vmem:[#allocation7 + $0x538] sm:$0xff] }
 0x2e9   :  { %v2077_v63 = vld [vmem:[#allocation7 + $0x5b8] sm:$0xff]  ;;  %v7332_v21 = vcombine.low %v2028_v37, %v2044_v40 }
 0x2ea   :  { %3704 = vmatmul.mubr.bf16.vlgmr.msra.gmra.mrb[168].mxu0 %v8472_v24  ;;  %3747 = vmatmul.mubr.bf16.vlgmr.msra.gmra.mrb[168].mxu1 %v8472_v24 }
 0x2eb   :  { %3758 = vmatpush1.bf16.msra.mxu0 %v7204_v9  ;;  %3801 = vmatpush1.bf16.msra.mxu1 %v7206_v27  ;;  %v2045_v9 = vld [vmem:[#allocation7 + $0x4b8] sm:$0xff]  ;;  %v7300_v27 = vcombine.low %v1996_v45, %v2012_v38 }
 0x2ec   :  { %3759 = vmatprep.subr.bf16.mxu0 %v7237_v0  ;;  %3802 = vmatprep.subr.bf16.mxu1 %v7239_v52  ;;  %v7302_v0 = vcombine.low %v1997_v53, %v2013_v13  ;;  %v7333_v52 = vcombine.high %v2028_v37, %v2044_v40  ;;  %v7335_v2 = vcombine.high %v2029_v46, %v2045_v9  ;;  %v2093_v45 = vld [vmem:[#allocation7 + $0x638] sm:$0xff] }
 0x2ed   :  { %3789 = vmatprep.mubr.bf16.mxu0 %v9258_v62  ;;  %3832 = vmatprep.mubr.bf16.mxu1 %v9258_v62  ;;  %v7334_v19 = vcombine.low %v2029_v46, %v2045_v9  ;;  %v2109_v38 = vld [vmem:[#allocation7 + $0x6b8] sm:$0xff]  ;;  %v7366_v13 = vcombine.low %v2061_v5, %v2077_v63 }
 0x2ee   :  { %v2125_v37 = vld [vmem:[#allocation7 + $0x738] sm:$0xff]  ;;  %v7398_v9 = vcombine.low %v2093_v45, %v2109_v38 }
 0x2ef   :  { %3760 = vmatpush1.bf16.msra.mxu0 %v7236_v15  ;;  %3803 = vmatpush1.bf16.msra.mxu1 %v7238_v31  ;;  %v2060_v15 = vld [vmem:[#allocation7 + $0x530] sm:$0xff]  ;;  %v2141_v40 = vld [vmem:[#allocation7 + $0x7b8] sm:$0xff] }
 0x2f0   :  { %3761 = vmatprep.subr.bf16.mxu0 %v7269_v20  ;;  %3804 = vmatprep.subr.bf16.mxu1 %v7271_v54  ;;  %v2076_v31 = vld [vmem:[#allocation7 + $0x5b0] sm:$0xff]  ;;  %v7367_v54 = vcombine.high %v2061_v5, %v2077_v63  ;;  %v7430_v63 = vcombine.low %v2125_v37, %v2141_v40 }
 0x2f1   :  { %v7365_v20 = vcombine.high %v2060_v15, %v2076_v31  ;;  %v7364_v53 = vcombine.low %v2060_v15, %v2076_v31  ;;  %v1903_v15 = vld [vmem:[#allocation7 + $0x48] sm:$0xff] }
 0x2f2   :  { %v1919_v31 = vld [vmem:[#allocation7 + $0xc8] sm:$0xff] }
 0x2f3   :  { %3762 = vmatpush1.bf16.msra.mxu0 %v7268_v59  ;;  %3805 = vmatpush1.bf16.msra.mxu1 %v7270_v18  ;;  %v2092_v59 = vld [vmem:[#allocation7 + $0x630] sm:$0xff] }
 0x2f4   :  { %3763 = vmatprep.subr.bf16.mxu0 %v7301_v44  ;;  %3806 = vmatprep.subr.bf16.mxu1 %v7303_v23  ;;  %v2108_v18 = vld [vmem:[#allocation7 + $0x6b0] sm:$0xff]  ;;  %v7399_v23 = vcombine.high %v2093_v45, %v2109_v38  ;;  %v7210_v38 = vcombine.low %v1903_v15, %v1919_v31 }
 0x2f5   :  { %v7397_v44 = vcombine.high %v2092_v59, %v2108_v18  ;;  %v7396_v46 = vcombine.low %v2092_v59, %v2108_v18  ;;  %v1935_v59 = vld [vmem:[#allocation7 + $0x148] sm:$0xff] }
 0x2f6   :  { %v1951_v18 = vld [vmem:[#allocation7 + $0x1c8] sm:$0xff] }
 0x2f7   :  { %3764 = vmatpush1.bf16.msra.mxu0 %v7300_v27  ;;  %3807 = vmatpush1.bf16.msra.mxu1 %v7302_v0  ;;  %v2124_v27 = vld [vmem:[#allocation7 + $0x730] sm:$0xff] }
 0x2f8   :  { %3765 = vmatprep.subr.bf16.mxu0 %v7333_v52  ;;  %3808 = vmatprep.subr.bf16.mxu1 %v7335_v2  ;;  %v2140_v0 = vld [vmem:[#allocation7 + $0x7b0] sm:$0xff]  ;;  %v7431_v2 = vcombine.high %v2125_v37, %v2141_v40  ;;  %v7242_v40 = vcombine.low %v1935_v59, %v1951_v18 }
 0x2f9   :  { %v7429_v52 = vcombine.high %v2124_v27, %v2140_v0  ;;  %v7428_v5 = vcombine.low %v2124_v27, %v2140_v0  ;;  %v1967_v27 = vld [vmem:[#allocation7 + $0x248] sm:$0xff] }
 0x2fa   :  { %v1983_v0 = vld [vmem:[#allocation7 + $0x2c8] sm:$0xff] }
 0x2fb   :  { %3766 = vmatpush1.bf16.msra.mxu0 %v7332_v21  ;;  %3809 = vmatpush1.bf16.msra.mxu1 %v7334_v19  ;;  %v1902_v21 = vld [vmem:[#allocation7 + $0x40] sm:$0xff] }
 0x2fc   :  { %3767 = vmatprep.subr.bf16.mxu0 %v7365_v20  ;;  %3810 = vmatprep.subr.bf16.mxu1 %v7367_v54  ;;  %v1918_v19 = vld [vmem:[#allocation7 + $0xc0] sm:$0xff]  ;;  %v7211_v54 = vcombine.high %v1903_v15, %v1919_v31  ;;  %v1999_v15 = vld [vmem:[#allocation7 + $0x348] sm:$0xff] }
 0x2fd   :  { %v7209_v20 = vcombine.high %v1902_v21, %v1918_v19  ;;  %v7208_v45 = vcombine.low %v1902_v21, %v1918_v19  ;;  %v1998_v21 = vld [vmem:[#allocation7 + $0x340] sm:$0xff]  ;;  %v2015_v31 = vld [vmem:[#allocation7 + $0x3c8] sm:$0xff] }
 0x2fe   :  { %v2014_v19 = vld [vmem:[#allocation7 + $0x3c0] sm:$0xff] }
 0x2ff   :  { %3768 = vmatpush1.bf16.msra.mxu0 %v7364_v53  ;;  %3811 = vmatpush1.bf16.msra.mxu1 %v7366_v13  ;;  %v1934_v53 = vld [vmem:[#allocation7 + $0x140] sm:$0xff] }
 0x300   :  { %3769 = vmatprep.subr.bf16.mxu0 %v7397_v44  ;;  %3812 = vmatprep.subr.bf16.mxu1 %v7399_v23  ;;  %v1950_v13 = vld [vmem:[#allocation7 + $0x1c0] sm:$0xff]  ;;  %v7243_v23 = vcombine.high %v1935_v59, %v1951_v18  ;;  %v2031_v59 = vld [vmem:[#allocation7 + $0x448] sm:$0xff] }
 0x301   :  { %v7241_v44 = vcombine.high %v1934_v53, %v1950_v13  ;;  %v7240_v37 = vcombine.low %v1934_v53, %v1950_v13  ;;  %v2030_v53 = vld [vmem:[#allocation7 + $0x440] sm:$0xff]  ;;  %v2047_v18 = vld [vmem:[#allocation7 + $0x4c8] sm:$0xff] }
 0x302   :  { %v2046_v13 = vld [vmem:[#allocation7 + $0x4c0] sm:$0xff] }
 0x303   :  { %3770 = vmatpush1.bf16.msra.mxu0 %v7396_v46  ;;  %3813 = vmatpush1.bf16.msra.mxu1 %v7398_v9  ;;  %v1966_v46 = vld [vmem:[#allocation7 + $0x240] sm:$0xff] }
 0x304   :  { %3771 = vmatprep.subr.bf16.mxu0 %v7429_v52  ;;  %3814 = vmatprep.subr.bf16.mxu1 %v7431_v2  ;;  %v1982_v9 = vld [vmem:[#allocation7 + $0x2c0] sm:$0xff]  ;;  %v7275_v2 = vcombine.high %v1967_v27, %v1983_v0 }
 0x305   :  { %v7273_v52 = vcombine.high %v1966_v46, %v1982_v9 }
 0x307   :  { %3772 = vmatpush1.bf16.msra.mxu0 %v7428_v5  ;;  %3815 = vmatpush1.bf16.msra.mxu1 %v7430_v63  ;;  %v7272_v5 = vcombine.low %v1966_v46, %v1982_v9  ;;  %v7274_v63 = vcombine.low %v1967_v27, %v1983_v0  ;;  %v2063_v46 = vld [vmem:[#allocation7 + $0x548] sm:$0xff]  ;;  %v7336_v27 = vcombine.low %v2030_v53, %v2046_v13 }
 0x308   :  { %3843 = vmatprep.subr.bf16.mxu0 %v7209_v20  ;;  %3886 = vmatprep.subr.bf16.mxu1 %v7211_v54  ;;  %v7305_v20 = vcombine.high %v1998_v21, %v2014_v19  ;;  %v7307_v54 = vcombine.high %v1999_v15, %v2015_v31  ;;  %v2079_v9 = vld [vmem:[#allocation7 + $0x5c8] sm:$0xff]  ;;  %v7338_v0 = vcombine.low %v2031_v59, %v2047_v18 }
 0x30a   :  { %3790 = vmatmul.mubr.bf16.vlgmr.msra.gmra.mrb[172].mxu0 %v8472_v24  ;;  %3833 = vmatmul.mubr.bf16.vlgmr.msra.gmra.mrb[172].mxu1 %v8472_v24 }
 0x30b   :  { %3844 = vmatpush1.bf16.msra.mxu0 %v7208_v45  ;;  %3887 = vmatpush1.bf16.msra.mxu1 %v7210_v38  ;;  %v7304_v45 = vcombine.low %v1998_v21, %v2014_v19  ;;  %v7306_v38 = vcombine.low %v1999_v15, %v2015_v31  ;;  %v2095_v21 = vld [vmem:[#allocation7 + $0x648] sm:$0xff]  ;;  %v7370_v31 = vcombine.low %v2063_v46, %v2079_v9 }
 0x30c   :  { %3845 = vmatprep.subr.bf16.mxu0 %v7241_v44  ;;  %3888 = vmatprep.subr.bf16.mxu1 %v7243_v23  ;;  %v7337_v44 = vcombine.high %v2030_v53, %v2046_v13  ;;  %v7339_v23 = vcombine.high %v2031_v59, %v2047_v18  ;;  %v2111_v19 = vld [vmem:[#allocation7 + $0x6c8] sm:$0xff] }
 0x30d   :  { %3875 = vmatprep.mubr.bf16.mxu0 %v9258_v62  ;;  %3918 = vmatprep.mubr.bf16.mxu1 %v9258_v62  ;;  %v2127_v53 = vld [vmem:[#allocation7 + $0x748] sm:$0xff]  ;;  %v7402_v18 = vcombine.low %v2095_v21, %v2111_v19 }
 0x30e   :  { %v2143_v13 = vld [vmem:[#allocation7 + $0x7c8] sm:$0xff] }
 0x30f   :  { %3846 = vmatpush1.bf16.msra.mxu0 %v7240_v37  ;;  %3889 = vmatpush1.bf16.msra.mxu1 %v7242_v40  ;;  %v2062_v37 = vld [vmem:[#allocation7 + $0x540] sm:$0xff] }
 0x310   :  { %3847 = vmatprep.subr.bf16.mxu0 %v7273_v52  ;;  %3890 = vmatprep.subr.bf16.mxu1 %v7275_v2  ;;  %v2078_v40 = vld [vmem:[#allocation7 + $0x5c0] sm:$0xff]  ;;  %v7371_v2 = vcombine.high %v2063_v46, %v2079_v9  ;;  %v7434_v9 = vcombine.low %v2127_v53, %v2143_v13 }
 0x311   :  { %v7369_v52 = vcombine.high %v2062_v37, %v2078_v40  ;;  %v7368_v15 = vcombine.low %v2062_v37, %v2078_v40  ;;  %v1905_v37 = vld [vmem:[#allocation7 + $0x58] sm:$0xff] }
 0x312   :  { %v1921_v40 = vld [vmem:[#allocation7 + $0xd8] sm:$0xff] }
 0x313   :  { %3848 = vmatpush1.bf16.msra.mxu0 %v7272_v5  ;;  %3891 = vmatpush1.bf16.msra.mxu1 %v7274_v63  ;;  %v2094_v5 = vld [vmem:[#allocation7 + $0x640] sm:$0xff] }
 0x314   :  { %3849 = vmatprep.subr.bf16.mxu0 %v7305_v20  ;;  %3892 = vmatprep.subr.bf16.mxu1 %v7307_v54  ;;  %v2110_v63 = vld [vmem:[#allocation7 + $0x6c0] sm:$0xff]  ;;  %v7403_v54 = vcombine.high %v2095_v21, %v2111_v19  ;;  %v7214_v19 = vcombine.low %v1905_v37, %v1921_v40 }
 0x315   :  { %v7401_v20 = vcombine.high %v2094_v5, %v2110_v63  ;;  %v7400_v59 = vcombine.low %v2094_v5, %v2110_v63  ;;  %v1937_v5 = vld [vmem:[#allocation7 + $0x158] sm:$0xff] }
 0x316   :  { %v1953_v63 = vld [vmem:[#allocation7 + $0x1d8] sm:$0xff] }
 0x317   :  { %3850 = vmatpush1.bf16.msra.mxu0 %v7304_v45  ;;  %3893 = vmatpush1.bf16.msra.mxu1 %v7306_v38  ;;  %v2126_v45 = vld [vmem:[#allocation7 + $0x740] sm:$0xff] }
 0x318   :  { %3851 = vmatprep.subr.bf16.mxu0 %v7337_v44  ;;  %3894 = vmatprep.subr.bf16.mxu1 %v7339_v23  ;;  %v2142_v38 = vld [vmem:[#allocation7 + $0x7c0] sm:$0xff]  ;;  %v7435_v23 = vcombine.high %v2127_v53, %v2143_v13  ;;  %v7246_v13 = vcombine.low %v1937_v5, %v1953_v63 }
 0x319   :  { %v7433_v44 = vcombine.high %v2126_v45, %v2142_v38  ;;  %v7432_v46 = vcombine.low %v2126_v45, %v2142_v38  ;;  %v1969_v45 = vld [vmem:[#allocation7 + $0x258] sm:$0xff] }
 0x31a   :  { %v1985_v38 = vld [vmem:[#allocation7 + $0x2d8] sm:$0xff] }
 0x31b   :  { %3852 = vmatpush1.bf16.msra.mxu0 %v7336_v27  ;;  %3895 = vmatpush1.bf16.msra.mxu1 %v7338_v0  ;;  %v1904_v27 = vld [vmem:[#allocation7 + $0x50] sm:$0xff] }
 0x31c   :  { %3853 = vmatprep.subr.bf16.mxu0 %v7369_v52  ;;  %3896 = vmatprep.subr.bf16.mxu1 %v7371_v2  ;;  %v1920_v0 = vld [vmem:[#allocation7 + $0xd0] sm:$0xff]  ;;  %v7215_v2 = vcombine.high %v1905_v37, %v1921_v40  ;;  %v2001_v37 = vld [vmem:[#allocation7 + $0x358] sm:$0xff] }
 0x31d   :  { %v7213_v52 = vcombine.high %v1904_v27, %v1920_v0  ;;  %v7212_v21 = vcombine.low %v1904_v27, %v1920_v0  ;;  %v2000_v27 = vld [vmem:[#allocation7 + $0x350] sm:$0xff]  ;;  %v2017_v40 = vld [vmem:[#allocation7 + $0x3d8] sm:$0xff] }
 0x31e   :  { %v2016_v0 = vld [vmem:[#allocation7 + $0x3d0] sm:$0xff] }
 0x31f   :  { %3854 = vmatpush1.bf16.msra.mxu0 %v7368_v15  ;;  %3897 = vmatpush1.bf16.msra.mxu1 %v7370_v31  ;;  %v1936_v15 = vld [vmem:[#allocation7 + $0x150] sm:$0xff] }
 0x320   :  { %3855 = vmatprep.subr.bf16.mxu0 %v7401_v20  ;;  %3898 = vmatprep.subr.bf16.mxu1 %v7403_v54  ;;  %v1952_v31 = vld [vmem:[#allocation7 + $0x1d0] sm:$0xff]  ;;  %v7247_v54 = vcombine.high %v1937_v5, %v1953_v63  ;;  %v2033_v63 = vld [vmem:[#allocation7 + $0x458] sm:$0xff] }
 0x321   :  { %v7245_v20 = vcombine.high %v1936_v15, %v1952_v31  ;;  %v7244_v53 = vcombine.low %v1936_v15, %v1952_v31  ;;  %v7311_v15 = vcombine.high %v2001_v37, %v2017_v40  ;;  %v2032_v31 = vld [vmem:[#allocation7 + $0x450] sm:$0xff] }
 0x322   :  { %v2048_v5 = vld [vmem:[#allocation7 + $0x4d0] sm:$0xff] }
 0x323   :  { %3856 = vmatpush1.bf16.msra.mxu0 %v7400_v59  ;;  %3899 = vmatpush1.bf16.msra.mxu1 %v7402_v18  ;;  %v1968_v59 = vld [vmem:[#allocation7 + $0x250] sm:$0xff] }
 0x324   :  { %3857 = vmatprep.subr.bf16.mxu0 %v7433_v44  ;;  %3900 = vmatprep.subr.bf16.mxu1 %v7435_v23  ;;  %v1984_v18 = vld [vmem:[#allocation7 + $0x2d0] sm:$0xff]  ;;  %v7279_v23 = vcombine.high %v1969_v45, %v1985_v38 }
 0x325   :  { %v7277_v44 = vcombine.high %v1968_v59, %v1984_v18 }
 0x327   :  { %3858 = vmatpush1.bf16.msra.mxu0 %v7432_v46  ;;  %3901 = vmatpush1.bf16.msra.mxu1 %v7434_v9  ;;  %v7276_v46 = vcombine.low %v1968_v59, %v1984_v18  ;;  %v7278_v9 = vcombine.low %v1969_v45, %v1985_v38  ;;  %v2064_v18 = vld [vmem:[#allocation7 + $0x550] sm:$0xff]  ;;  %v2065_v38 = vld [vmem:[#allocation7 + $0x558] sm:$0xff] }
 0x328   :  { %3929 = vmatprep.subr.bf16.mxu0 %v7213_v52  ;;  %3972 = vmatprep.subr.bf16.mxu1 %v7215_v2  ;;  %v5277_v52 = vld [vmem:[%s9215_s4 + $0x10] sm:$0xff]  ;;  %v7309_v2 = vcombine.high %v2000_v27, %v2016_v0 }
 0x329   :  { %5355 = vperm.xlu1 %7594, %v5277_v52   ;;  %v2080_v45 = vld [vmem:[#allocation7 + $0x5d0] sm:$0xff] }
 0x32a   :  { %3876 = vmatmul.mubr.bf16.vlgmr.msra.gmra.mrb[176].mxu0 %v8472_v24  ;;  %3919 = vmatmul.mubr.bf16.vlgmr.msra.gmra.mrb[176].mxu1 %v8472_v24 }
 0x32b   :  { %3930 = vmatpush1.bf16.msra.mxu0 %v7212_v21  ;;  %3973 = vmatpush1.bf16.msra.mxu1 %v7214_v19  ;;  %v2049_v21 = vld [vmem:[#allocation7 + $0x4d8] sm:$0xff]  ;;  %v7308_v19 = vcombine.low %v2000_v27, %v2016_v0 }
 0x32c   :  { %3931 = vmatprep.subr.bf16.mxu0 %v7245_v20  ;;  %3974 = vmatprep.subr.bf16.mxu1 %v7247_v54  ;;  %v7310_v20 = vcombine.low %v2001_v37, %v2017_v40  ;;  %v7341_v54 = vcombine.high %v2032_v31, %v2048_v5  ;;  %v7343_v59 = vcombine.high %v2033_v63, %v2049_v21  ;;  %v2097_v27 = vld [vmem:[#allocation7 + $0x658] sm:$0xff] }
 0x32d   :  { %3961 = vmatprep.mubr.bf16.mxu0 %v9258_v62  ;;  %4004 = vmatprep.mubr.bf16.mxu1 %v9258_v62  ;;  %v2113_v0 = vld [vmem:[#allocation7 + $0x6d8] sm:$0xff]  ;;  %v7372_v37 = vcombine.low %v2064_v18, %v2080_v45 }
 0x32f   :  { %3932 = vmatpush1.bf16.msra.mxu0 %v7244_v53  ;;  %3975 = vmatpush1.bf16.msra.mxu1 %v7246_v13  ;;  %v2081_v53 = vld [vmem:[#allocation7 + $0x5d8] sm:$0xff]  ;;  %v7340_v13 = vcombine.low %v2032_v31, %v2048_v5 }
 0x330   :  { %3933 = vmatprep.subr.bf16.mxu0 %v7277_v44  ;;  %3976 = vmatprep.subr.bf16.mxu1 %v7279_v23  ;;  %v7342_v44 = vcombine.low %v2033_v63, %v2049_v21  ;;  %v7373_v23 = vcombine.high %v2064_v18, %v2080_v45  ;;  %v7375_v52 = vcombine.high %v2065_v38, %v2081_v53  ;;  %v2129_v31 = vld [vmem:[#allocation7 + $0x758] sm:$0xff]  ;;  %v1907_v18 = vld [vmem:[#allocation7 + $0x68] sm:$0xff] }
 0x331   :  { %v7374_v40 = vcombine.low %v2065_v38, %v2081_v53  ;;  %v2145_v5 = vld [vmem:[#allocation7 + $0x7d8] sm:$0xff]  ;;  %v7406_v21 = vcombine.low %v2097_v27, %v2113_v0  ;;  %v1923_v45 = vld [vmem:[#allocation7 + $0xe8] sm:$0xff] }
 0x332   :  { %v7438_v53 = vcombine.low %v2129_v31, %v2145_v5 }
 0x333   :  { %3934 = vmatpush1.bf16.msra.mxu0 %v7276_v46  ;;  %3977 = vmatpush1.bf16.msra.mxu1 %v7278_v9  ;;  %v2096_v46 = vld [vmem:[#allocation7 + $0x650] sm:$0xff] }
 0x334   :  { %3935 = vmatprep.subr.bf16.mxu0 %v7309_v2  ;;  %3978 = vmatprep.subr.bf16.mxu1 %v7311_v15  ;;  %v2112_v9 = vld [vmem:[#allocation7 + $0x6d0] sm:$0xff]  ;;  %v7407_v15 = vcombine.high %v2097_v27, %v2113_v0  ;;  %v7218_v0 = vcombine.low %v1907_v18, %v1923_v45 }
 0x335   :  { %v7405_v2 = vcombine.high %v2096_v46, %v2112_v9  ;;  %v7404_v63 = vcombine.low %v2096_v46, %v2112_v9  ;;  %v1939_v46 = vld [vmem:[#allocation7 + $0x168] sm:$0xff] }
 0x336   :  { %v1955_v9 = vld [vmem:[#allocation7 + $0x1e8] sm:$0xff] }
 0x337   :  { %3936 = vmatpush1.bf16.msra.mxu0 %v7308_v19  ;;  %3979 = vmatpush1.bf16.msra.mxu1 %v7310_v20  ;;  %v2128_v19 = vld [vmem:[#allocation7 + $0x750] sm:$0xff] }
 0x338   :  { %3937 = vmatprep.subr.bf16.mxu0 %v7341_v54  ;;  %3980 = vmatprep.subr.bf16.mxu1 %v7343_v59  ;;  %v2144_v20 = vld [vmem:[#allocation7 + $0x7d0] sm:$0xff]  ;;  %v7439_v59 = vcombine.high %v2129_v31, %v2145_v5  ;;  %v7250_v5 = vcombine.low %v1939_v46, %v1955_v9 }
 0x339   :  { %v7437_v54 = vcombine.high %v2128_v19, %v2144_v20  ;;  %v7436_v38 = vcombine.low %v2128_v19, %v2144_v20  ;;  %v1971_v19 = vld [vmem:[#allocation7 + $0x268] sm:$0xff] }
 0x33a   :  { %v1987_v20 = vld [vmem:[#allocation7 + $0x2e8] sm:$0xff] }
 0x33b   :  { %3938 = vmatpush1.bf16.msra.mxu0 %v7340_v13  ;;  %3981 = vmatpush1.bf16.msra.mxu1 %v7342_v44  ;;  %v1906_v13 = vld [vmem:[#allocation7 + $0x60] sm:$0xff] }
 0x33c   :  { %3939 = vmatprep.subr.bf16.mxu0 %v7373_v23  ;;  %3982 = vmatprep.subr.bf16.mxu1 %v7375_v52  ;;  %v1922_v44 = vld [vmem:[#allocation7 + $0xe0] sm:$0xff]  ;;  %v7219_v52 = vcombine.high %v1907_v18, %v1923_v45  ;;  %v2003_v18 = vld [vmem:[#allocation7 + $0x368] sm:$0xff] }
 0x33d   :  { %v7217_v23 = vcombine.high %v1906_v13, %v1922_v44  ;;  %v7216_v27 = vcombine.low %v1906_v13, %v1922_v44  ;;  %v2002_v13 = vld [vmem:[#allocation7 + $0x360] sm:$0xff]  ;;  %v2019_v45 = vld [vmem:[#allocation7 + $0x3e8] sm:$0xff] }
 0x33e   :  { %v2018_v44 = vld [vmem:[#allocation7 + $0x3e0] sm:$0xff] }
 0x33f   :  { %3940 = vmatpush1.bf16.msra.mxu0 %v7372_v37  ;;  %3983 = vmatpush1.bf16.msra.mxu1 %v7374_v40  ;;  %v1938_v37 = vld [vmem:[#allocation7 + $0x160] sm:$0xff] }
 0x340   :  { %3941 = vmatprep.subr.bf16.mxu0 %v7405_v2  ;;  %3984 = vmatprep.subr.bf16.mxu1 %v7407_v15  ;;  %v1954_v40 = vld [vmem:[#allocation7 + $0x1e0] sm:$0xff]  ;;  %v7251_v15 = vcombine.high %v1939_v46, %v1955_v9  ;;  %v2035_v46 = vld [vmem:[#allocation7 + $0x468] sm:$0xff] }
 0x341   :  { %v7249_v2 = vcombine.high %v1938_v37, %v1954_v40  ;;  %v7248_v31 = vcombine.low %v1938_v37, %v1954_v40  ;;  %v2034_v37 = vld [vmem:[#allocation7 + $0x460] sm:$0xff]  ;;  %v2051_v9 = vld [vmem:[#allocation7 + $0x4e8] sm:$0xff] }
 0x342   :  { %v2050_v40 = vld [vmem:[#allocation7 + $0x4e0] sm:$0xff] }
 0x343   :  { %3942 = vmatpush1.bf16.msra.mxu0 %v7404_v63  ;;  %3985 = vmatpush1.bf16.msra.mxu1 %v7406_v21  ;;  %v1970_v63 = vld [vmem:[#allocation7 + $0x260] sm:$0xff] }
 0x344   :  { %3943 = vmatprep.subr.bf16.mxu0 %v7437_v54  ;;  %3986 = vmatprep.subr.bf16.mxu1 %v7439_v59  ;;  %v1986_v21 = vld [vmem:[#allocation7 + $0x2e0] sm:$0xff]  ;;  %v7283_v59 = vcombine.high %v1971_v19, %v1987_v20 }
 0x345   :  { %v7281_v54 = vcombine.high %v1970_v63, %v1986_v21 }
 0x347   :  { %3944 = vmatpush1.bf16.msra.mxu0 %v7436_v38  ;;  %3987 = vmatpush1.bf16.msra.mxu1 %v7438_v53  ;;  %v7280_v38 = vcombine.low %v1970_v63, %v1986_v21  ;;  %v7282_v53 = vcombine.low %v1971_v19, %v1987_v20  ;;  %v2067_v63 = vld [vmem:[#allocation7 + $0x568] sm:$0xff]  ;;  %v7344_v19 = vcombine.low %v2034_v37, %v2050_v40 }
 0x348   :  { %4015 = vmatprep.subr.bf16.mxu0 %v7217_v23  ;;  %4058 = vmatprep.subr.bf16.mxu1 %v7219_v52  ;;  %v7313_v23 = vcombine.high %v2002_v13, %v2018_v44  ;;  %v7315_v52 = vcombine.high %v2003_v18, %v2019_v45  ;;  %v2083_v21 = vld [vmem:[#allocation7 + $0x5e8] sm:$0xff]  ;;  %v7346_v20 = vcombine.low %v2035_v46, %v2051_v9 }
 0x34a   :  { %3962 = vmatmul.mubr.bf16.vlgmr.msra.gmra.mrb[180].mxu0 %v8472_v24  ;;  %4005 = vmatmul.mubr.bf16.vlgmr.msra.gmra.mrb[180].mxu1 %v8472_v24 }
 0x34b   :  { %4016 = vmatpush1.bf16.msra.mxu0 %v7216_v27  ;;  %4059 = vmatpush1.bf16.msra.mxu1 %v7218_v0  ;;  %v7312_v27 = vcombine.low %v2002_v13, %v2018_v44  ;;  %v7314_v0 = vcombine.low %v2003_v18, %v2019_v45  ;;  %v2099_v13 = vld [vmem:[#allocation7 + $0x668] sm:$0xff]  ;;  %v7378_v45 = vcombine.low %v2067_v63, %v2083_v21 }
 0x34c   :  { %4017 = vmatprep.subr.bf16.mxu0 %v7249_v2  ;;  %4060 = vmatprep.subr.bf16.mxu1 %v7251_v15  ;;  %v7345_v2 = vcombine.high %v2034_v37, %v2050_v40  ;;  %v7347_v15 = vcombine.high %v2035_v46, %v2051_v9  ;;  %v2115_v44 = vld [vmem:[#allocation7 + $0x6e8] sm:$0xff] }
 0x34d   :  { %4047 = vmatprep.mubr.bf16.mxu0 %v9258_v62  ;;  %4090 = vmatprep.mubr.bf16.mxu1 %v9258_v62  ;;  %v2131_v37 = vld [vmem:[#allocation7 + $0x768] sm:$0xff]  ;;  %v7410_v9 = vcombine.low %v2099_v13, %v2115_v44 }
 0x34e   :  { %v2147_v40 = vld [vmem:[#allocation7 + $0x7e8] sm:$0xff] }
 0x34f   :  { %4018 = vmatpush1.bf16.msra.mxu0 %v7248_v31  ;;  %4061 = vmatpush1.bf16.msra.mxu1 %v7250_v5  ;;  %v2066_v31 = vld [vmem:[#allocation7 + $0x560] sm:$0xff] }
 0x350   :  { %4019 = vmatprep.subr.bf16.mxu0 %v7281_v54  ;;  %4062 = vmatprep.subr.bf16.mxu1 %v7283_v59  ;;  %v2082_v5 = vld [vmem:[#allocation7 + $0x5e0] sm:$0xff]  ;;  %v7379_v59 = vcombine.high %v2067_v63, %v2083_v21  ;;  %v7442_v21 = vcombine.low %v2131_v37, %v2147_v40 }
 0x351   :  { %v7377_v54 = vcombine.high %v2066_v31, %v2082_v5  ;;  %v7376_v18 = vcombine.low %v2066_v31, %v2082_v5  ;;  %v1909_v31 = vld [vmem:[#allocation7 + $0x78] sm:$0xff] }
 0x352   :  { %v1925_v5 = vld [vmem:[#allocation7 + $0xf8] sm:$0xff] }
 0x353   :  { %4020 = vmatpush1.bf16.msra.mxu0 %v7280_v38  ;;  %4063 = vmatpush1.bf16.msra.mxu1 %v7282_v53  ;;  %v2098_v38 = vld [vmem:[#allocation7 + $0x660] sm:$0xff] }
 0x354   :  { %4021 = vmatprep.subr.bf16.mxu0 %v7313_v23  ;;  %4064 = vmatprep.subr.bf16.mxu1 %v7315_v52  ;;  %v2114_v53 = vld [vmem:[#allocation7 + $0x6e0] sm:$0xff]  ;;  %v7411_v52 = vcombine.high %v2099_v13, %v2115_v44  ;;  %v7222_v44 = vcombine.low %v1909_v31, %v1925_v5 }
 0x355   :  { %v7409_v23 = vcombine.high %v2098_v38, %v2114_v53  ;;  %v7408_v46 = vcombine.low %v2098_v38, %v2114_v53  ;;  %v1941_v38 = vld [vmem:[#allocation7 + $0x178] sm:$0xff] }
 0x356   :  { %v1957_v53 = vld [vmem:[#allocation7 + $0x1f8] sm:$0xff] }
 0x357   :  { %4022 = vmatpush1.bf16.msra.mxu0 %v7312_v27  ;;  %4065 = vmatpush1.bf16.msra.mxu1 %v7314_v0  ;;  %v2130_v27 = vld [vmem:[#allocation7 + $0x760] sm:$0xff] }
 0x358   :  { %4023 = vmatprep.subr.bf16.mxu0 %v7345_v2  ;;  %4066 = vmatprep.subr.bf16.mxu1 %v7347_v15  ;;  %v2146_v0 = vld [vmem:[#allocation7 + $0x7e0] sm:$0xff]  ;;  %v7443_v15 = vcombine.high %v2131_v37, %v2147_v40  ;;  %v7254_v40 = vcombine.low %v1941_v38, %v1957_v53 }
 0x359   :  { %v7441_v2 = vcombine.high %v2130_v27, %v2146_v0  ;;  %v7440_v63 = vcombine.low %v2130_v27, %v2146_v0  ;;  %v1973_v27 = vld [vmem:[#allocation7 + $0x278] sm:$0xff] }
 0x35a   :  { %v1989_v0 = vld [vmem:[#allocation7 + $0x2f8] sm:$0xff] }
 0x35b   :  { %4024 = vmatpush1.bf16.msra.mxu0 %v7344_v19  ;;  %4067 = vmatpush1.bf16.msra.mxu1 %v7346_v20  ;;  %v1908_v19 = vld [vmem:[#allocation7 + $0x70] sm:$0xff] }
 0x35c   :  { %4025 = vmatprep.subr.bf16.mxu0 %v7377_v54  ;;  %4068 = vmatprep.subr.bf16.mxu1 %v7379_v59  ;;  %v1924_v20 = vld [vmem:[#allocation7 + $0xf0] sm:$0xff]  ;;  %v7223_v59 = vcombine.high %v1909_v31, %v1925_v5  ;;  %v2005_v5 = vld [vmem:[#allocation7 + $0x378] sm:$0xff] }
 0x35d   :  { %v7221_v54 = vcombine.high %v1908_v19, %v1924_v20  ;;  %v7220_v13 = vcombine.low %v1908_v19, %v1924_v20  ;;  %v7287_v19 = vcombine.high %v1973_v27, %v1989_v0  ;;  %v2004_v20 = vld [vmem:[#allocation7 + $0x370] sm:$0xff] }
 0x35e   :  { %v2020_v31 = vld [vmem:[#allocation7 + $0x3f0] sm:$0xff] }
 0x35f   :  { %4026 = vmatpush1.bf16.msra.mxu0 %v7376_v18  ;;  %4069 = vmatpush1.bf16.msra.mxu1 %v7378_v45  ;;  %v1940_v18 = vld [vmem:[#allocation7 + $0x170] sm:$0xff] }
 0x360   :  { %4027 = vmatprep.subr.bf16.mxu0 %v7409_v23  ;;  %4070 = vmatprep.subr.bf16.mxu1 %v7411_v52  ;;  %v1956_v45 = vld [vmem:[#allocation7 + $0x1f0] sm:$0xff]  ;;  %v7255_v52 = vcombine.high %v1941_v38, %v1957_v53  ;;  %v2037_v53 = vld [vmem:[#allocation7 + $0x478] sm:$0xff] }
 0x361   :  { %v7253_v23 = vcombine.high %v1940_v18, %v1956_v45  ;;  %v7252_v37 = vcombine.low %v1940_v18, %v1956_v45  ;;  %v2036_v45 = vld [vmem:[#allocation7 + $0x470] sm:$0xff] }
 0x362   :  { %v2052_v38 = vld [vmem:[#allocation7 + $0x4f0] sm:$0xff] }
 0x363   :  { %4028 = vmatpush1.bf16.msra.mxu0 %v7408_v46  ;;  %4071 = vmatpush1.bf16.msra.mxu1 %v7410_v9  ;;  %v1972_v46 = vld [vmem:[#allocation7 + $0x270] sm:$0xff] }
 0x364   :  { %4029 = vmatprep.subr.bf16.mxu0 %v7441_v2  ;;  %4072 = vmatprep.subr.bf16.mxu1 %v7443_v15  ;;  %v1988_v9 = vld [vmem:[#allocation7 + $0x2f0] sm:$0xff]  ;;  %v5278_v2 = vld [vmem:[%s9215_s4 + $0x18] sm:$0xff] }
 0x365   :  { %v7285_v15 = vcombine.high %v1972_v46, %v1988_v9  ;;  %5360 = vperm.xlu1 %7594, %v5278_v2  }
 0x367   :  { %4030 = vmatpush1.bf16.msra.mxu0 %v7440_v63  ;;  %4073 = vmatpush1.bf16.msra.mxu1 %v7442_v21  ;;  %v2021_v63 = vld [vmem:[#allocation7 + $0x3f8] sm:$0xff]  ;;  %v7284_v21 = vcombine.low %v1972_v46, %v1988_v9  ;;  %v4192_v46 = vlaneseq  ;;  %v2068_v9 = vld [vmem:[#allocation7 + $0x570] sm:$0xff] }
 0x368   :  { %4101 = vmatprep.subr.bf16.mxu0 %v7221_v54  ;;  %4144 = vmatprep.subr.bf16.mxu1 %v7223_v59  ;;  %v7286_v54 = vcombine.low %v1973_v27, %v1989_v0  ;;  %v7317_v59 = vcombine.high %v2004_v20, %v2020_v31  ;;  %v7319_v18 = vcombine.high %v2005_v5, %v2021_v63  ;;  %v2084_v27 = vld [vmem:[#allocation7 + $0x5f0] sm:$0xff]  ;;  %v2069_v0 = vld [vmem:[#allocation7 + $0x578] sm:$0xff] }
 0x36a   :  { %4048 = vmatmul.mubr.bf16.vlgmr.msra.gmra.mrb[184].mxu0 %v8472_v24  ;;  %4091 = vmatmul.mubr.bf16.vlgmr.msra.gmra.mrb[184].mxu1 %v8472_v24 }
 0x36b   :  { %4102 = vmatpush1.bf16.msra.mxu0 %v7220_v13  ;;  %4145 = vmatpush1.bf16.msra.mxu1 %v7222_v44  ;;  %v2053_v13 = vld [vmem:[#allocation7 + $0x4f8] sm:$0xff]  ;;  %v7316_v44 = vcombine.low %v2004_v20, %v2020_v31  ;;  %v8520_v20 = vshrl.u32 %v4192_v46, 7  ;;  %v7381_v31 = vcombine.high %v2068_v9, %v2084_v27 }
 0x36c   :  { %4103 = vmatprep.subr.bf16.mxu0 %v7253_v23  ;;  %4146 = vmatprep.subr.bf16.mxu1 %v7255_v52  ;;  %v7318_v23 = vcombine.low %v2005_v5, %v2021_v63  ;;  %v7349_v52 = vcombine.high %v2036_v45, %v2052_v38  ;;  %v7351_v2 = vcombine.high %v2037_v53, %v2053_v13  ;;  %v2100_v63 = vld [vmem:[#allocation7 + $0x670] sm:$0xff] }
 0x36d   :  { %4133 = vmatprep.mubr.bf16.mxu0 %v9258_v62  ;;  %4176 = vmatprep.mubr.bf16.mxu1 %v9258_v62  ;;  %v7350_v17 = vcombine.low %v2037_v53, %v2053_v13  ;;  %v2133_v53 = vld [vmem:[#allocation7 + $0x778] sm:$0xff] }
 0x36e   :  { %v2149_v13 = vld [vmem:[#allocation7 + $0x7f8] sm:$0xff] }
 0x36f   :  { %4104 = vmatpush1.bf16.msra.mxu0 %v7252_v37  ;;  %4147 = vmatpush1.bf16.msra.mxu1 %v7254_v40  ;;  %v8162_v37 = vmov 1983009808  }
 0x370   :  { %4105 = vmatprep.subr.bf16.mxu0 %v7285_v15  ;;  %4148 = vmatprep.subr.bf16.mxu1 %v7287_v19  ;;  %v4190_v40 = vunpack.c.l.s4 %v8162_v37  ;;  %v2085_v15 = vld [vmem:[#allocation7 + $0x5f8] sm:$0xff]  ;;  %v7348_v19 = vcombine.low %v2036_v45, %v2052_v38  ;;  %v7380_v37 = vcombine.low %v2068_v9, %v2084_v27 }
 0x371   :  { %v7383_v5 = vcombine.high %v2069_v0, %v2085_v15  ;;  %v7382_v30 = vcombine.low %v2069_v0, %v2085_v15 }
 0x373   :  { %4106 = vmatpush1.bf16.msra.mxu0 %v7284_v21  ;;  %4149 = vmatpush1.bf16.msra.mxu1 %v7286_v54  ;;  %v4191_v21 = vunpack.c.0.s8 %v4190_v40  ;;  %v2116_v54 = vld [vmem:[#allocation7 + $0x6f0] sm:$0xff] }
 0x374   :  { %4107 = vmatprep.subr.bf16.mxu0 %v7317_v59  ;;  %4150 = vmatprep.subr.bf16.mxu1 %v7319_v18  ;;  %v2101_v59 = vld [vmem:[#allocation7 + $0x678] sm:$0xff]  ;;  %v7413_v38 = vcombine.high %v2100_v63, %v2116_v54 }
 0x375   :  { %v2117_v18 = vld [vmem:[#allocation7 + $0x6f8] sm:$0xff]  ;;  %v8523_v45 = vsub.s32 %v4191_v21, %v8520_v20 }
 0x376   :  { %v7415_v40 = vcombine.high %v2101_v59, %v2117_v18  ;;  %v7414_v9 = vcombine.low %v2101_v59, %v2117_v18 }
 0x377   :  { %4108 = vmatpush1.bf16.msra.mxu0 %v7316_v44  ;;  %4151 = vmatpush1.bf16.msra.mxu1 %v7318_v23  ;;  %v2148_v44 = vld [vmem:[#allocation7 + $0x7f0] sm:$0xff]  ;;  %9259 = vst [vmem:[#allocation49_spill] sm:$0xff] %v8523_v45 }
 0x378   :  { %4109 = vmatprep.subr.bf16.mxu0 %v7349_v52  ;;  %4152 = vmatprep.subr.bf16.mxu1 %v7351_v2  ;;  %v7412_v2 = vcombine.low %v2100_v63, %v2116_v54  ;;  %v7445_v27 = vcombine.high %v2132_v25, %v2148_v44 }
 0x37b   :  { %4110 = vmatpush1.bf16.msra.mxu0 %v7348_v19  ;;  %4153 = vmatpush1.bf16.msra.mxu1 %v7350_v17 }
 0x37c   :  { %4111 = vmatprep.subr.bf16.mxu0 %v7381_v31  ;;  %4154 = vmatprep.subr.bf16.mxu1 %v7383_v5  ;;  %v7447_v5 = vcombine.high %v2133_v53, %v2149_v13 }
 0x37d   :  { %v3533_v23 = vpop.f32.mrb[160].mxu0  ;;  %v3576_v52 = vpop.f32.mrb[160].mxu1 }
 0x37e   :  { %v4187_v46 = vcombine.low %v3533_v23, %v3576_v52  ;;  %v4188_v39 = vcombine.high %v3533_v23, %v3576_v52  ;;  %v3535_v19 = vpop.f32.mrb[161].mxu0  ;;  %v3578_v17 = vpop.f32.mrb[161].mxu1 }
 0x37f   :  { %v4203_v0 = vcombine.low %v3535_v19, %v3578_v17  ;;  %v4204_v15 = vcombine.high %v3535_v19, %v3578_v17  ;;  %4112 = vmatpush1.bf16.msra.mxu0 %v7380_v37  ;;  %4155 = vmatpush1.bf16.msra.mxu1 %v7382_v30  ;;  %v3537_v21 = vpop.f32.mrb[162].mxu0  ;;  %v3580_v31 = vpop.f32.mrb[162].mxu1 }
 0x380   :  { %v4195_v43 = vrot.slane %v4187_v46, %v8523_v45  ;;  %v8527_v7 = vrot.slane %v4188_v39, %v8523_v45  ;;  %v4731_v63 = vcombine.low %v3537_v21, %v3580_v31  ;;  %v4732_v54 = vcombine.high %v3537_v21, %v3580_v31  ;;  %v3539_v32 = vpop.f32.mrb[163].mxu0  ;;  %v3582_v23 = vpop.f32.mrb[163].mxu1  ;;  %4113 = vmatprep.subr.bf16.mxu0 %v7413_v38 }
 0x381   :  { %v4211_v59 = vrot.slane %v4203_v0, %v8523_v45  ;;  %v4218_v18 = vrot.slane %v4204_v15, %v8523_v45  ;;  %v4747_v52 = vcombine.low %v3539_v32, %v3582_v23  ;;  %v4748_v37 = vcombine.high %v3539_v32, %v3582_v23  ;;  %4156 = vmatprep.subr.bf16.mxu1 %v7415_v40 }
 0x382   :  { %v4739_v30 = vrot.slane %v4731_v63, %v8523_v45  ;;  %v8533_v19 = vrot.slane %v4732_v54, %v8523_v45  ;;  %v7444_v46 = vcombine.low %v2132_v25, %v2148_v44  ;;  %v7446_v32 = vcombine.low %v2133_v53, %v2149_v13 }
 0x383   :  { %v4251_v39 = vcombine.low %v4195_v43, %v4211_v59  ;;  %v4252_v17 = vcombine.high %v4195_v43, %v4211_v59  ;;  %v4267_v21 = vcombine.low %v8527_v7, %v4218_v18  ;;  %v4268_v31 = vcombine.high %v8527_v7, %v4218_v18  ;;  %4114 = vmatpush1.bf16.msra.mxu0 %v7412_v2 }
 0x384   :  { %v4755_v38 = vrot.slane %v4747_v52, %v8523_v45  ;;  %v8539_v0 = vrot.slane %v4748_v37, %v8523_v45  ;;  %4157 = vmatpush1.bf16.msra.mxu1 %v7414_v9  ;;  %4115 = vmatprep.subr.bf16.mxu0 %v7445_v27  ;;  %v8163_v7 = vmov 1934713408  }
 0x385   :  { %4158 = vmatprep.subr.bf16.mxu1 %v7447_v5  ;;  %v4254_v44 = vunpack.c.l.s4 %v8163_v7 }
 0x386   :  { %v4795_v40 = vcombine.low %v4739_v30, %v4755_v38  ;;  %v4796_v15 = vcombine.high %v4739_v30, %v4755_v38 }
 0x387   :  { %4116 = vmatpush1.bf16.msra.mxu0 %v7444_v46  ;;  %v4255_v53 = vunpack.c.0.s8 %v4254_v44 }
 0x388   :  { %4159 = vmatpush1.bf16.msra.mxu1 %v7446_v32  ;;  %6291 = vmatprep.subr.bf16.mxu0 %v9258_v62 }
 0x389   :  { %6580 = vmatprep.subr.bf16.mxu1 %v9258_v62  ;;  %v8550_v13 = vsub.s32 %v4255_v53, %v8520_v20 }
 0x38a   :  { %4134 = vmatmul.mubr.bf16.vlgmr.msra.gmra.mrb[188].mxu0 %v8472_v24 }
 0x38b   :  { %4177 = vmatmul.mubr.bf16.vlgmr.msra.gmra.mrb[188].mxu1 %v8472_v24  ;;  %v4259_v23 = vrot.slane %v4251_v39, %v8550_v13  ;;  %v4266_v59 = vrot.slane %v4252_v17, %v8550_v13  ;;  %v4275_v17 = vrot.slane %v4267_v21, %v8550_v13 }
 0x39d   :  { %v3619_v2 = vpop.f32.mrb[164].mxu0  ;;  %v3662_v9 = vpop.f32.mrb[164].mxu1 }
 0x39e   :  { %v4219_v27 = vcombine.low %v3619_v2, %v3662_v9  ;;  %v4220_v5 = vcombine.high %v3619_v2, %v3662_v9  ;;  %v3621_v63 = vpop.f32.mrb[165].mxu0  ;;  %v3664_v54 = vpop.f32.mrb[165].mxu1  ;;  %v4282_v9 = vrot.slane %v4268_v31, %v8550_v13 }
 0x39f   :  { %v4235_v18 = vcombine.low %v3621_v63, %v3664_v54  ;;  %v4236_v52 = vcombine.high %v3621_v63, %v3664_v54  ;;  %v3623_v37 = vpop.f32.mrb[166].mxu0  ;;  %v3666_v24 = vpop.f32.mrb[166].mxu1 }
 0x3a0   :  { %v4227_v30 = vrot.slane %v4219_v27, %v8523_v45  ;;  %v4234_v46 = vrot.slane %v4220_v5, %v8523_v45  ;;  %v4763_v20 = vcombine.low %v3623_v37, %v3666_v24  ;;  %v4764_v38 = vcombine.high %v3623_v37, %v3666_v24  ;;  %v3625_v32 = vpop.f32.mrb[167].mxu0  ;;  %v3668_v7 = vpop.f32.mrb[167].mxu1 }
 0x3a1   :  { %v4243_v44 = vrot.slane %v4235_v18, %v8523_v45  ;;  %v4250_v53 = vrot.slane %v4236_v52, %v8523_v45  ;;  %v4779_v2 = vcombine.low %v3625_v32, %v3668_v7  ;;  %v4780_v39 = vcombine.high %v3625_v32, %v3668_v7 }
 0x3a2   :  { %v4771_v63 = vrot.slane %v4763_v20, %v8523_v45  ;;  %v4778_v27 = vrot.slane %v4764_v38, %v8523_v45  ;;  %v4803_v24 = vrot.slane %v4795_v40, %v8550_v13  ;;  %v4810_v18 = vrot.slane %v4796_v15, %v8550_v13 }
 0x3a3   :  { %v4283_v54 = vcombine.low %v4227_v30, %v4243_v44  ;;  %v4284_v5 = vcombine.high %v4227_v30, %v4243_v44  ;;  %v4299_v43 = vcombine.low %v4234_v46, %v4250_v53  ;;  %v4300_v37 = vcombine.high %v4234_v46, %v4250_v53 }
 0x3a4   :  { %v4787_v52 = vrot.slane %v4779_v2, %v8523_v45  ;;  %v4794_v32 = vrot.slane %v4780_v39, %v8523_v45 }
 0x3a5   :  { %v4291_v21 = vrot.slane %v4283_v54, %v8550_v13  ;;  %v4298_v31 = vrot.slane %v4284_v5, %v8550_v13  ;;  %v4307_v20 = vrot.slane %v4299_v43, %v8550_v13  ;;  %v4314_v38 = vrot.slane %v4300_v37, %v8550_v13 }
 0x3a6   :  { %v4827_v7 = vcombine.low %v4771_v63, %v4787_v52  ;;  %v4828_v30 = vcombine.high %v4771_v63, %v4787_v52  ;;  %v4843_v44 = vcombine.low %v4778_v27, %v4794_v32  ;;  %v4844_v46 = vcombine.high %v4778_v27, %v4794_v32 }
 0x3a7   :  { %v4315_v53 = vcombine.low %v4259_v23, %v4291_v21  ;;  %v4316_v40 = vcombine.high %v4259_v23, %v4291_v21  ;;  %v4317_v25 = vcombine.low %v4266_v59, %v4298_v31  ;;  %v4318_v15 = vcombine.high %v4266_v59, %v4298_v31 }
 0x3a8   :  { %v4319_v62 = vcombine.low %v4275_v17, %v4307_v20  ;;  %v4320_v2 = vcombine.high %v4275_v17, %v4307_v20  ;;  %v4321_v34 = vcombine.low %v4282_v9, %v4314_v38  ;;  %v4322_v39 = vcombine.high %v4282_v9, %v4314_v38 }
 0x3a9   :  { %v8571_v54 = vadd.f32 %v4315_v53, %v8291_v50  ;;  %v8574_v5 = vadd.f32 %v4316_v40, %v8299_v29  ;;  %v8577_v43 = vadd.f32 %v4317_v25, %v8311_v11  ;;  %v8580_v63 = vadd.f32 %v4318_v15, %v8321_v4 }
 0x3aa   :  { %v8583_v23 = vadd.f32 %v4319_v62, %v8331_v60  ;;  %v8586_v59 = vadd.f32 %v4320_v2, %v8341_v58  ;;  %v8589_v17 = vadd.f32 %v4321_v34, %v8353_v48  ;;  %v8592_v50 = vadd.f32 %v4322_v39, %v8363_v47 }
 0x3ab   :  { %v4835_v29 = vrot.slane %v4827_v7, %v8550_v13  ;;  %v4842_v11 = vrot.slane %v4828_v30, %v8550_v13  ;;  %v4851_v25 = vrot.slane %v4843_v44, %v8550_v13  ;;  %v4858_v4 = vrot.slane %v4844_v46, %v8550_v13 }
 0x3ac   :  { %v9260_v60 = vcombine.low %v8533_v19, %v8539_v0  ;;  %v9261_v48 = vcombine.high %v8533_v19, %v8539_v0 }
 0x3ad   :  { %v4859_v47 = vcombine.low %v4803_v24, %v4835_v29  ;;  %v4860_v62 = vcombine.high %v4803_v24, %v4835_v29  ;;  %v4861_v9 = vcombine.low %v4810_v18, %v4842_v11  ;;  %v4862_v27 = vcombine.high %v4810_v18, %v4842_v11 }
 0x3ae   :  { %v4819_v58 = vrot.slane %v9260_v60, %v8550_v13  ;;  %v4826_v34 = vrot.slane %v9261_v48, %v8550_v13 }
 0x3af   :  { %v5311_v31 = vadd.f32 %v4859_v47, %v8373_v22  ;;  %v5315_v20 = vadd.f32 %v4860_v62, %v8384_v56  ;;  %v5319_v38 = vadd.f32 %v4861_v9, %v8410_v10  ;;  %v5323_v7 = vadd.f32 %v4862_v27, %v8420_v55 }
 0x3b0   :  { %v4863_v37 = vcombine.low %v4819_v58, %v4851_v25  ;;  %v4864_v52 = vcombine.high %v4819_v58, %v4851_v25  ;;  %v4865_v32 = vcombine.low %v4826_v34, %v4858_v4  ;;  %v4866_v21 = vcombine.high %v4826_v34, %v4858_v4 }
 0x3b2   :  { %v5327_v30 = vadd.f32 %v4863_v37, %v8430_v49  ;;  %v5331_v19 = vadd.f32 %v4864_v52, %v8440_v36  ;;  %v5335_v0 = vadd.f32 %v4865_v32, %v8450_v42  ;;  %v5339_v24 = vadd.f32 %v4866_v21, %v8460_v12 }
 0x3bd   :  { %v3705_v18 = vpop.f32.mrb[168].mxu0  ;;  %v3748_v44 = vpop.f32.mrb[168].mxu1 }
 0x3be   :  { %v4323_v46 = vcombine.low %v3705_v18, %v3748_v44  ;;  %v4324_v53 = vcombine.high %v3705_v18, %v3748_v44  ;;  %v3707_v40 = vpop.f32.mrb[169].mxu0  ;;  %v3750_v22 = vpop.f32.mrb[169].mxu1 }
 0x3bf   :  { %v4339_v15 = vcombine.low %v3707_v40, %v3750_v22  ;;  %v4340_v56 = vcombine.high %v3707_v40, %v3750_v22  ;;  %v3709_v2 = vpop.f32.mrb[170].mxu0  ;;  %v3752_v10 = vpop.f32.mrb[170].mxu1 }
 0x3c0   :  { %v4331_v55 = vrot.slane %v4323_v46, %v8523_v45  ;;  %v8616_v49 = vrot.slane %v4324_v53, %v8523_v45  ;;  %v4867_v36 = vcombine.low %v3709_v2, %v3752_v10  ;;  %v4868_v39 = vcombine.high %v3709_v2, %v3752_v10  ;;  %v3711_v42 = vpop.f32.mrb[171].mxu0  ;;  %v3754_v29 = vpop.f32.mrb[171].mxu1 }
 0x3c1   :  { %v4347_v12 = vrot.slane %v4339_v15, %v8523_v45  ;;  %v4354_v11 = vrot.slane %v4340_v56, %v8523_v45  ;;  %v4883_v25 = vcombine.low %v3711_v42, %v3754_v29  ;;  %v4884_v4 = vcombine.high %v3711_v42, %v3754_v29  ;;  %v5346_v18 = vpop.permute.xlu0 %5345 }
 0x3c2   :  { %v8621_v60 = vrot.slane %v4867_v36, %v8523_v45  ;;  %v8624_v58 = vrot.slane %v4868_v39, %v8523_v45  ;;  %v8643_v44 = vadd.f32 %v5346_v18, %v8571_v54  ;;  %v8646_v46 = vadd.f32 %v5346_v18, %v8574_v5 }
 0x3c3   :  { %v4387_v48 = vcombine.low %v4331_v55, %v4347_v12  ;;  %v4388_v34 = vcombine.high %v4331_v55, %v4347_v12  ;;  %v4403_v47 = vcombine.low %v8616_v49, %v4354_v11  ;;  %v4404_v62 = vcombine.high %v8616_v49, %v4354_v11 }
 0x3c4   :  { %v8629_v9 = vrot.slane %v4883_v25, %v8523_v45  ;;  %v8632_v27 = vrot.slane %v4884_v4, %v8523_v45  ;;  %v8649_v53 = vadd.f32 %v5346_v18, %v8577_v43  ;;  %v8652_v40 = vadd.f32 %v5346_v18, %v8580_v63 }
 0x3c5   :  { %v8654_v22 = vadd.f32 %v5346_v18, %v5311_v31  ;;  %v8656_v15 = vadd.f32 %v5346_v18, %v5315_v20  ;;  %v8658_v56 = vadd.f32 %v5346_v18, %v5319_v38  ;;  %v8660_v2 = vadd.f32 %v5346_v18, %v5323_v7 }
 0x3c6   :  { %v4931_v37 = vcombine.low %v8621_v60, %v8629_v9  ;;  %v4932_v52 = vcombine.high %v8621_v60, %v8629_v9  ;;  %v4947_v32 = vcombine.low %v8624_v58, %v8632_v27  ;;  %v4948_v21 = vcombine.high %v8624_v58, %v8632_v27 }
 0x3c7   :  { %v8663_v54 = vadd.f32 %v5346_v18, %v8583_v23  ;;  %v8665_v10 = vadd.f32 %v5346_v18, %v5327_v30  ;;  %v8668_v5 = vadd.f32 %v5346_v18, %v8586_v59  ;;  %v8670_v43 = vadd.f32 %v5346_v18, %v5331_v19 }
 0x3c8   :  { %v8673_v63 = vadd.f32 %v5346_v18, %v8589_v17  ;;  %v8675_v31 = vadd.f32 %v5346_v18, %v5335_v0  ;;  %v8678_v20 = vadd.f32 %v5346_v18, %v8592_v50  ;;  %v8680_v38 = vadd.f32 %v5346_v18, %v5339_v24 }
 0x3c9   :  { %v4395_v4 = vrot.slane %v4387_v48, %v8550_v13  ;;  %v4402_v60 = vrot.slane %v4388_v34, %v8550_v13  ;;  %v4411_v36 = vrot.slane %v4403_v47, %v8550_v13  ;;  %v4418_v50 = vrot.slane %v4404_v62, %v8550_v13 }
 0x3ca   :  { %v4939_v62 = vrot.slane %v4931_v37, %v8550_v13  ;;  %v4962_v37 = vrot.slane %v4948_v21, %v8550_v13 }
 0x3dd   :  { %v3791_v39 = vpop.f32.mrb[172].mxu0  ;;  %v3834_v42 = vpop.f32.mrb[172].mxu1 }
 0x3de   :  { %v4355_v9 = vcombine.low %v3791_v39, %v3834_v42  ;;  %v4356_v18 = vcombine.high %v3791_v39, %v3834_v42  ;;  %v3793_v24 = vpop.f32.mrb[173].mxu0  ;;  %v3836_v49 = vpop.f32.mrb[173].mxu1 }
 0x3df   :  { %v4371_v55 = vcombine.low %v3793_v24, %v3836_v49  ;;  %v4372_v29 = vcombine.high %v3793_v24, %v3836_v49  ;;  %v3795_v0 = vpop.f32.mrb[174].mxu0  ;;  %v3838_v12 = vpop.f32.mrb[174].mxu1  ;;  %v4946_v24 = vrot.slane %v4932_v52, %v8550_v13 }
 0x3e0   :  { %v4363_v11 = vrot.slane %v4355_v9, %v8523_v45  ;;  %v4370_v25 = vrot.slane %v4356_v18, %v8523_v45  ;;  %v4899_v17 = vcombine.low %v3795_v0, %v3838_v12  ;;  %v4900_v48 = vcombine.high %v3795_v0, %v3838_v12  ;;  %v3797_v19 = vpop.f32.mrb[175].mxu0  ;;  %v3840_v34 = vpop.f32.mrb[175].mxu1 }
 0x3e1   :  { %v4379_v39 = vrot.slane %v4371_v55, %v8523_v45  ;;  %v4386_v42 = vrot.slane %v4372_v29, %v8523_v45  ;;  %v4915_v59 = vcombine.low %v3797_v19, %v3840_v34  ;;  %v4916_v47 = vcombine.high %v3797_v19, %v3840_v34 }
 0x3e2   :  { %v4907_v49 = vrot.slane %v4899_v17, %v8523_v45  ;;  %v4914_v9 = vrot.slane %v4900_v48, %v8523_v45  ;;  %v4955_v55 = vrot.slane %v4947_v32, %v8550_v13 }
 0x3e3   :  { %v4419_v30 = vcombine.low %v4363_v11, %v4379_v39  ;;  %v4420_v18 = vcombine.high %v4363_v11, %v4379_v39  ;;  %v4435_v7 = vcombine.low %v4370_v25, %v4386_v42  ;;  %v4436_v0 = vcombine.high %v4370_v25, %v4386_v42 }
 0x3e4   :  { %v4923_v52 = vrot.slane %v4915_v59, %v8523_v45  ;;  %v4930_v19 = vrot.slane %v4916_v47, %v8523_v45  ;;  %v8728_v45 = vpop.permute.xlu1 %5350 }
 0x3e5   :  { %v4427_v17 = vrot.slane %v4419_v30, %v8550_v13  ;;  %v4434_v29 = vrot.slane %v4420_v18, %v8550_v13  ;;  %v4443_v12 = vrot.slane %v4435_v7, %v8550_v13  ;;  %v4450_v11 = vrot.slane %v4436_v0, %v8550_v13 }
 0x3e6   :  { %v4963_v25 = vcombine.low %v4907_v49, %v4923_v52  ;;  %v4964_v48 = vcombine.high %v4907_v49, %v4923_v52  ;;  %v4979_v32 = vcombine.low %v4914_v9, %v4930_v19  ;;  %v4980_v34 = vcombine.high %v4914_v9, %v4930_v19 }
 0x3e7   :  { %v4451_v39 = vcombine.low %v4395_v4, %v4427_v17  ;;  %v4452_v42 = vcombine.high %v4395_v4, %v4427_v17  ;;  %v4453_v58 = vcombine.low %v4402_v60, %v4434_v29  ;;  %v4454_v27 = vcombine.high %v4402_v60, %v4434_v29 }
 0x3e8   :  { %v4455_v21 = vcombine.low %v4411_v36, %v4443_v12  ;;  %v4456_v59 = vcombine.high %v4411_v36, %v4443_v12  ;;  %v4457_v23 = vcombine.low %v4418_v50, %v4450_v11  ;;  %v4458_v47 = vcombine.high %v4418_v50, %v4450_v11 }
 0x3e9   :  { %v5280_v30 = vadd.f32 %v4451_v39, %v8293_v61  ;;  %v5284_v18 = vadd.f32 %v4452_v42, %v8301_v35  ;;  %v5288_v7 = vadd.f32 %v4453_v58, %v8313_v26  ;;  %v5292_v0 = vadd.f32 %v4454_v27, %v8323_v16  ;;  %v9262_v42 = vld [vmem:[#allocation43_spill] sm:$0xff]  ;;  %v9263_v58 = vld [vmem:[#allocation46_spill] sm:$0xff] }
 0x3ea   :  { %v5296_v49 = vadd.f32 %v4455_v21, %v8333_v14  ;;  %v5300_v4 = vadd.f32 %v4456_v59, %v8345_v6  ;;  %v5304_v60 = vadd.f32 %v4457_v23, %v8355_v1  ;;  %v5308_v36 = vadd.f32 %v4458_v47, %v8365_v57 }
 0x3eb   :  { %v4971_v50 = vrot.slane %v4963_v25, %v8550_v13  ;;  %v4978_v61 = vrot.slane %v4964_v48, %v8550_v13  ;;  %v4987_v35 = vrot.slane %v4979_v32, %v8550_v13  ;;  %v4994_v26 = vrot.slane %v4980_v34, %v8550_v13 }
 0x3ec   :  { %v5364_v16 = vadd.f32 %v8728_v45, %v5280_v30  ;;  %v5368_v9 = vadd.f32 %v8728_v45, %v5284_v18  ;;  %v5372_v14 = vadd.f32 %v8728_v45, %v5288_v7  ;;  %v5376_v6 = vadd.f32 %v8728_v45, %v5292_v0 }
 0x3ed   :  { %v4995_v52 = vcombine.low %v4939_v62, %v4971_v50  ;;  %v4996_v1 = vcombine.high %v4939_v62, %v4971_v50  ;;  %v4997_v23 = vcombine.low %v4946_v24, %v4978_v61  ;;  %v4998_v57 = vcombine.high %v4946_v24, %v4978_v61 }
 0x3ee   :  { %v4999_v19 = vcombine.low %v4955_v55, %v4987_v35  ;;  %v5000_v17 = vcombine.high %v4955_v55, %v4987_v35  ;;  %v5001_v29 = vcombine.low %v4962_v37, %v4994_v26  ;;  %v5002_v12 = vcombine.high %v4962_v37, %v4994_v26 }
 0x3ef   :  { %v5312_v11 = vadd.f32 %v4995_v52, %v8375_v3  ;;  %v5316_v25 = vadd.f32 %v4996_v1, %v8386_v8  ;;  %v5320_v48 = vadd.f32 %v4997_v23, %v8412_v33  ;;  %v5324_v32 = vadd.f32 %v4998_v57, %v8422_v41 }
 0x3f0   :  { %v5328_v34 = vadd.f32 %v4999_v19, %v8432_v28  ;;  %v5332_v39 = vadd.f32 %v5000_v17, %v8442_v51  ;;  %v5336_v62 = vadd.f32 %v5001_v29, %v9262_v42  ;;  %v5340_v24 = vadd.f32 %v5002_v12, %v9263_v58 }
 0x3f1   :  { %v5428_v27 = vmax.f32 %v5364_v16, 0.0  ;;  %v5396_v55 = vadd.f32 %v8728_v45, %v5312_v11  ;;  %v5432_v37 = vmax.f32 %v5368_v9, 0.0  ;;  %v5400_v3 = vadd.f32 %v8728_v45, %v5316_v25 }
 0x3f2   :  { %v5436_v21 = vmax.f32 %v5372_v14, 0.0  ;;  %v5404_v8 = vadd.f32 %v8728_v45, %v5320_v48  ;;  %v5440_v33 = vmax.f32 %v5376_v6, 0.0  ;;  %v5408_v41 = vadd.f32 %v8728_v45, %v5324_v32 }
 0x3f3   :  { %v9264_v28 = vmax.f32 %v8643_v44, 0.0  ;;  %v5460_v51 = vmax.f32 %v5396_v55, 0.0  ;;  %v9265_v47 = vmax.f32 %v8646_v46, 0.0  ;;  %v5464_v18 = vmax.f32 %v5400_v3, 0.0 }
 0x3f4   :  { %v9266_v7 = vmax.f32 %v8649_v53, 0.0  ;;  %v5468_v50 = vmax.f32 %v5404_v8, 0.0  ;;  %v9267_v61 = vmax.f32 %v8652_v40, 0.0  ;;  %v5472_v26 = vmax.f32 %v5408_v41, 0.0 }
 0x3f5   :  { %v5491_v59 = vpack.c.bf16 %v5428_v27, %v9264_v28  ;;  %v8758_v30 = vpack.c.bf16 %v5432_v37, %v9265_v47  ;;  %v9268_v44 = vmax.f32 %v8654_v22, 0.0  ;;  %v9269_v9 = vmax.f32 %v8656_v15, 0.0 }
 0x3f6   :  { %v8762_v0 = vpack.c.bf16 %v5436_v21, %v9266_v7  ;;  %v8766_v35 = vpack.c.bf16 %v5440_v33, %v9267_v61  ;;  %v5380_v14 = vadd.f32 %v8728_v45, %v5296_v49  ;;  %v5412_v53 = vadd.f32 %v8728_v45, %v5328_v34 }
 0x3f7   :  { %6292 = vmatpush1.bf16.msra.mxu0 %v5491_v59  ;;  %v5507_v16 = vpack.c.bf16 %v5460_v51, %v9268_v44  ;;  %v8772_v46 = vpack.c.bf16 %v5464_v18, %v9269_v9  ;;  %v9270_v6 = vmov 0   ;;  %v9271_v52 = vmax.f32 %v8658_v56, 0.0  ;;  %v9286_v51 = vld [vmem:[#allocation49_spill] sm:$0xff] }
 0x3f8   :  { %6293 = vmatprep.subr.bf16.mxu0 %v9270_v6  ;;  %v9272_v1 = vmax.f32 %v8660_v2, 0.0  ;;  %v5384_v22 = vadd.f32 %v8728_v45, %v5300_v4  ;;  %v5416_v15 = vadd.f32 %v8728_v45, %v5332_v39  ;;  %v5444_v57 = vmax.f32 %v5380_v14, 0.0 }
 0x3f9   :  { %v8779_v40 = vpack.c.bf16 %v5468_v50, %v9271_v52  ;;  %6581 = vmatpush1.bf16.msra.mxu1 %v5507_v16  ;;  %v5476_v19 = vmax.f32 %v5412_v53, 0.0  ;;  %v5388_v49 = vadd.f32 %v8728_v45, %v5304_v60  ;;  %v5420_v17 = vadd.f32 %v8728_v45, %v5336_v62 }
 0x3fa   :  { %v8783_v23 = vpack.c.bf16 %v5472_v26, %v9272_v1  ;;  %6582 = vmatprep.subr.bf16.mxu1 %v9270_v6  ;;  %v5448_v56 = vmax.f32 %v5384_v22, 0.0  ;;  %v5480_v29 = vmax.f32 %v5416_v15, 0.0  ;;  %v5392_v12 = vadd.f32 %v8728_v45, %v5308_v36 }
 0x3fb   :  { %v5424_v2 = vadd.f32 %v8728_v45, %v5340_v24  ;;  %v9273_v11 = vmax.f32 %v8663_v54, 0.0  ;;  %v9274_v25 = vmax.f32 %v8665_v10, 0.0  ;;  %v5452_v32 = vmax.f32 %v5388_v49, 0.0 }
 0x3fc   :  { %v5484_v60 = vmax.f32 %v5420_v17, 0.0  ;;  %v9275_v34 = vmax.f32 %v8668_v5, 0.0  ;;  %v9276_v42 = vmax.f32 %v8670_v43, 0.0  ;;  %v5456_v36 = vmax.f32 %v5392_v12, 0.0 }
 0x3fd   :  { %v8794_v4 = vpack.c.bf16 %v5444_v57, %v9273_v11  ;;  %v8798_v48 = vpack.c.bf16 %v5476_v19, %v9274_v25  ;;  %v5488_v45 = vmax.f32 %v5424_v2, 0.0  ;;  %v9278_v54 = vmax.f32 %v8673_v63, 0.0  ;;  %v3877_v43 = vpop.f32.mrb[176].mxu0  ;;  %v3920_v3 = vpop.f32.mrb[176].mxu1 }
 0x3fe   :  { %v8802_v39 = vpack.c.bf16 %v5448_v56, %v9275_v34  ;;  %v8806_v62 = vpack.c.bf16 %v5480_v29, %v9276_v42  ;;  %v9280_v10 = vmax.f32 %v8675_v31, 0.0  ;;  %v9282_v27 = vmax.f32 %v8678_v20, 0.0  ;;  %v3879_v33 = vpop.f32.mrb[177].mxu0  ;;  %v3922_v63 = vpop.f32.mrb[177].mxu1 }
 0x3ff   :  { %v8810_v58 = vpack.c.bf16 %v5452_v32, %v9278_v54  ;;  %v9284_v5 = vmax.f32 %v8680_v38, 0.0  ;;  %v4459_v21 = vcombine.low %v3877_v43, %v3920_v3  ;;  %v4460_v8 = vcombine.high %v3877_v43, %v3920_v3  ;;  %v3881_v59 = vpop.f32.mrb[178].mxu0  ;;  %v3924_v31 = vpop.f32.mrb[178].mxu1 }
 0x400   :  { %9277 = vst [vmem:[#allocation43_spill] sm:$0xff] %v8806_v62  ;;  %v8814_v24 = vpack.c.bf16 %v5484_v60, %v9280_v10  ;;  %v8818_v55 = vpack.c.bf16 %v5456_v36, %v9282_v27  ;;  %v4475_v41 = vcombine.low %v3879_v33, %v3922_v63  ;;  %v4476_v28 = vcombine.high %v3879_v33, %v3922_v63  ;;  %v3883_v50 = vpop.f32.mrb[179].mxu0  ;;  %v3926_v38 = vpop.f32.mrb[179].mxu1  ;;  %v9308_v62 = vld [vmem:[#allocation24_spill] sm:$0xff] }
 0x401   :  { %9279 = vst [vmem:[#allocation46_spill] sm:$0xff] %v8810_v58  ;;  %v8822_v37 = vpack.c.bf16 %v5488_v45, %v9284_v5  ;;  %v4467_v47 = vrot.slane %v4459_v21, %v9286_v51  ;;  %v4474_v20 = vrot.slane %v4460_v8, %v9286_v51  ;;  %v5003_v18 = vcombine.low %v3881_v59, %v3924_v31  ;;  %v9307_v58 = vld [vmem:[#allocation22_spill] sm:$0xff] }
 0x402   :  { %9281 = vst [vmem:[#allocation50_spill] sm:$0xff] %v8814_v24  ;;  %9283 = vst [vmem:[#allocation51_spill] sm:$0xff] %v8818_v55  ;;  %v5004_v7 = vcombine.high %v3881_v59, %v3924_v31  ;;  %v4483_v61 = vrot.slane %v4475_v41, %v9286_v51  ;;  %v4490_v26 = vrot.slane %v4476_v28, %v9286_v51  ;;  %v9305_v55 = vld [vmem:[#allocation18_spill] sm:$0xff]  ;;  %v9306_v24 = vld [vmem:[#allocation20_spill] sm:$0xff] }
 0x403   :  { %9285 = vst [vmem:[#allocation52_spill] sm:$0xff] %v8822_v37  ;;  %v5019_v44 = vcombine.low %v3883_v50, %v3926_v38  ;;  %v5020_v16 = vcombine.high %v3883_v50, %v3926_v38  ;;  %v5011_v9 = vrot.slane %v5003_v18, %v9286_v51 }
 0x404   :  { %v8830_v14 = vrot.slane %v5004_v7, %v9286_v51  ;;  %v4523_v53 = vcombine.low %v4467_v47, %v4483_v61  ;;  %v4524_v52 = vcombine.high %v4467_v47, %v4483_v61  ;;  %v4539_v1 = vcombine.low %v4474_v20, %v4490_v26 }
 0x405   :  { %v4540_v22 = vcombine.high %v4474_v20, %v4490_v26  ;;  %v5027_v15 = vrot.slane %v5019_v44, %v9286_v51  ;;  %v8834_v57 = vrot.slane %v5020_v16, %v9286_v51 }
 0x406   :  { %v4531_v60 = vrot.slane %v4523_v53, %v8550_v13  ;;  %v4538_v34 = vrot.slane %v4524_v52, %v8550_v13  ;;  %v4547_v28 = vrot.slane %v4539_v1, %v8550_v13 }
 0x407   :  { %v5067_v19 = vcombine.low %v5011_v9, %v5027_v15  ;;  %v5068_v49 = vcombine.high %v5011_v9, %v5027_v15  ;;  %v5083_v17 = vcombine.low %v8830_v14, %v8834_v57  ;;  %v5084_v56 = vcombine.high %v8830_v14, %v8834_v57  ;;  %v9300_v57 = vld [vmem:[#allocation41_spill] sm:$0xff] }
 0x408   :  { %v4554_v59 = vrot.slane %v4540_v22, %v8550_v13 }
 0x409   :  { %v5075_v38 = vrot.slane %v5067_v19, %v8550_v13  ;;  %v5082_v61 = vrot.slane %v5068_v49, %v8550_v13 }
 0x41d   :  { %v3963_v29 = vpop.f32.mrb[180].mxu0  ;;  %v4006_v12 = vpop.f32.mrb[180].mxu1 }
 0x41e   :  { %v4491_v2 = vcombine.low %v3963_v29, %v4006_v12  ;;  %v4492_v11 = vcombine.high %v3963_v29, %v4006_v12  ;;  %v3965_v25 = vpop.f32.mrb[181].mxu0  ;;  %v4008_v32 = vpop.f32.mrb[181].mxu1 }
 0x41f   :  { %v4507_v42 = vcombine.low %v3965_v25, %v4008_v32  ;;  %v4508_v36 = vcombine.high %v3965_v25, %v4008_v32  ;;  %v3967_v45 = vpop.f32.mrb[182].mxu0  ;;  %v4010_v54 = vpop.f32.mrb[182].mxu1 }
 0x420   :  { %v4499_v10 = vrot.slane %v4491_v2, %v9286_v51  ;;  %v4506_v27 = vrot.slane %v4492_v11, %v9286_v51  ;;  %v5035_v5 = vcombine.low %v3967_v45, %v4010_v54  ;;  %v5036_v43 = vcombine.high %v3967_v45, %v4010_v54  ;;  %v3969_v3 = vpop.f32.mrb[183].mxu0  ;;  %v4012_v21 = vpop.f32.mrb[183].mxu1  ;;  %v9288_v54 = vld [vmem:[#allocation17_spill] sm:$0xff] }
 0x421   :  { %v4515_v8 = vrot.slane %v4507_v42, %v9286_v51  ;;  %v4522_v33 = vrot.slane %v4508_v36, %v9286_v51  ;;  %v5051_v63 = vcombine.low %v3969_v3, %v4012_v21  ;;  %v5052_v41 = vcombine.high %v3969_v3, %v4012_v21  ;;  %v9287_v36 = vld [vmem:[#allocation15_spill] sm:$0xff] }
 0x422   :  { %v5043_v31 = vrot.slane %v5035_v5, %v9286_v51  ;;  %v5050_v47 = vrot.slane %v5036_v43, %v9286_v51  ;;  %v9290_v43 = vld [vmem:[#allocation21_spill] sm:$0xff]  ;;  %v9291_v21 = vld [vmem:[#allocation23_spill] sm:$0xff] }
 0x423   :  { %v4555_v20 = vcombine.low %v4499_v10, %v4515_v8  ;;  %v4556_v18 = vcombine.high %v4499_v10, %v4515_v8  ;;  %v4571_v7 = vcombine.low %v4506_v27, %v4522_v33  ;;  %v4572_v50 = vcombine.high %v4506_v27, %v4522_v33  ;;  %v9289_v27 = vld [vmem:[#allocation19_spill] sm:$0xff] }
 0x424   :  { %v5059_v26 = vrot.slane %v5051_v63, %v9286_v51  ;;  %v5066_v44 = vrot.slane %v5052_v41, %v9286_v51  ;;  %v9293_v33 = vld [vmem:[#allocation27_spill] sm:$0xff]  ;;  %v9294_v41 = vld [vmem:[#allocation29_spill] sm:$0xff] }
 0x425   :  { %v4563_v16 = vrot.slane %v4555_v20, %v8550_v13  ;;  %v4570_v9 = vrot.slane %v4556_v18, %v8550_v13  ;;  %v4579_v53 = vrot.slane %v4571_v7, %v8550_v13  ;;  %v4586_v52 = vrot.slane %v4572_v50, %v8550_v13 }
 0x426   :  { %v5099_v1 = vcombine.low %v5043_v31, %v5059_v26  ;;  %v5100_v22 = vcombine.high %v5043_v31, %v5059_v26  ;;  %v5115_v15 = vcombine.low %v5050_v47, %v5066_v44  ;;  %v5116_v29 = vcombine.high %v5050_v47, %v5066_v44 }
 0x427   :  { %v4587_v12 = vcombine.low %v4531_v60, %v4563_v16  ;;  %v4588_v19 = vcombine.high %v4531_v60, %v4563_v16  ;;  %v4589_v2 = vcombine.low %v4538_v34, %v4570_v9  ;;  %v4590_v49 = vcombine.high %v4538_v34, %v4570_v9  ;;  %v9292_v34 = vld [vmem:[#allocation25_spill] sm:$0xff] }
 0x428   :  { %v4591_v11 = vcombine.low %v4547_v28, %v4579_v53  ;;  %v4592_v25 = vcombine.high %v4547_v28, %v4579_v53  ;;  %v4593_v32 = vcombine.low %v4554_v59, %v4586_v52  ;;  %v4594_v42 = vcombine.high %v4554_v59, %v4586_v52 }
 0x429   :  { %v8859_v45 = vadd.f32 %v4587_v12, %v9287_v36  ;;  %v8862_v10 = vadd.f32 %v4588_v19, %v9288_v54  ;;  %v8865_v5 = vadd.f32 %v4589_v2, %v9289_v27  ;;  %v8868_v3 = vadd.f32 %v4590_v49, %v9290_v43  ;;  %v9296_v12 = vld [vmem:[#allocation33_spill] sm:$0xff]  ;;  %v9297_v2 = vld [vmem:[#allocation35_spill] sm:$0xff]  ;;  %v7842_v36 = vld [vmem:[#allocation8 + $0xc] ss:$16 sps:$4 sm:$0xff]  }
 0x42a   :  { %v8871_v60 = vadd.f32 %v4591_v11, %v9291_v21  ;;  %v8874_v8 = vadd.f32 %v4592_v25, %v9292_v34  ;;  %v8877_v63 = vadd.f32 %v4593_v32, %v9293_v33  ;;  %v8880_v28 = vadd.f32 %v4594_v42, %v9294_v41  ;;  %v9298_v49 = vld [vmem:[#allocation37_spill] sm:$0xff]  ;;  %v9299_v25 = vld [vmem:[#allocation39_spill] sm:$0xff]  ;;  %6612 = vmatprep.mubr.bf16.mxu1 %v7842_v36 }
 0x42b   :  { %v5107_v59 = vrot.slane %v5099_v1, %v8550_v13  ;;  %v5114_v31 = vrot.slane %v5100_v22, %v8550_v13  ;;  %v5123_v47 = vrot.slane %v5115_v15, %v8550_v13  ;;  %v5130_v20 = vrot.slane %v5116_v29, %v8550_v13  ;;  %v7839_v22 = vld [vmem:[#allocation8 + $0x4] ss:$16 sps:$4 sm:$0xff]  }
 0x42c   :  { %v5091_v18 = vrot.slane %v5083_v17, %v8550_v13  ;;  %v5098_v7 = vrot.slane %v5084_v56, %v8550_v13  ;;  %v9295_v15 = vld [vmem:[#allocation31_spill] sm:$0xff]  ;;  %6323 = vmatprep.mubr.bf16.mxu0 %v7839_v22 }
 0x42d   :  { %v5131_v50 = vcombine.low %v5075_v38, %v5107_v59  ;;  %v5132_v26 = vcombine.high %v5075_v38, %v5107_v59  ;;  %v5133_v44 = vcombine.low %v5082_v61, %v5114_v31  ;;  %v5134_v16 = vcombine.high %v5082_v61, %v5114_v31  ;;  %v9301_v38 = vld [vmem:[#allocation44_spill] sm:$0xff]  ;;  %v9302_v61 = vld [vmem:[#allocation47_spill] sm:$0xff] }
 0x42e   :  { %v5135_v9 = vcombine.low %v5091_v18, %v5123_v47  ;;  %v5136_v53 = vcombine.high %v5091_v18, %v5123_v47  ;;  %v5137_v52 = vcombine.low %v5098_v7, %v5130_v20  ;;  %v5138_v1 = vcombine.high %v5098_v7, %v5130_v20 }
 0x42f   :  { %v5313_v29 = vadd.f32 %v5131_v50, %v9295_v15  ;;  %v5317_v19 = vadd.f32 %v5132_v26, %v9296_v12  ;;  %v5321_v17 = vadd.f32 %v5133_v44, %v9297_v2  ;;  %v5325_v11 = vadd.f32 %v5134_v16, %v9298_v49 }
 0x430   :  { %v5329_v14 = vadd.f32 %v5135_v9, %v9299_v25  ;;  %v5333_v56 = vadd.f32 %v5136_v53, %v9300_v57  ;;  %v5337_v32 = vadd.f32 %v5137_v52, %v9301_v38  ;;  %v5341_v42 = vadd.f32 %v5138_v1, %v9302_v61 }
 0x43d   :  { %v4049_v54 = vpop.f32.mrb[184].mxu0  ;;  %v4092_v27 = vpop.f32.mrb[184].mxu1 }
 0x43e   :  { %v4595_v43 = vcombine.low %v4049_v54, %v4092_v27  ;;  %v4596_v21 = vcombine.high %v4049_v54, %v4092_v27  ;;  %v4051_v34 = vpop.f32.mrb[185].mxu0  ;;  %v4094_v33 = vpop.f32.mrb[185].mxu1 }
 0x43f   :  { %v4611_v41 = vcombine.low %v4051_v34, %v4094_v33  ;;  %v4612_v59 = vcombine.high %v4051_v34, %v4094_v33  ;;  %v4053_v31 = vpop.f32.mrb[186].mxu0  ;;  %v4096_v47 = vpop.f32.mrb[186].mxu1 }
 0x440   :  { %v4603_v20 = vrot.slane %v4595_v43, %v9286_v51  ;;  %v8904_v18 = vrot.slane %v4596_v21, %v9286_v51  ;;  %v5139_v7 = vcombine.low %v4053_v31, %v4096_v47  ;;  %v5140_v50 = vcombine.high %v4053_v31, %v4096_v47  ;;  %v4055_v26 = vpop.f32.mrb[187].mxu0  ;;  %v4098_v44 = vpop.f32.mrb[187].mxu1 }
 0x441   :  { %v4619_v16 = vrot.slane %v4611_v41, %v9286_v51  ;;  %v4626_v9 = vrot.slane %v4612_v59, %v9286_v51  ;;  %v5155_v53 = vcombine.low %v4055_v26, %v4098_v44  ;;  %v5156_v52 = vcombine.high %v4055_v26, %v4098_v44  ;;  %v5356_v27 = vpop.permute.xlu1 %5355 }
 0x442   :  { %v8909_v1 = vrot.slane %v5139_v7, %v9286_v51  ;;  %v8912_v22 = vrot.slane %v5140_v50, %v9286_v51  ;;  %v8931_v43 = vadd.f32 %v5356_v27, %v8859_v45  ;;  %v8934_v21 = vadd.f32 %v5356_v27, %v8862_v10 }
 0x443   :  { %v4659_v15 = vcombine.low %v4603_v20, %v4619_v16  ;;  %v4660_v12 = vcombine.high %v4603_v20, %v4619_v16  ;;  %v4675_v2 = vcombine.low %v8904_v18, %v4626_v9  ;;  %v4676_v49 = vcombine.high %v8904_v18, %v4626_v9 }
 0x444   :  { %v8917_v25 = vrot.slane %v5155_v53, %v9286_v51  ;;  %v8920_v57 = vrot.slane %v5156_v52, %v9286_v51  ;;  %v8937_v34 = vadd.f32 %v5356_v27, %v8865_v5  ;;  %v8940_v33 = vadd.f32 %v5356_v27, %v8868_v3 }
 0x445   :  { %v8942_v41 = vadd.f32 %v5356_v27, %v5313_v29  ;;  %v8944_v59 = vadd.f32 %v5356_v27, %v5317_v19  ;;  %v8946_v31 = vadd.f32 %v5356_v27, %v5321_v17  ;;  %v8948_v47 = vadd.f32 %v5356_v27, %v5325_v11 }
 0x446   :  { %v5203_v38 = vcombine.low %v8909_v1, %v8917_v25  ;;  %v5204_v61 = vcombine.high %v8909_v1, %v8917_v25  ;;  %v5219_v36 = vcombine.low %v8912_v22, %v8920_v57  ;;  %v8951_v45 = vadd.f32 %v5356_v27, %v8871_v60 }
 0x447   :  { %v8953_v20 = vadd.f32 %v5356_v27, %v5329_v14  ;;  %v8956_v10 = vadd.f32 %v5356_v27, %v8874_v8  ;;  %v8958_v5 = vadd.f32 %v5356_v27, %v5333_v56  ;;  %v8961_v3 = vadd.f32 %v5356_v27, %v8877_v63 }
 0x448   :  { %v8963_v29 = vadd.f32 %v5356_v27, %v5337_v32  ;;  %v8966_v19 = vadd.f32 %v5356_v27, %v8880_v28  ;;  %v8968_v17 = vadd.f32 %v5356_v27, %v5341_v42  ;;  %v4667_v25 = vrot.slane %v4659_v15, %v8550_v13 }
 0x449   :  { %v4674_v27 = vrot.slane %v4660_v12, %v8550_v13  ;;  %v4683_v26 = vrot.slane %v4675_v2, %v8550_v13  ;;  %v4690_v32 = vrot.slane %v4676_v49, %v8550_v13  ;;  %v5211_v2 = vrot.slane %v5203_v38, %v8550_v13 }
 0x44a   :  { %v5218_v49 = vrot.slane %v5204_v61, %v8550_v13 }
 0x45d   :  { %v4135_v28 = vpop.f32.mrb[188].mxu0 }
 0x45e   :  { %v4178_v44 = vpop.f32.mrb[188].mxu1  ;;  %v4137_v16 = vpop.f32.mrb[189].mxu0 }
 0x45f   :  { %v4627_v42 = vcombine.low %v4135_v28, %v4178_v44  ;;  %v4628_v7 = vcombine.high %v4135_v28, %v4178_v44  ;;  %v4180_v18 = vpop.f32.mrb[189].mxu1  ;;  %v4139_v50 = vpop.f32.mrb[190].mxu0 }
 0x460   :  { %v4643_v63 = vcombine.low %v4137_v16, %v4180_v18  ;;  %v4644_v9 = vcombine.high %v4137_v16, %v4180_v18  ;;  %v4182_v56 = vpop.f32.mrb[190].mxu1  ;;  %v4141_v53 = vpop.f32.mrb[191].mxu0 }
 0x461   :  { %v4635_v52 = vrot.slane %v4627_v42, %v9286_v51  ;;  %v4642_v1 = vrot.slane %v4628_v7, %v9286_v51  ;;  %v5171_v8 = vcombine.low %v4139_v50, %v4182_v56  ;;  %v5172_v15 = vcombine.high %v4139_v50, %v4182_v56  ;;  %v4184_v14 = vpop.f32.mrb[191].mxu1 }
 0x462   :  { %v4651_v12 = vrot.slane %v4643_v63, %v9286_v51  ;;  %v4658_v28 = vrot.slane %v4644_v9, %v9286_v51  ;;  %v5187_v44 = vcombine.low %v4141_v53, %v4184_v14  ;;  %v5188_v11 = vcombine.high %v4141_v53, %v4184_v14 }
 0x463   :  { %v5179_v18 = vrot.slane %v5171_v8, %v9286_v51  ;;  %v5186_v16 = vrot.slane %v5172_v15, %v9286_v51  ;;  %v5227_v56 = vrot.slane %v5219_v36, %v8550_v13  ;;  %v9303_v14 = vcombine.high %v8912_v22, %v8920_v57 }
 0x464   :  { %v4691_v42 = vcombine.low %v4635_v52, %v4651_v12  ;;  %v4692_v60 = vcombine.high %v4635_v52, %v4651_v12  ;;  %v4707_v7 = vcombine.low %v4642_v1, %v4658_v28  ;;  %v4708_v54 = vcombine.high %v4642_v1, %v4658_v28 }
 0x465   :  { %v5234_v38 = vrot.slane %v9303_v14, %v8550_v13  ;;  %v5195_v61 = vrot.slane %v5187_v44, %v9286_v51  ;;  %v5202_v8 = vrot.slane %v5188_v11, %v9286_v51  ;;  %v9304_v11 = vld [vmem:[#allocation16_spill] sm:$0xff] }
 0x466   :  { %v4699_v63 = vrot.slane %v4691_v42, %v8550_v13  ;;  %v4706_v50 = vrot.slane %v4692_v60, %v8550_v13  ;;  %v4715_v9 = vrot.slane %v4707_v7, %v8550_v13  ;;  %v4722_v53 = vrot.slane %v4708_v54, %v8550_v13 }
 0x467   :  { %v5235_v52 = vcombine.low %v5179_v18, %v5195_v61  ;;  %v5236_v1 = vcombine.high %v5179_v18, %v5195_v61  ;;  %v5251_v36 = vcombine.low %v5186_v16, %v5202_v8  ;;  %v5252_v15 = vcombine.high %v5186_v16, %v5202_v8  ;;  %v9309_v61 = vld [vmem:[#allocation26_spill] sm:$0xff]  ;;  %v9310_v8 = vld [vmem:[#allocation28_spill] sm:$0xff] }
 0x468   :  { %v4723_v12 = vcombine.low %v4667_v25, %v4699_v63  ;;  %v4724_v28 = vcombine.high %v4667_v25, %v4699_v63  ;;  %v4725_v22 = vcombine.low %v4674_v27, %v4706_v50  ;;  %v4726_v57 = vcombine.high %v4674_v27, %v4706_v50  ;;  %v9311_v63 = vld [vmem:[#allocation30_spill] sm:$0xff] }
 0x469   :  { %v4727_v14 = vcombine.low %v4683_v26, %v4715_v9  ;;  %v4728_v44 = vcombine.high %v4683_v26, %v4715_v9  ;;  %v4729_v37 = vcombine.low %v4690_v32, %v4722_v53  ;;  %v4730_v51 = vcombine.high %v4690_v32, %v4722_v53  ;;  %v5361_v9 = vpop.permute.xlu1 %5360 }
 0x46a   :  { %v5282_v42 = vadd.f32 %v4723_v12, %v9304_v11  ;;  %v5286_v60 = vadd.f32 %v4724_v28, %v9305_v55  ;;  %v5290_v7 = vadd.f32 %v4725_v22, %v9306_v24  ;;  %v5294_v54 = vadd.f32 %v4726_v57, %v9307_v58 }
 0x46b   :  { %v5298_v18 = vadd.f32 %v4727_v14, %v9308_v62  ;;  %v5302_v16 = vadd.f32 %v4728_v44, %v9309_v61  ;;  %v5306_v25 = vadd.f32 %v4729_v37, %v9310_v8  ;;  %v5310_v27 = vadd.f32 %v4730_v51, %v9311_v63  ;;  %v9318_v63 = vld [vmem:[#allocation45_spill] sm:$0xff] }
 0x46c   :  { %v5243_v26 = vrot.slane %v5235_v52, %v8550_v13  ;;  %v5250_v32 = vrot.slane %v5236_v1, %v8550_v13  ;;  %v5259_v50 = vrot.slane %v5251_v36, %v8550_v13  ;;  %v5266_v55 = vrot.slane %v5252_v15, %v8550_v13  ;;  %v9312_v52 = vld [vmem:[#allocation32_spill] sm:$0xff]  ;;  %v9313_v1 = vld [vmem:[#allocation34_spill] sm:$0xff] }
 0x46d   :  { %v5366_v24 = vadd.f32 %v5361_v9, %v5282_v42  ;;  %v5370_v53 = vadd.f32 %v5361_v9, %v5286_v60  ;;  %v5374_v58 = vadd.f32 %v5361_v9, %v5290_v7  ;;  %v5378_v12 = vadd.f32 %v5361_v9, %v5294_v54  ;;  %v9314_v36 = vld [vmem:[#allocation36_spill] sm:$0xff]  ;;  %v9315_v13 = vld [vmem:[#allocation38_spill] sm:$0xff] }
 0x46e   :  { %v5267_v62 = vcombine.low %v5211_v2, %v5243_v26  ;;  %v5268_v28 = vcombine.high %v5211_v2, %v5243_v26  ;;  %v5269_v22 = vcombine.low %v5218_v49, %v5250_v32  ;;  %v5270_v57 = vcombine.high %v5218_v49, %v5250_v32  ;;  %v9316_v42 = vld [vmem:[#allocation40_spill] sm:$0xff]  ;;  %v9317_v7 = vld [vmem:[#allocation42_spill] sm:$0xff] }
 0x46f   :  { %v5271_v37 = vcombine.low %v5227_v56, %v5259_v50  ;;  %v5272_v14 = vcombine.high %v5227_v56, %v5259_v50  ;;  %v5273_v44 = vcombine.low %v5234_v38, %v5266_v55  ;;  %v5274_v51 = vcombine.high %v5234_v38, %v5266_v55  ;;  %v9319_v26 = vld [vmem:[#allocation48_spill] sm:$0xff] }
 0x470   :  { %v5314_v11 = vadd.f32 %v5267_v62, %v9312_v52  ;;  %v5318_v61 = vadd.f32 %v5268_v28, %v9313_v1  ;;  %v5322_v8 = vadd.f32 %v5269_v22, %v9314_v36  ;;  %v5326_v15 = vadd.f32 %v5270_v57, %v9315_v13 }
 0x471   :  { %v5330_v60 = vadd.f32 %v5271_v37, %v9316_v42  ;;  %v5334_v54 = vadd.f32 %v5272_v14, %v9317_v7  ;;  %v5338_v2 = vadd.f32 %v5273_v44, %v9318_v63  ;;  %v5342_v49 = vadd.f32 %v5274_v51, %v9319_v26 }
 0x472   :  { %v5430_v32 = vmax.f32 %v5366_v24, 0.0  ;;  %v5398_v56 = vadd.f32 %v5361_v9, %v5314_v11  ;;  %v5434_v50 = vmax.f32 %v5370_v53, 0.0  ;;  %v5402_v38 = vadd.f32 %v5361_v9, %v5318_v61 }
 0x473   :  { %v5438_v55 = vmax.f32 %v5374_v58, 0.0  ;;  %v5406_v62 = vadd.f32 %v5361_v9, %v5322_v8  ;;  %v5442_v52 = vmax.f32 %v5378_v12, 0.0  ;;  %v5410_v28 = vadd.f32 %v5361_v9, %v5326_v15 }
 0x474   :  { %v9320_v22 = vmax.f32 %v8931_v43, 0.0  ;;  %v5462_v57 = vmax.f32 %v5398_v56, 0.0  ;;  %v9321_v37 = vmax.f32 %v8934_v21, 0.0  ;;  %v5466_v14 = vmax.f32 %v5402_v38, 0.0 }
 0x475   :  { %v9322_v44 = vmax.f32 %v8937_v34, 0.0  ;;  %v5470_v51 = vmax.f32 %v5406_v62, 0.0  ;;  %v9323_v24 = vmax.f32 %v8940_v33, 0.0  ;;  %v5474_v58 = vmax.f32 %v5410_v28, 0.0 }
 0x476   :  { %v5492_v1 = vpack.c.bf16 %v5430_v32, %v9320_v22  ;;  %v5494_v36 = vpack.c.bf16 %v5434_v50, %v9321_v37  ;;  %v9324_v12 = vmax.f32 %v8942_v41, 0.0  ;;  %v9325_v43 = vmax.f32 %v8944_v59, 0.0  ;;  %v7845_v37 = vld [vmem:[#allocation8 + $0x20] ss:$16 sps:$4 sm:$0xff]  }
 0x477   :  { %v5496_v13 = vpack.c.bf16 %v5438_v55, %v9322_v44  ;;  %v9040_v53 = vpack.c.bf16 %v5442_v52, %v9323_v24  ;;  %v5382_v8 = vadd.f32 %v5361_v9, %v5298_v18  ;;  %v5414_v21 = vadd.f32 %v5361_v9, %v5330_v60  ;;  %v7852_v44 = vld [vmem:[#allocation8 + $0x4c] ss:$16 sps:$4 sm:$0xff]  }
 0x478   :  { %6294 = vmatpush1.bf16.msra.mxu0 %v5492_v1  ;;  %v5508_v11 = vpack.c.bf16 %v5462_v57, %v9324_v12  ;;  %v5510_v61 = vpack.c.bf16 %v5466_v14, %v9325_v43  ;;  %v9326_v34 = vmax.f32 %v8946_v31, 0.0  ;;  %v9327_v42 = vmax.f32 %v8948_v47, 0.0  ;;  %v7846_v57 = vld [vmem:[#allocation8 + $0x2c] ss:$16 sps:$4 sm:$0xff]   ;;  %v7848_v14 = vld [vmem:[#allocation8 + $0x28] ss:$16 sps:$4 sm:$0xff]  }
 0x479   :  { %6295 = vmatprep.subr.bf16.mxu0 %v9270_v6  ;;  %v5386_v7 = vadd.f32 %v5361_v9, %v5302_v16  ;;  %v5418_v63 = vadd.f32 %v5361_v9, %v5334_v54  ;;  %v5446_v26 = vmax.f32 %v5382_v8, 0.0  ;;  %v5478_v32 = vmax.f32 %v5414_v21, 0.0  ;;  %v7858_v24 = vld [vmem:[#allocation8 + $0x6c] ss:$16 sps:$4 sm:$0xff]   ;;  %v7860_v12 = vld [vmem:[#allocation8 + $0x68] ss:$16 sps:$4 sm:$0xff]  }
 0x47a   :  { %v5512_v15 = vpack.c.bf16 %v5470_v51, %v9326_v34  ;;  %v5514_v33 = vpack.c.bf16 %v5474_v58, %v9327_v42  ;;  %6583 = vmatpush1.bf16.msra.mxu1 %v5508_v11  ;;  %v5390_v41 = vadd.f32 %v5361_v9, %v5306_v25  ;;  %v5422_v56 = vadd.f32 %v5361_v9, %v5338_v2  ;;  %v7854_v51 = vld [vmem:[#allocation8 + $0x48] ss:$16 sps:$4 sm:$0xff]   ;;  %v7861_v58 = vld [vmem:[#allocation8 + $0x84] ss:$16 sps:$4 sm:$0xff]   ;;  %v7864_v11 = vld [vmem:[#allocation8 + $0x8c] ss:$16 sps:$4 sm:$0xff]  }
 0x47b   :  { %6584 = vmatprep.subr.bf16.mxu1 %v9270_v6  ;;  %v5450_v59 = vmax.f32 %v5386_v7, 0.0  ;;  %v5482_v18 = vmax.f32 %v5418_v63, 0.0  ;;  %v5394_v60 = vadd.f32 %v5361_v9, %v5310_v27  ;;  %v5426_v50 = vadd.f32 %v5361_v9, %v5342_v49  ;;  %v7863_v43 = vld [vmem:[#allocation8 + $0x80] ss:$16 sps:$4 sm:$0xff]   ;;  %v7866_v8 = vld [vmem:[#allocation8 + $0x88] ss:$16 sps:$4 sm:$0xff]  }
 0x47c   :  { %6296 = vmatpush1.bf16.msra.mxu0 %v8758_v30  ;;  %v9328_v31 = vmax.f32 %v8951_v45, 0.0  ;;  %v9329_v47 = vmax.f32 %v8953_v20, 0.0  ;;  %v5454_v54 = vmax.f32 %v5390_v41, 0.0  ;;  %v5486_v55 = vmax.f32 %v5422_v56, 0.0  ;;  %v7870_v21 = vld [vmem:[#allocation8 + $0xac] ss:$16 sps:$4 sm:$0xff]  }
 0x47d   :  { %6297 = vmatprep.subr.bf16.mxu0 %v9270_v6  ;;  %v9330_v25 = vmax.f32 %v8956_v10, 0.0  ;;  %v9331_v62 = vmax.f32 %v8958_v5, 0.0  ;;  %v5458_v27 = vmax.f32 %v5394_v60, 0.0  ;;  %v5490_v9 = vmax.f32 %v5426_v50, 0.0  ;;  %v8029_v5 = vld [vmem:[%s9215_s4] sm:$0xff] }
 0x47e   :  { %v5500_v38 = vpack.c.bf16 %v5446_v26, %v9328_v31  ;;  %v5516_v16 = vpack.c.bf16 %v5478_v32, %v9329_v47  ;;  %6585 = vmatpush1.bf16.msra.mxu1 %v8772_v46  ;;  %v9332_v30 = vmax.f32 %v8961_v3, 0.0  ;;  %v9333_v20 = vmax.f32 %v8963_v29, 0.0  ;;  %v8032_v3 = vld [vmem:[%s9215_s4 + $0x10] sm:$0xff]  ;;  %v7872_v42 = vld [vmem:[#allocation8 + $0xa8] ss:$16 sps:$4 sm:$0xff]  }
 0x47f   :  { %v5502_v2 = vpack.c.bf16 %v5450_v59, %v9330_v25  ;;  %v5518_v52 = vpack.c.bf16 %v5482_v18, %v9331_v62  ;;  %6586 = vmatprep.subr.bf16.mxu1 %v9270_v6  ;;  %v9334_v28 = vmax.f32 %v8966_v19, 0.0  ;;  %v9335_v10 = vmax.f32 %v8968_v17, 0.0  ;;  %v7837_v29 = vld [vmem:[#allocation8] ss:$16 sps:$4 sm:$0xff]   ;;  %v7843_v19 = vld [vmem:[#allocation8 + $0x24] ss:$16 sps:$4 sm:$0xff]  }
 0x480   :  { %v5504_v45 = vpack.c.bf16 %v5454_v54, %v9332_v30  ;;  %v5520_v49 = vpack.c.bf16 %v5486_v55, %v9333_v20  ;;  %6298 = vmatpush1.bf16.msra.mxu0 %v5494_v36  ;;  %v8164_v46 = vmov 1   ;;  %v7840_v17 = vld [vmem:[#allocation8 + $0x8] ss:$16 sps:$4 sm:$0xff]   ;;  %v7849_v36 = vld [vmem:[#allocation8 + $0x44] ss:$16 sps:$4 sm:$0xff]  }
 0x481   :  { %v5506_v22 = vpack.c.bf16 %v5458_v27, %v9334_v28  ;;  %v9072_v1 = vpack.c.bf16 %v5490_v9, %v9335_v10  ;;  %6299 = vmatprep.subr.bf16.mxu0 %v9270_v6  ;;  %7595 = vset.pattern.permute.xlu0 %v8164_v46  ;;  %v7869_v34 = vld [vmem:[#allocation8 + $0xa0] ss:$16 sps:$4 sm:$0xff]   ;;  %v7879_v63 = vld [vmem:[#allocation8 + $0xe4] ss:$16 sps:$4 sm:$0xff]   ;;  %v7878_v26 = vld [vmem:[#allocation8 + $0xc8] ss:$16 sps:$4 sm:$0xff]  }
 0x482   :  { %6587 = vmatpush1.bf16.msra.mxu1 %v5510_v61  ;;  %6870 = vperm.xlu0 %7595, %v8029_v5   ;;  %v7867_v61 = vld [vmem:[#allocation8 + $0xa4] ss:$16 sps:$4 sm:$0xff]   ;;  %v7875_v7 = vld [vmem:[#allocation8 + $0xc0] ss:$16 sps:$4 sm:$0xff]   ;;  %v7882_v32 = vld [vmem:[#allocation8 + $0xec] ss:$16 sps:$4 sm:$0xff]  }
 0x483   :  { %6588 = vmatprep.subr.bf16.mxu1 %v9270_v6  ;;  %7596 = vset.pattern.permute.xlu1 %v8164_v46  ;;  %v7881_v41 = vld [vmem:[#allocation8 + $0xe0] ss:$16 sps:$4 sm:$0xff]   ;;  %v7885_v56 = vld [vmem:[#allocation8 + $0x104] ss:$16 sps:$4 sm:$0xff]   ;;  %v7884_v59 = vld [vmem:[#allocation8 + $0xe8] ss:$16 sps:$4 sm:$0xff]  }
 0x484   :  { %6300 = vmatpush1.bf16.msra.mxu0 %v8762_v0  ;;  %v8030_v0 = vld [vmem:[%s9215_s4 + $0x8] sm:$0xff]  ;;  %v7887_v60 = vld [vmem:[#allocation8 + $0x100] ss:$16 sps:$4 sm:$0xff]   ;;  %v7891_v50 = vld [vmem:[#allocation8 + $0x124] ss:$16 sps:$4 sm:$0xff]  }
 0x485   :  { %6301 = vmatprep.subr.bf16.mxu0 %v9270_v6  ;;  %6874 = vperm.xlu1 %7596, %v8030_v0   ;;  %v7888_v18 = vld [vmem:[#allocation8 + $0x10c] ss:$16 sps:$4 sm:$0xff]   ;;  %v7890_v31 = vld [vmem:[#allocation8 + $0x108] ss:$16 sps:$4 sm:$0xff]   ;;  %v7893_v47 = vld [vmem:[#allocation8 + $0x120] ss:$16 sps:$4 sm:$0xff]  }
 0x486   :  { %6589 = vmatpush1.bf16.msra.mxu1 %v8779_v40  ;;  %v8031_v40 = vld [vmem:[%s9215_s4 + $0x18] sm:$0xff]  ;;  %v7899_v25 = vld [vmem:[#allocation8 + $0x140] ss:$16 sps:$4 sm:$0xff]   ;;  %v7909_v9 = vld [vmem:[#allocation8 + $0x184] ss:$16 sps:$4 sm:$0xff]   ;;  %s8165_s4 = smov [#allocation10]  }
 0x487   :  { %6590 = vmatprep.subr.bf16.mxu1 %v9270_v6  ;;  %6882 = vperm.xlu0 %7595, %v8031_v40   ;;  %v7896_v54 = vld [vmem:[#allocation8 + $0x128] ss:$16 sps:$4 sm:$0xff]   ;;  %v7900_v55 = vld [vmem:[#allocation8 + $0x14c] ss:$16 sps:$4 sm:$0xff]   ;;  %v7905_v27 = vld [vmem:[#allocation8 + $0x160] ss:$16 sps:$4 sm:$0xff]  }
 0x488   :  { %6302 = vmatpush1.bf16.msra.mxu0 %v5496_v13  ;;  %v7855_v13 = vld [vmem:[#allocation8 + $0x64] ss:$16 sps:$4 sm:$0xff]   ;;  %v7902_v62 = vld [vmem:[#allocation8 + $0x148] ss:$16 sps:$4 sm:$0xff]   ;;  %v7911_v20 = vld [vmem:[#allocation8 + $0x180] ss:$16 sps:$4 sm:$0xff]  }
 0x489   :  { %6303 = vmatprep.subr.bf16.mxu0 %v9270_v6  ;;  %6878 = vperm.xlu1 %7596, %v8032_v3   ;;  %v7908_v30 = vld [vmem:[#allocation8 + $0x168] ss:$16 sps:$4 sm:$0xff]   ;;  %v7917_v10 = vld [vmem:[#allocation8 + $0x1a0] ss:$16 sps:$4 sm:$0xff]   ;;  %v7924_v5 = vld [vmem:[#allocation8 + $0x1cc] ss:$16 sps:$4 sm:$0xff]  }
 0x48a   :  { %6591 = vmatpush1.bf16.msra.mxu1 %v5512_v15  ;;  %v7873_v15 = vld [vmem:[#allocation8 + $0xc4] ss:$16 sps:$4 sm:$0xff]   ;;  %v7914_v28 = vld [vmem:[#allocation8 + $0x188] ss:$16 sps:$4 sm:$0xff]   ;;  %v7923_v0 = vld [vmem:[#allocation8 + $0x1c0] ss:$16 sps:$4 sm:$0xff]  }
 0x48b   :  { %6592 = vmatprep.subr.bf16.mxu1 %v9270_v6  ;;  %v7920_v46 = vld [vmem:[#allocation8 + $0x1a8] ss:$16 sps:$4 sm:$0xff]   ;;  %v7927_v40 = vld [vmem:[#allocation8 + $0x1e4] ss:$16 sps:$4 sm:$0xff]   ;;  %s7018_s14 = sshll.u32 %s8165_s4, 4  ;;  %s7019_s14 = int_to_ptr.vmem [resolvable:$true] %s7018_s14 }
 0x48c   :  { %6304 = vmatpush1.bf16.msra.mxu0 %v8766_v35  ;;  %v9336_v35 = vld [vmem:[#allocation43_spill] sm:$0xff]  ;;  %v7926_v3 = vld [vmem:[#allocation8 + $0x1c8] ss:$16 sps:$4 sm:$0xff]   ;;  %s8121_s15 = scalar_lea.vmem %s7019_s14, 8192  ;;  %p8126_p5 = scmp.lt.s32.totalorder %s7019_s14, %s7019_s14 }
 0x48d   :  { %6305 = vmatprep.subr.bf16.mxu0 %v9270_v6  ;;  %p8122_p4 = scmp.ne.s32.totalorder %s7019_s14, %s8121_s15  ;;  %p8127_p6 = scmp.lt.s32.totalorder %s8121_s15, %s8121_s15 }
 0x48e   :  { %6593 = vmatpush1.bf16.msra.mxu1 %v8783_v23  ;;  %v9337_v23 = vld [vmem:[#allocation46_spill] sm:$0xff] }
 0x48f   :  { %6594 = vmatprep.subr.bf16.mxu1 %v9270_v6  ;;  %p8128_p7 = por %p8127_p6, %p8126_p5 }
 0x490   :  { %6306 = vmatpush1.bf16.msra.mxu0 %v9040_v53  ;;  %v7857_v53 = vld [vmem:[#allocation8 + $0x60] ss:$16 sps:$4 sm:$0xff]  }
 0x491   :  { %6307 = vmatprep.subr.bf16.mxu0 %v9270_v6  ;;  %p8129_p8 = pnand %p8128_p7, %p8122_p4 }
 0x492   :  { %6595 = vmatpush1.bf16.msra.mxu1 %v5514_v33  ;;  %v7876_v33 = vld [vmem:[#allocation8 + $0xcc] ss:$16 sps:$4 sm:$0xff]  }
 0x493   :  { %6596 = vmatprep.subr.bf16.mxu1 %v9270_v6 }
 0x494   :  { %6308 = vmatpush1.bf16.msra.mxu0 %v8794_v4  ;;  %v9338_v4 = vld [vmem:[#allocation50_spill] sm:$0xff] }
 0x495   :  { %6309 = vmatprep.subr.bf16.mxu0 %v9270_v6 }
 0x496   :  { %6597 = vmatpush1.bf16.msra.mxu1 %v8798_v48  ;;  %v9339_v48 = vld [vmem:[#allocation51_spill] sm:$0xff] }
 0x497   :  { %6598 = vmatprep.subr.bf16.mxu1 %v9270_v6 }
 0x498   :  { %6310 = vmatpush1.bf16.msra.mxu0 %v5500_v38  ;;  %v7894_v38 = vld [vmem:[#allocation8 + $0x12c] ss:$16 sps:$4 sm:$0xff]  }
 0x499   :  { %6311 = vmatprep.subr.bf16.mxu0 %v9270_v6 }
 0x49a   :  { %6599 = vmatpush1.bf16.msra.mxu1 %v5516_v16  ;;  %v7897_v16 = vld [vmem:[#allocation8 + $0x144] ss:$16 sps:$4 sm:$0xff]  }
 0x49b   :  { %6600 = vmatprep.subr.bf16.mxu1 %v9270_v6 }
 0x49c   :  { %6312 = vmatpush1.bf16.msra.mxu0 %v8802_v39  ;;  %v9340_v39 = vld [vmem:[#allocation52_spill] sm:$0xff] }
 0x49d   :  { %6313 = vmatprep.subr.bf16.mxu0 %v9270_v6 }
 0x49e   :  { %6601 = vmatpush1.bf16.msra.mxu1 %v9336_v35  ;;  %v7930_v35 = vld [vmem:[#allocation8 + $0x1ec] ss:$16 sps:$4 sm:$0xff]  }
 0x49f   :  { %6602 = vmatprep.subr.bf16.mxu1 %v9270_v6 }
 0x4a0   :  { %6314 = vmatpush1.bf16.msra.mxu0 %v5502_v2  ;;  %v7903_v2 = vld [vmem:[#allocation8 + $0x164] ss:$16 sps:$4 sm:$0xff]  }
 0x4a1   :  { %6315 = vmatprep.subr.bf16.mxu0 %v9270_v6 }
 0x4a2   :  { %6603 = vmatpush1.bf16.msra.mxu1 %v5518_v52  ;;  %v7906_v52 = vld [vmem:[#allocation8 + $0x16c] ss:$16 sps:$4 sm:$0xff]  }
 0x4a3   :  { %6604 = vmatprep.subr.bf16.mxu1 %v9270_v6 }
 0x4a4   :  { %6316 = vmatpush1.bf16.msra.mxu0 %v9337_v23  ;;  %v7929_v23 = vld [vmem:[#allocation8 + $0x1e0] ss:$16 sps:$4 sm:$0xff]  }
 0x4a5   :  { %6317 = vmatprep.subr.bf16.mxu0 %v9270_v6 }
 0x4a6   :  { %6605 = vmatpush1.bf16.msra.mxu1 %v9338_v4  ;;  %v7935_v4 = vld [vmem:[#allocation8 + $0x204] ss:$16 sps:$4 sm:$0xff]  }
 0x4a7   :  { %6606 = vmatprep.subr.bf16.mxu1 %v9270_v6 }
 0x4a8   :  { %6318 = vmatpush1.bf16.msra.mxu0 %v5504_v45  ;;  %v7912_v45 = vld [vmem:[#allocation8 + $0x18c] ss:$16 sps:$4 sm:$0xff]  }
 0x4a9   :  { %6319 = vmatprep.subr.bf16.mxu0 %v9270_v6 }
 0x4aa   :  { %6607 = vmatpush1.bf16.msra.mxu1 %v5520_v49  ;;  %v7915_v49 = vld [vmem:[#allocation8 + $0x1a4] ss:$16 sps:$4 sm:$0xff]  }
 0x4ab   :  { %6608 = vmatprep.subr.bf16.mxu1 %v9270_v6 }
 0x4ac   :  { %6320 = vmatpush1.bf16.msra.mxu0 %v9339_v48  ;;  %v7932_v48 = vld [vmem:[#allocation8 + $0x1e8] ss:$16 sps:$4 sm:$0xff]  }
 0x4ad   :  { %6321 = vmatprep.subr.bf16.mxu0 %v9270_v6 }
 0x4ae   :  { %6609 = vmatpush1.bf16.msra.mxu1 %v9340_v39  ;;  %v7938_v39 = vld [vmem:[#allocation8 + $0x20c] ss:$16 sps:$4 sm:$0xff]  }
 0x4af   :  { %6610 = vmatprep.subr.bf16.mxu1 %v9270_v6  ;;  %v7851_v6 = vld [vmem:[#allocation8 + $0x40] ss:$16 sps:$4 sm:$0xff]  }
 0x4b0   :  { %6322 = vmatpush1.bf16.msra.mxu0 %v5506_v22  ;;  %v7918_v22 = vld [vmem:[#allocation8 + $0x1ac] ss:$16 sps:$4 sm:$0xff]  }
 0x4b2   :  { %6611 = vmatpush1.bf16.msra.mxu1 %v9072_v1  ;;  %v7921_v1 = vld [vmem:[#allocation8 + $0x1c4] ss:$16 sps:$4 sm:$0xff]  }
 0x4b3   :  { %6324 = vmatmul.mubr.bf16.vlgmr.msra.gmra.mrb[192].mxu0 %v7837_v29  ;;  %v7933_v29 = vld [vmem:[#allocation8 + $0x200] ss:$16 sps:$4 sm:$0xff]  }
 0x4b4   :  { %6331 = vmatprep.mubr.bf16.mxu0 %v7843_v19  ;;  %v7941_v19 = vld [vmem:[#allocation8 + $0x224] ss:$16 sps:$4 sm:$0xff]  }
 0x4b5   :  { %6613 = vmatmul.mubr.bf16.vlgmr.msra.gmra.mrb[192].mxu1 %v7840_v17  ;;  %v7936_v17 = vld [vmem:[#allocation8 + $0x208] ss:$16 sps:$4 sm:$0xff]  }
 0x4b6   :  { %6620 = vmatprep.mubr.bf16.mxu1 %v7846_v57  ;;  %v7944_v57 = vld [vmem:[#allocation8 + $0x22c] ss:$16 sps:$4 sm:$0xff]  }
 0x4bb   :  { %6332 = vmatmul.mubr.bf16.gmra.mrb[196].mxu0 %v7845_v37  ;;  %v7939_v37 = vld [vmem:[#allocation8 + $0x220] ss:$16 sps:$4 sm:$0xff]  }
 0x4bc   :  { %6339 = vmatprep.mubr.bf16.mxu0 %v7849_v36  ;;  %v7947_v36 = vld [vmem:[#allocation8 + $0x244] ss:$16 sps:$4 sm:$0xff]  }
 0x4bd   :  { %6621 = vmatmul.mubr.bf16.gmra.mrb[196].mxu1 %v7848_v14  ;;  %v7942_v14 = vld [vmem:[#allocation8 + $0x228] ss:$16 sps:$4 sm:$0xff]  }
 0x4be   :  { %6628 = vmatprep.mubr.bf16.mxu1 %v7852_v44  ;;  %v7950_v44 = vld [vmem:[#allocation8 + $0x24c] ss:$16 sps:$4 sm:$0xff]  }
 0x4c3   :  { %6340 = vmatmul.mubr.bf16.gmra.mrb[200].mxu0 %v7851_v6  ;;  %v7945_v6 = vld [vmem:[#allocation8 + $0x240] ss:$16 sps:$4 sm:$0xff]  }
 0x4c4   :  { %6347 = vmatprep.mubr.bf16.mxu0 %v7855_v13  ;;  %v7953_v13 = vld [vmem:[#allocation8 + $0x264] ss:$16 sps:$4 sm:$0xff]  }
 0x4c5   :  { %6629 = vmatmul.mubr.bf16.gmra.mrb[200].mxu1 %v7854_v51  ;;  %v7948_v51 = vld [vmem:[#allocation8 + $0x248] ss:$16 sps:$4 sm:$0xff]  }
 0x4c6   :  { %6636 = vmatprep.mubr.bf16.mxu1 %v7858_v24  ;;  %v7956_v24 = vld [vmem:[#allocation8 + $0x26c] ss:$16 sps:$4 sm:$0xff]  }
 0x4cb   :  { %6348 = vmatmul.mubr.bf16.gmra.mrb[204].mxu0 %v7857_v53  ;;  %v7951_v53 = vld [vmem:[#allocation8 + $0x260] ss:$16 sps:$4 sm:$0xff]  }
 0x4cc   :  { %6355 = vmatprep.mubr.bf16.mxu0 %v7861_v58  ;;  %v7959_v58 = vld [vmem:[#allocation8 + $0x284] ss:$16 sps:$4 sm:$0xff]  }
 0x4cd   :  { %6637 = vmatmul.mubr.bf16.gmra.mrb[204].mxu1 %v7860_v12  ;;  %v7954_v12 = vld [vmem:[#allocation8 + $0x268] ss:$16 sps:$4 sm:$0xff]  }
 0x4ce   :  { %6644 = vmatprep.mubr.bf16.mxu1 %v7864_v11  ;;  %v7962_v11 = vld [vmem:[#allocation8 + $0x28c] ss:$16 sps:$4 sm:$0xff]  }
 0x4d3   :  { %6356 = vmatmul.mubr.bf16.gmra.mrb[208].mxu0 %v7863_v43  ;;  %v7957_v43 = vld [vmem:[#allocation8 + $0x280] ss:$16 sps:$4 sm:$0xff]  }
 0x4d4   :  { %6363 = vmatprep.mubr.bf16.mxu0 %v7867_v61  ;;  %v7965_v61 = vld [vmem:[#allocation8 + $0x2a4] ss:$16 sps:$4 sm:$0xff]  }
 0x4d5   :  { %6645 = vmatmul.mubr.bf16.gmra.mrb[208].mxu1 %v7866_v8  ;;  %v7960_v8 = vld [vmem:[#allocation8 + $0x288] ss:$16 sps:$4 sm:$0xff]  }
 0x4d6   :  { %6652 = vmatprep.mubr.bf16.mxu1 %v7870_v21  ;;  %v7968_v21 = vld [vmem:[#allocation8 + $0x2ac] ss:$16 sps:$4 sm:$0xff]  }
 0x4db   :  { %6364 = vmatmul.mubr.bf16.gmra.mrb[212].mxu0 %v7869_v34  ;;  %v7963_v34 = vld [vmem:[#allocation8 + $0x2a0] ss:$16 sps:$4 sm:$0xff]  }
 0x4dc   :  { %6371 = vmatprep.mubr.bf16.mxu0 %v7873_v15  ;;  %v7971_v15 = vld [vmem:[#allocation8 + $0x2c4] ss:$16 sps:$4 sm:$0xff]  }
 0x4dd   :  { %6653 = vmatmul.mubr.bf16.gmra.mrb[212].mxu1 %v7872_v42  ;;  %v7966_v42 = vld [vmem:[#allocation8 + $0x2a8] ss:$16 sps:$4 sm:$0xff]  }
 0x4de   :  { %6660 = vmatprep.mubr.bf16.mxu1 %v7876_v33  ;;  %v7974_v33 = vld [vmem:[#allocation8 + $0x2cc] ss:$16 sps:$4 sm:$0xff]  }
 0x4e3   :  { %6372 = vmatmul.mubr.bf16.gmra.mrb[216].mxu0 %v7875_v7  ;;  %v7969_v7 = vld [vmem:[#allocation8 + $0x2c0] ss:$16 sps:$4 sm:$0xff]  }
 0x4e4   :  { %6379 = vmatprep.mubr.bf16.mxu0 %v7879_v63  ;;  %v7977_v63 = vld [vmem:[#allocation8 + $0x2e4] ss:$16 sps:$4 sm:$0xff]  }
 0x4e5   :  { %6661 = vmatmul.mubr.bf16.gmra.mrb[216].mxu1 %v7878_v26  ;;  %v7972_v26 = vld [vmem:[#allocation8 + $0x2c8] ss:$16 sps:$4 sm:$0xff]  }
 0x4e6   :  { %6668 = vmatprep.mubr.bf16.mxu1 %v7882_v32  ;;  %v7980_v32 = vld [vmem:[#allocation8 + $0x2ec] ss:$16 sps:$4 sm:$0xff]  }
 0x4eb   :  { %6380 = vmatmul.mubr.bf16.gmra.mrb[220].mxu0 %v7881_v41  ;;  %v7975_v41 = vld [vmem:[#allocation8 + $0x2e0] ss:$16 sps:$4 sm:$0xff]  }
 0x4ec   :  { %6387 = vmatprep.mubr.bf16.mxu0 %v7885_v56  ;;  %v7983_v56 = vld [vmem:[#allocation8 + $0x304] ss:$16 sps:$4 sm:$0xff]  }
 0x4ed   :  { %6669 = vmatmul.mubr.bf16.gmra.mrb[220].mxu1 %v7884_v59  ;;  %v7978_v59 = vld [vmem:[#allocation8 + $0x2e8] ss:$16 sps:$4 sm:$0xff]  }
 0x4ee   :  { %6676 = vmatprep.mubr.bf16.mxu1 %v7888_v18  ;;  %v7986_v18 = vld [vmem:[#allocation8 + $0x30c] ss:$16 sps:$4 sm:$0xff]  }
 0x4f3   :  { %6388 = vmatmul.mubr.bf16.gmra.mrb[224].mxu0 %v7887_v60  ;;  %v7981_v60 = vld [vmem:[#allocation8 + $0x300] ss:$16 sps:$4 sm:$0xff]  }
 0x4f4   :  { %6395 = vmatprep.mubr.bf16.mxu0 %v7891_v50  ;;  %v7989_v50 = vld [vmem:[#allocation8 + $0x324] ss:$16 sps:$4 sm:$0xff]  }
 0x4f5   :  { %6677 = vmatmul.mubr.bf16.gmra.mrb[224].mxu1 %v7890_v31  ;;  %v7984_v31 = vld [vmem:[#allocation8 + $0x308] ss:$16 sps:$4 sm:$0xff]  }
 0x4f6   :  { %6684 = vmatprep.mubr.bf16.mxu1 %v7894_v38  ;;  %v7992_v38 = vld [vmem:[#allocation8 + $0x32c] ss:$16 sps:$4 sm:$0xff]  }
 0x4fb   :  { %6396 = vmatmul.mubr.bf16.gmra.mrb[228].mxu0 %v7893_v47  ;;  %v7987_v47 = vld [vmem:[#allocation8 + $0x320] ss:$16 sps:$4 sm:$0xff]  }
 0x4fc   :  { %6403 = vmatprep.mubr.bf16.mxu0 %v7897_v16  ;;  %v7995_v16 = vld [vmem:[#allocation8 + $0x344] ss:$16 sps:$4 sm:$0xff]  }
 0x4fd   :  { %6685 = vmatmul.mubr.bf16.gmra.mrb[228].mxu1 %v7896_v54  ;;  %v7990_v54 = vld [vmem:[#allocation8 + $0x328] ss:$16 sps:$4 sm:$0xff]  }
 0x4fe   :  { %6692 = vmatprep.mubr.bf16.mxu1 %v7900_v55  ;;  %v7998_v55 = vld [vmem:[#allocation8 + $0x34c] ss:$16 sps:$4 sm:$0xff]  }
 0x503   :  { %6404 = vmatmul.mubr.bf16.gmra.mrb[232].mxu0 %v7899_v25  ;;  %v7993_v25 = vld [vmem:[#allocation8 + $0x340] ss:$16 sps:$4 sm:$0xff]  }
 0x504   :  { %6411 = vmatprep.mubr.bf16.mxu0 %v7903_v2  ;;  %v8001_v2 = vld [vmem:[#allocation8 + $0x364] ss:$16 sps:$4 sm:$0xff]  }
 0x505   :  { %6693 = vmatmul.mubr.bf16.gmra.mrb[232].mxu1 %v7902_v62  ;;  %v7996_v62 = vld [vmem:[#allocation8 + $0x348] ss:$16 sps:$4 sm:$0xff]  }
 0x506   :  { %6700 = vmatprep.mubr.bf16.mxu1 %v7906_v52  ;;  %v8004_v52 = vld [vmem:[#allocation8 + $0x36c] ss:$16 sps:$4 sm:$0xff]  }
 0x50b   :  { %6412 = vmatmul.mubr.bf16.gmra.mrb[236].mxu0 %v7905_v27 }
 0x50c   :  { %6419 = vmatprep.mubr.bf16.mxu0 %v7909_v9 }
 0x50d   :  { %6701 = vmatmul.mubr.bf16.gmra.mrb[236].mxu1 %v7908_v30  ;;  %v9124_v30 = vpop.permute.xlu0 %6870 }
 0x50e   :  { %6708 = vmatprep.mubr.bf16.mxu1 %v7912_v45  ;;  %v7999_v45 = vld [vmem:[#allocation8 + $0x360] ss:$16 sps:$4 sm:$0xff]  }
 0x513   :  { %6420 = vmatmul.mubr.bf16.gmra.mrb[240].mxu0 %v7911_v20 }
 0x514   :  { %6427 = vmatprep.mubr.bf16.mxu0 %v7915_v49 }
 0x515   :  { %6709 = vmatmul.mubr.bf16.gmra.mrb[240].mxu1 %v7914_v28  ;;  %v8007_v28 = vld [vmem:[#allocation8 + $0x384] ss:$16 sps:$4 sm:$0xff]  }
 0x516   :  { %6716 = vmatprep.mubr.bf16.mxu1 %v7918_v22 }
 0x51b   :  { %6428 = vmatmul.mubr.bf16.gmra.mrb[244].mxu0 %v7917_v10 }
 0x51c   :  { %6435 = vmatprep.mubr.bf16.mxu0 %v7921_v1 }
 0x51d   :  { %6717 = vmatmul.mubr.bf16.gmra.mrb[244].mxu1 %v7920_v46  ;;  %v8002_v46 = vld [vmem:[#allocation8 + $0x368] ss:$16 sps:$4 sm:$0xff]  }
 0x51e   :  { %6724 = vmatprep.mubr.bf16.mxu1 %v7924_v5 }
 0x523   :  { %6436 = vmatmul.mubr.bf16.gmra.mrb[248].mxu0 %v7923_v0  ;;  %v9126_v0 = vpop.permute.xlu1 %6874 }
 0x524   :  { %6443 = vmatprep.mubr.bf16.mxu0 %v7927_v40  ;;  %v8010_v40 = vld [vmem:[#allocation8 + $0x38c] ss:$16 sps:$4 sm:$0xff]  }
 0x525   :  { %6725 = vmatmul.mubr.bf16.gmra.mrb[248].mxu1 %v7926_v3 }
 0x526   :  { %6732 = vmatprep.mubr.bf16.mxu1 %v7930_v35 }
 0x52b   :  { %6444 = vmatmul.mubr.bf16.gmra.mrb[252].mxu0 %v7929_v23 }
 0x52c   :  { %6451 = vmatprep.mubr.bf16.mxu0 %v7935_v4 }
 0x52d   :  { %6733 = vmatmul.mubr.bf16.gmra.mrb[252].mxu1 %v7932_v48 }
 0x52e   :  { %6740 = vmatprep.mubr.bf16.mxu1 %v7938_v39 }
 0x533   :  { %6452 = vmatmul.mubr.bf16.gmra.mrb[0].mxu0 %v7933_v29  ;;  %v9130_v29 = vpop.permute.xlu1 %6878 }
 0x534   :  { %6459 = vmatprep.mubr.bf16.mxu0 %v7941_v19  ;;  %v8005_v19 = vld [vmem:[#allocation8 + $0x380] ss:$16 sps:$4 sm:$0xff]  }
 0x535   :  { %6741 = vmatmul.mubr.bf16.gmra.mrb[0].mxu1 %v7936_v17 }
 0x536   :  { %6748 = vmatprep.mubr.bf16.mxu1 %v7944_v57 }
 0x53b   :  { %6460 = vmatmul.mubr.bf16.gmra.mrb[4].mxu0 %v7939_v37  ;;  %v8013_v37 = vld [vmem:[#allocation8 + $0x3a4] ss:$16 sps:$4 sm:$0xff]  }
 0x53c   :  { %6467 = vmatprep.mubr.bf16.mxu0 %v7947_v36 }
 0x53d   :  { %6749 = vmatmul.mubr.bf16.gmra.mrb[4].mxu1 %v7942_v14 }
 0x53e   :  { %6756 = vmatprep.mubr.bf16.mxu1 %v7950_v44 }
 0x543   :  { %6468 = vmatmul.mubr.bf16.gmra.mrb[8].mxu0 %v7945_v6  ;;  %v8008_v6 = vld [vmem:[#allocation8 + $0x388] ss:$16 sps:$4 sm:$0xff]  }
 0x544   :  { %6475 = vmatprep.mubr.bf16.mxu0 %v7953_v13 }
 0x545   :  { %6757 = vmatmul.mubr.bf16.gmra.mrb[8].mxu1 %v7948_v51  ;;  %v9132_v51 = vpop.permute.xlu0 %6882 }
 0x546   :  { %6764 = vmatprep.mubr.bf16.mxu1 %v7956_v24  ;;  %v8016_v24 = vld [vmem:[#allocation8 + $0x3ac] ss:$16 sps:$4 sm:$0xff]  }
 0x54b   :  { %6476 = vmatmul.mubr.bf16.gmra.mrb[12].mxu0 %v7951_v53 }
 0x54c   :  { %6483 = vmatprep.mubr.bf16.mxu0 %v7959_v58 }
 0x54d   :  { %6765 = vmatmul.mubr.bf16.gmra.mrb[12].mxu1 %v7954_v12 }
 0x54e   :  { %6772 = vmatprep.mubr.bf16.mxu1 %v7962_v11 }
 0x553   :  { %6484 = vmatmul.mubr.bf16.gmra.mrb[16].mxu0 %v7957_v43 }
 0x554   :  { %6491 = vmatprep.mubr.bf16.mxu0 %v7965_v61 }
 0x555   :  { %6773 = vmatmul.mubr.bf16.gmra.mrb[16].mxu1 %v7960_v8  ;;  %v8011_v8 = vld [vmem:[#allocation8 + $0x3a0] ss:$16 sps:$4 sm:$0xff]  }
 0x556   :  { %6780 = vmatprep.mubr.bf16.mxu1 %v7968_v21 }
 0x55b   :  { %6492 = vmatmul.mubr.bf16.gmra.mrb[20].mxu0 %v7963_v34 }
 0x55c   :  { %6499 = vmatprep.mubr.bf16.mxu0 %v7971_v15  ;;  %v8019_v15 = vld [vmem:[#allocation8 + $0x3c4] ss:$16 sps:$4 sm:$0xff]  }
 0x55d   :  { %6781 = vmatmul.mubr.bf16.gmra.mrb[20].mxu1 %v7966_v42 }
 0x55e   :  { %6788 = vmatprep.mubr.bf16.mxu1 %v7974_v33 }
 0x563   :  { %6500 = vmatmul.mubr.bf16.gmra.mrb[24].mxu0 %v7969_v7 }
 0x564   :  { %6507 = vmatprep.mubr.bf16.mxu0 %v7977_v63  ;;  %v8014_v63 = vld [vmem:[#allocation8 + $0x3a8] ss:$16 sps:$4 sm:$0xff]  }
 0x565   :  { %6789 = vmatmul.mubr.bf16.gmra.mrb[24].mxu1 %v7972_v26 }
 0x566   :  { %6796 = vmatprep.mubr.bf16.mxu1 %v7980_v32  ;;  %v8022_v32 = vld [vmem:[#allocation8 + $0x3cc] ss:$16 sps:$4 sm:$0xff]  }
 0x56b   :  { %6508 = vmatmul.mubr.bf16.gmra.mrb[28].mxu0 %v7975_v41 }
 0x56c   :  { %6515 = vmatprep.mubr.bf16.mxu0 %v7983_v56 }
 0x56d   :  { %6797 = vmatmul.mubr.bf16.gmra.mrb[28].mxu1 %v7978_v59 }
 0x56e   :  { %6804 = vmatprep.mubr.bf16.mxu1 %v7986_v18 }
 0x573   :  { %6516 = vmatmul.mubr.bf16.gmra.mrb[32].mxu0 %v7981_v60 }
 0x574   :  { %6523 = vmatprep.mubr.bf16.mxu0 %v7989_v50 }
 0x575   :  { %6805 = vmatmul.mubr.bf16.gmra.mrb[32].mxu1 %v7984_v31  ;;  %v8017_v31 = vld [vmem:[#allocation8 + $0x3c0] ss:$16 sps:$4 sm:$0xff]  }
 0x576   :  { %6812 = vmatprep.mubr.bf16.mxu1 %v7992_v38 }
 0x57b   :  { %6524 = vmatmul.mubr.bf16.gmra.mrb[36].mxu0 %v7987_v47 }
 0x57c   :  { %6531 = vmatprep.mubr.bf16.mxu0 %v7995_v16  ;;  %v8025_v16 = vld [vmem:[#allocation8 + $0x3e4] ss:$16 sps:$4 sm:$0xff]  }
 0x57d   :  { %6813 = vmatmul.mubr.bf16.gmra.mrb[36].mxu1 %v7990_v54 }
 0x57e   :  { %6820 = vmatprep.mubr.bf16.mxu1 %v7998_v55 }
 0x583   :  { %6532 = vmatmul.mubr.bf16.gmra.mrb[40].mxu0 %v7993_v25 }
 0x584   :  { %6539 = vmatprep.mubr.bf16.mxu0 %v8001_v2  ;;  %v8020_v2 = vld [vmem:[#allocation8 + $0x3c8] ss:$16 sps:$4 sm:$0xff]  }
 0x585   :  { %6821 = vmatmul.mubr.bf16.gmra.mrb[40].mxu1 %v7996_v62 }
 0x586   :  { %v6325_v27 = vpop.f32.mrb[192].mxu0  ;;  %6828 = vmatprep.mubr.bf16.mxu1 %v8004_v52  ;;  %v8028_v52 = vld [vmem:[#allocation8 + $0x3ec] ss:$16 sps:$4 sm:$0xff]  }
 0x587   :  { %v6327_v9 = vpop.f32.mrb[193].mxu0 }
 0x588   :  { %v6328_v20 = vpop.f32.mrb[194].mxu0  ;;  %v6614_v49 = vpop.f32.mrb[192].mxu1 }
 0x589   :  { %v6615_v22 = vadd.f32 %v6614_v49, %v6325_v27  ;;  %v6330_v10 = vpop.f32.mrb[195].mxu0  ;;  %v6616_v1 = vpop.f32.mrb[193].mxu1 }
 0x58a   :  { %v6617_v5 = vpop.f32.mrb[194].mxu1 }
 0x58b   :  { %v6885_v3 = vadd.f32 %v9124_v30, %v6615_v22  ;;  %v6618_v35 = vadd.f32 %v6617_v5, %v6328_v20  ;;  %6540 = vmatmul.mubr.bf16.gmra.mrb[44].mxu0 %v7999_v45  ;;  %v6619_v23 = vpop.f32.mrb[195].mxu1  ;;  %v8023_v22 = vld [vmem:[#allocation8 + $0x3e0] ss:$16 sps:$4 sm:$0xff]  }
 0x58c   :  { %6547 = vmatprep.mubr.bf16.mxu0 %v8007_v28 }
 0x58d   :  { %6949 = vst [vmem:[#allocation10] sm:$0xff] %v6885_v3  ;;  %v6886_v4 = vadd.f32 %v9126_v0, %v6618_v35  ;;  %6829 = vmatmul.mubr.bf16.gmra.mrb[44].mxu1 %v8002_v46  ;;  %v8026_v3 = vld [vmem:[#allocation8 + $0x3e8] ss:$16 sps:$4 sm:$0xff]  }
 0x58e   :  { %v6333_v48 = vpop.f32.mrb[196].mxu0  ;;  %6836 = vmatprep.mubr.bf16.mxu1 %v8010_v40 }
 0x58f   :  { %6950 = vst [vmem:[#allocation10 + $0x8] sm:$0xff] %v6886_v4  ;;  %v6335_v39 = vpop.f32.mrb[197].mxu0 }
 0x590   :  { %v6336_v17 = vpop.f32.mrb[198].mxu0  ;;  %v6622_v57 = vpop.f32.mrb[196].mxu1 }
 0x591   :  { %v6623_v36 = vadd.f32 %v6622_v57, %v6333_v48  ;;  %v6338_v14 = vpop.f32.mrb[199].mxu0  ;;  %v6624_v44 = vpop.f32.mrb[197].mxu1 }
 0x592   :  { %v6625_v13 = vpop.f32.mrb[198].mxu1 }
 0x593   :  { %v6887_v53 = vadd.f32 %v9130_v29, %v6623_v36  ;;  %v6626_v58 = vadd.f32 %v6625_v13, %v6336_v17  ;;  %6548 = vmatmul.mubr.bf16.gmra.mrb[48].mxu0 %v8005_v19  ;;  %v6627_v12 = vpop.f32.mrb[199].mxu1 }
 0x594   :  { %6555 = vmatprep.mubr.bf16.mxu0 %v8013_v37 }
 0x595   :  { %6951 = vst [vmem:[#allocation10 + $0x10] sm:$0xff] %v6887_v53  ;;  %v6888_v11 = vadd.f32 %v9132_v51, %v6626_v58  ;;  %6837 = vmatmul.mubr.bf16.gmra.mrb[48].mxu1 %v8008_v6 }
 0x596   :  { %v6341_v43 = vpop.f32.mrb[200].mxu0  ;;  %6844 = vmatprep.mubr.bf16.mxu1 %v8016_v24 }
 0x597   :  { %6952 = vst [vmem:[#allocation10 + $0x18] sm:$0xff] %v6888_v11  ;;  %v6343_v61 = vpop.f32.mrb[201].mxu0 }
 0x598   :  { %v6344_v21 = vpop.f32.mrb[202].mxu0  ;;  %v6630_v34 = vpop.f32.mrb[200].mxu1 }
 0x599   :  { %v6631_v42 = vadd.f32 %v6630_v34, %v6341_v43  ;;  %v6346_v33 = vpop.f32.mrb[203].mxu0  ;;  %v6632_v7 = vpop.f32.mrb[201].mxu1 }
 0x59a   :  { %v6633_v26 = vpop.f32.mrb[202].mxu1 }
 0x59b   :  { %v6889_v41 = vadd.f32 %v9124_v30, %v6631_v42  ;;  %v6634_v56 = vadd.f32 %v6633_v26, %v6344_v21  ;;  %6556 = vmatmul.mubr.bf16.gmra.mrb[52].mxu0 %v8011_v8  ;;  %v6635_v59 = vpop.f32.mrb[203].mxu1 }
 0x59c   :  { %6563 = vmatprep.mubr.bf16.mxu0 %v8019_v15 }
 0x59d   :  { %6953 = vst [vmem:[#allocation10 + $0x20] sm:$0xff] %v6889_v41  ;;  %v6890_v18 = vadd.f32 %v9126_v0, %v6634_v56  ;;  %6845 = vmatmul.mubr.bf16.gmra.mrb[52].mxu1 %v8014_v63 }
 0x59e   :  { %v6349_v60 = vpop.f32.mrb[204].mxu0  ;;  %6852 = vmatprep.mubr.bf16.mxu1 %v8022_v32 }
 0x59f   :  { %6954 = vst [vmem:[#allocation10 + $0x28] sm:$0xff] %v6890_v18  ;;  %v6351_v50 = vpop.f32.mrb[205].mxu0 }
 0x5a0   :  { %v6352_v38 = vpop.f32.mrb[206].mxu0  ;;  %v6638_v47 = vpop.f32.mrb[204].mxu1 }
 0x5a1   :  { %v6639_v54 = vadd.f32 %v6638_v47, %v6349_v60  ;;  %v6354_v55 = vpop.f32.mrb[207].mxu0  ;;  %v6640_v25 = vpop.f32.mrb[205].mxu1 }
 0x5a2   :  { %v6641_v62 = vpop.f32.mrb[206].mxu1 }
 0x5a3   :  { %v6891_v27 = vadd.f32 %v9130_v29, %v6639_v54  ;;  %v6642_v9 = vadd.f32 %v6641_v62, %v6352_v38  ;;  %6564 = vmatmul.mubr.bf16.gmra.mrb[56].mxu0 %v8017_v31  ;;  %v6643_v45 = vpop.f32.mrb[207].mxu1 }
 0x5a4   :  { %6571 = vmatprep.mubr.bf16.mxu0 %v8025_v16 }
 0x5a5   :  { %6955 = vst [vmem:[#allocation10 + $0x30] sm:$0xff] %v6891_v27  ;;  %v6892_v20 = vadd.f32 %v9132_v51, %v6642_v9  ;;  %6853 = vmatmul.mubr.bf16.gmra.mrb[56].mxu1 %v8020_v2 }
 0x5a6   :  { %v6357_v49 = vpop.f32.mrb[208].mxu0  ;;  %6860 = vmatprep.mubr.bf16.mxu1 %v8028_v52 }
 0x5a7   :  { %6956 = vst [vmem:[#allocation10 + $0x38] sm:$0xff] %v6892_v20  ;;  %v6359_v28 = vpop.f32.mrb[209].mxu0 }
 0x5a8   :  { %v6360_v10 = vpop.f32.mrb[210].mxu0  ;;  %v6646_v1 = vpop.f32.mrb[208].mxu1 }
 0x5a9   :  { %v6647_v46 = vadd.f32 %v6646_v1, %v6357_v49  ;;  %v6362_v5 = vpop.f32.mrb[211].mxu0  ;;  %v6648_v40 = vpop.f32.mrb[209].mxu1 }
 0x5aa   :  { %v6649_v35 = vpop.f32.mrb[210].mxu1 }
 0x5ab   :  { %v6893_v23 = vadd.f32 %v9124_v30, %v6647_v46  ;;  %v6650_v4 = vadd.f32 %v6649_v35, %v6360_v10  ;;  %6572 = vmatmul.mubr.bf16.gmra.mrb[60].mxu0 %v8023_v22  ;;  %v6651_v48 = vpop.f32.mrb[211].mxu1 }
 0x5ad   :  { %6957 = vst [vmem:[#allocation10 + $0x40] sm:$0xff] %v6893_v23  ;;  %v6894_v39 = vadd.f32 %v9126_v0, %v6650_v4  ;;  %6861 = vmatmul.mubr.bf16.gmra.mrb[60].mxu1 %v8026_v3 }
 0x5ae   :  { %v6365_v19 = vpop.f32.mrb[212].mxu0 }
 0x5af   :  { %6958 = vst [vmem:[#allocation10 + $0x48] sm:$0xff] %v6894_v39  ;;  %v6367_v17 = vpop.f32.mrb[213].mxu0 }
 0x5b0   :  { %v6368_v57 = vpop.f32.mrb[214].mxu0  ;;  %v6654_v37 = vpop.f32.mrb[212].mxu1 }
 0x5b1   :  { %v6655_v36 = vadd.f32 %v6654_v37, %v6365_v19  ;;  %v6370_v14 = vpop.f32.mrb[215].mxu0  ;;  %v6656_v44 = vpop.f32.mrb[213].mxu1 }
 0x5b2   :  { %v6657_v6 = vpop.f32.mrb[214].mxu1 }
 0x5b3   :  { %v6895_v13 = vadd.f32 %v9130_v29, %v6655_v36  ;;  %v6658_v24 = vadd.f32 %v6657_v6, %v6368_v57  ;;  %v6659_v53 = vpop.f32.mrb[215].mxu1 }
 0x5b5   :  { %6959 = vst [vmem:[#allocation10 + $0x50] sm:$0xff] %v6895_v13  ;;  %v6896_v58 = vadd.f32 %v9132_v51, %v6658_v24 }
 0x5b6   :  { %v6373_v12 = vpop.f32.mrb[216].mxu0 }
 0x5b7   :  { %6960 = vst [vmem:[#allocation10 + $0x58] sm:$0xff] %v6896_v58  ;;  %v6375_v11 = vpop.f32.mrb[217].mxu0 }
 0x5b8   :  { %v6376_v43 = vpop.f32.mrb[218].mxu0  ;;  %v6662_v61 = vpop.f32.mrb[216].mxu1 }
 0x5b9   :  { %v6663_v8 = vadd.f32 %v6662_v61, %v6373_v12  ;;  %v6378_v21 = vpop.f32.mrb[219].mxu0  ;;  %v6664_v34 = vpop.f32.mrb[217].mxu1 }
 0x5ba   :  { %v6665_v15 = vpop.f32.mrb[218].mxu1 }
 0x5bb   :  { %v6897_v42 = vadd.f32 %v9124_v30, %v6663_v8  ;;  %v6666_v33 = vadd.f32 %v6665_v15, %v6376_v43  ;;  %v6667_v7 = vpop.f32.mrb[219].mxu1 }
 0x5bd   :  { %6961 = vst [vmem:[#allocation10 + $0x60] sm:$0xff] %v6897_v42  ;;  %v6898_v63 = vadd.f32 %v9126_v0, %v6666_v33 }
 0x5be   :  { %v6381_v26 = vpop.f32.mrb[220].mxu0 }
 0x5bf   :  { %6962 = vst [vmem:[#allocation10 + $0x68] sm:$0xff] %v6898_v63  ;;  %v6383_v32 = vpop.f32.mrb[221].mxu0 }
 0x5c0   :  { %v6384_v41 = vpop.f32.mrb[222].mxu0  ;;  %v6670_v56 = vpop.f32.mrb[220].mxu1 }
 0x5c1   :  { %v6671_v59 = vadd.f32 %v6670_v56, %v6381_v26  ;;  %v6386_v18 = vpop.f32.mrb[223].mxu0  ;;  %v6672_v60 = vpop.f32.mrb[221].mxu1 }
 0x5c2   :  { %v6673_v50 = vpop.f32.mrb[222].mxu1 }
 0x5c3   :  { %v6899_v31 = vadd.f32 %v9130_v29, %v6671_v59  ;;  %v6674_v38 = vadd.f32 %v6673_v50, %v6384_v41  ;;  %v6675_v47 = vpop.f32.mrb[223].mxu1 }
 0x5c5   :  { %6963 = vst [vmem:[#allocation10 + $0x70] sm:$0xff] %v6899_v31  ;;  %v6900_v16 = vadd.f32 %v9132_v51, %v6674_v38 }
 0x5c6   :  { %v6389_v54 = vpop.f32.mrb[224].mxu0 }
 0x5c7   :  { %6964 = vst [vmem:[#allocation10 + $0x78] sm:$0xff] %v6900_v16  ;;  %v6391_v55 = vpop.f32.mrb[225].mxu0 }
 0x5c8   :  { %v6392_v25 = vpop.f32.mrb[226].mxu0  ;;  %v6678_v2 = vpop.f32.mrb[224].mxu1 }
 0x5c9   :  { %v6679_v62 = vadd.f32 %v6678_v2, %v6389_v54  ;;  %v6394_v52 = vpop.f32.mrb[227].mxu0  ;;  %v6680_v27 = vpop.f32.mrb[225].mxu1 }
 0x5ca   :  { %v6681_v9 = vpop.f32.mrb[226].mxu1 }
 0x5cb   :  { %v6901_v45 = vadd.f32 %v9124_v30, %v6679_v62  ;;  %v6682_v20 = vadd.f32 %v6681_v9, %v6392_v25  ;;  %v6683_v49 = vpop.f32.mrb[227].mxu1 }
 0x5cd   :  { %6965 = vst [vmem:[#allocation10 + $0x80] sm:$0xff] %v6901_v45  ;;  %v6902_v28 = vadd.f32 %v9126_v0, %v6682_v20 }
 0x5ce   :  { %v6397_v22 = vpop.f32.mrb[228].mxu0 }
 0x5cf   :  { %6966 = vst [vmem:[#allocation10 + $0x88] sm:$0xff] %v6902_v28  ;;  %v6399_v10 = vpop.f32.mrb[229].mxu0 }
 0x5d0   :  { %v6400_v1 = vpop.f32.mrb[230].mxu0  ;;  %v6686_v46 = vpop.f32.mrb[228].mxu1 }
 0x5d1   :  { %v6687_v5 = vadd.f32 %v6686_v46, %v6397_v22  ;;  %v6402_v40 = vpop.f32.mrb[231].mxu0  ;;  %v6688_v3 = vpop.f32.mrb[229].mxu1 }
 0x5d2   :  { %v6689_v35 = vpop.f32.mrb[230].mxu1 }
 0x5d3   :  { %v6903_v23 = vadd.f32 %v9130_v29, %v6687_v5  ;;  %v6690_v4 = vadd.f32 %v6689_v35, %v6400_v1  ;;  %v6691_v48 = vpop.f32.mrb[231].mxu1 }
 0x5d5   :  { %6967 = vst [vmem:[#allocation10 + $0x90] sm:$0xff] %v6903_v23  ;;  %v6904_v39 = vadd.f32 %v9132_v51, %v6690_v4 }
 0x5d6   :  { %v6405_v19 = vpop.f32.mrb[232].mxu0 }
 0x5d7   :  { %6968 = vst [vmem:[#allocation10 + $0x98] sm:$0xff] %v6904_v39  ;;  %v6407_v17 = vpop.f32.mrb[233].mxu0 }
 0x5d8   :  { %v6408_v57 = vpop.f32.mrb[234].mxu0  ;;  %v6694_v37 = vpop.f32.mrb[232].mxu1 }
 0x5d9   :  { %v6695_v36 = vadd.f32 %v6694_v37, %v6405_v19  ;;  %v6410_v14 = vpop.f32.mrb[235].mxu0  ;;  %v6696_v44 = vpop.f32.mrb[233].mxu1 }
 0x5da   :  { %v6697_v6 = vpop.f32.mrb[234].mxu1 }
 0x5db   :  { %v6905_v13 = vadd.f32 %v9124_v30, %v6695_v36  ;;  %v6698_v24 = vadd.f32 %v6697_v6, %v6408_v57  ;;  %v6699_v53 = vpop.f32.mrb[235].mxu1 }
 0x5dd   :  { %6969 = vst [vmem:[#allocation10 + $0xa0] sm:$0xff] %v6905_v13  ;;  %v6906_v58 = vadd.f32 %v9126_v0, %v6698_v24 }
 0x5de   :  { %v6413_v12 = vpop.f32.mrb[236].mxu0 }
 0x5df   :  { %6970 = vst [vmem:[#allocation10 + $0xa8] sm:$0xff] %v6906_v58  ;;  %v6415_v11 = vpop.f32.mrb[237].mxu0 }
 0x5e0   :  { %v6416_v43 = vpop.f32.mrb[238].mxu0  ;;  %v6702_v61 = vpop.f32.mrb[236].mxu1 }
 0x5e1   :  { %v6703_v8 = vadd.f32 %v6702_v61, %v6413_v12  ;;  %v6418_v21 = vpop.f32.mrb[239].mxu0  ;;  %v6704_v34 = vpop.f32.mrb[237].mxu1 }
 0x5e2   :  { %v6705_v15 = vpop.f32.mrb[238].mxu1 }
 0x5e3   :  { %v6907_v42 = vadd.f32 %v9130_v29, %v6703_v8  ;;  %v6706_v33 = vadd.f32 %v6705_v15, %v6416_v43  ;;  %v6707_v7 = vpop.f32.mrb[239].mxu1 }
 0x5e5   :  { %6971 = vst [vmem:[#allocation10 + $0xb0] sm:$0xff] %v6907_v42  ;;  %v6908_v63 = vadd.f32 %v9132_v51, %v6706_v33 }
 0x5e6   :  { %v6421_v26 = vpop.f32.mrb[240].mxu0 }
 0x5e7   :  { %6972 = vst [vmem:[#allocation10 + $0xb8] sm:$0xff] %v6908_v63  ;;  %v6423_v32 = vpop.f32.mrb[241].mxu0 }
 0x5e8   :  { %v6424_v41 = vpop.f32.mrb[242].mxu0  ;;  %v6710_v56 = vpop.f32.mrb[240].mxu1 }
 0x5e9   :  { %v6711_v59 = vadd.f32 %v6710_v56, %v6421_v26  ;;  %v6426_v18 = vpop.f32.mrb[243].mxu0  ;;  %v6712_v60 = vpop.f32.mrb[241].mxu1 }
 0x5ea   :  { %v6713_v50 = vpop.f32.mrb[242].mxu1 }
 0x5eb   :  { %v6909_v31 = vadd.f32 %v9124_v30, %v6711_v59  ;;  %v6714_v38 = vadd.f32 %v6713_v50, %v6424_v41  ;;  %v6715_v47 = vpop.f32.mrb[243].mxu1 }
 0x5ed   :  { %6973 = vst [vmem:[#allocation10 + $0xc0] sm:$0xff] %v6909_v31  ;;  %v6910_v16 = vadd.f32 %v9126_v0, %v6714_v38 }
 0x5ee   :  { %v6429_v54 = vpop.f32.mrb[244].mxu0 }
 0x5ef   :  { %6974 = vst [vmem:[#allocation10 + $0xc8] sm:$0xff] %v6910_v16  ;;  %v6431_v55 = vpop.f32.mrb[245].mxu0 }
 0x5f0   :  { %v6432_v25 = vpop.f32.mrb[246].mxu0  ;;  %v6718_v2 = vpop.f32.mrb[244].mxu1 }
 0x5f1   :  { %v6719_v62 = vadd.f32 %v6718_v2, %v6429_v54  ;;  %v6434_v52 = vpop.f32.mrb[247].mxu0  ;;  %v6720_v27 = vpop.f32.mrb[245].mxu1 }
 0x5f2   :  { %v6721_v9 = vpop.f32.mrb[246].mxu1 }
 0x5f3   :  { %v6911_v45 = vadd.f32 %v9130_v29, %v6719_v62  ;;  %v6722_v20 = vadd.f32 %v6721_v9, %v6432_v25  ;;  %v6723_v49 = vpop.f32.mrb[247].mxu1 }
 0x5f5   :  { %6975 = vst [vmem:[#allocation10 + $0xd0] sm:$0xff] %v6911_v45  ;;  %v6912_v28 = vadd.f32 %v9132_v51, %v6722_v20 }
 0x5f6   :  { %v6437_v22 = vpop.f32.mrb[248].mxu0 }
 0x5f7   :  { %6976 = vst [vmem:[#allocation10 + $0xd8] sm:$0xff] %v6912_v28  ;;  %v6439_v10 = vpop.f32.mrb[249].mxu0 }
 0x5f8   :  { %v6440_v1 = vpop.f32.mrb[250].mxu0  ;;  %v6726_v46 = vpop.f32.mrb[248].mxu1 }
 0x5f9   :  { %v6727_v5 = vadd.f32 %v6726_v46, %v6437_v22  ;;  %v6442_v40 = vpop.f32.mrb[251].mxu0  ;;  %v6728_v3 = vpop.f32.mrb[249].mxu1 }
 0x5fa   :  { %v6729_v35 = vpop.f32.mrb[250].mxu1 }
 0x5fb   :  { %v6913_v23 = vadd.f32 %v9124_v30, %v6727_v5  ;;  %v6730_v4 = vadd.f32 %v6729_v35, %v6440_v1  ;;  %v6731_v48 = vpop.f32.mrb[251].mxu1 }
 0x5fd   :  { %6977 = vst [vmem:[#allocation10 + $0xe0] sm:$0xff] %v6913_v23  ;;  %v6914_v39 = vadd.f32 %v9126_v0, %v6730_v4 }
 0x5fe   :  { %v6445_v19 = vpop.f32.mrb[252].mxu0 }
 0x5ff   :  { %6978 = vst [vmem:[#allocation10 + $0xe8] sm:$0xff] %v6914_v39  ;;  %v6447_v17 = vpop.f32.mrb[253].mxu0 }
 0x600   :  { %v6448_v57 = vpop.f32.mrb[254].mxu0  ;;  %v6734_v37 = vpop.f32.mrb[252].mxu1 }
 0x601   :  { %v6735_v36 = vadd.f32 %v6734_v37, %v6445_v19  ;;  %v6450_v14 = vpop.f32.mrb[255].mxu0  ;;  %v6736_v44 = vpop.f32.mrb[253].mxu1 }
 0x602   :  { %v6737_v6 = vpop.f32.mrb[254].mxu1 }
 0x603   :  { %v6915_v13 = vadd.f32 %v9130_v29, %v6735_v36  ;;  %v6738_v24 = vadd.f32 %v6737_v6, %v6448_v57  ;;  %v6739_v53 = vpop.f32.mrb[255].mxu1 }
 0x605   :  { %6979 = vst [vmem:[#allocation10 + $0xf0] sm:$0xff] %v6915_v13  ;;  %v6916_v58 = vadd.f32 %v9132_v51, %v6738_v24 }
 0x606   :  { %v6453_v12 = vpop.f32.mrb[0].mxu0 }
 0x607   :  { %6980 = vst [vmem:[#allocation10 + $0xf8] sm:$0xff] %v6916_v58  ;;  %v6455_v11 = vpop.f32.mrb[1].mxu0 }
 0x608   :  { %v6456_v43 = vpop.f32.mrb[2].mxu0  ;;  %v6742_v61 = vpop.f32.mrb[0].mxu1 }
 0x609   :  { %v6743_v8 = vadd.f32 %v6742_v61, %v6453_v12  ;;  %v6458_v21 = vpop.f32.mrb[3].mxu0  ;;  %v6744_v34 = vpop.f32.mrb[1].mxu1 }
 0x60a   :  { %v6745_v15 = vpop.f32.mrb[2].mxu1 }
 0x60b   :  { %v6917_v42 = vadd.f32 %v9124_v30, %v6743_v8  ;;  %v6746_v33 = vadd.f32 %v6745_v15, %v6456_v43  ;;  %v6747_v7 = vpop.f32.mrb[3].mxu1 }
 0x60d   :  { %6981 = vst [vmem:[#allocation10 + $0x100] sm:$0xff] %v6917_v42  ;;  %v6918_v63 = vadd.f32 %v9126_v0, %v6746_v33 }
 0x60e   :  { %v6461_v26 = vpop.f32.mrb[4].mxu0 }
 0x60f   :  { %6982 = vst [vmem:[#allocation10 + $0x108] sm:$0xff] %v6918_v63  ;;  %v6463_v32 = vpop.f32.mrb[5].mxu0 }
 0x610   :  { %v6464_v41 = vpop.f32.mrb[6].mxu0  ;;  %v6750_v56 = vpop.f32.mrb[4].mxu1 }
 0x611   :  { %v6751_v59 = vadd.f32 %v6750_v56, %v6461_v26  ;;  %v6466_v18 = vpop.f32.mrb[7].mxu0  ;;  %v6752_v60 = vpop.f32.mrb[5].mxu1 }
 0x612   :  { %v6753_v50 = vpop.f32.mrb[6].mxu1 }
 0x613   :  { %v6919_v31 = vadd.f32 %v9130_v29, %v6751_v59  ;;  %v6754_v38 = vadd.f32 %v6753_v50, %v6464_v41  ;;  %v6755_v47 = vpop.f32.mrb[7].mxu1 }
 0x615   :  { %6983 = vst [vmem:[#allocation10 + $0x110] sm:$0xff] %v6919_v31  ;;  %v6920_v16 = vadd.f32 %v9132_v51, %v6754_v38 }
 0x616   :  { %v6469_v54 = vpop.f32.mrb[8].mxu0 }
 0x617   :  { %6984 = vst [vmem:[#allocation10 + $0x118] sm:$0xff] %v6920_v16  ;;  %v6471_v55 = vpop.f32.mrb[9].mxu0 }
 0x618   :  { %v6472_v25 = vpop.f32.mrb[10].mxu0  ;;  %v6758_v2 = vpop.f32.mrb[8].mxu1 }
 0x619   :  { %v6759_v62 = vadd.f32 %v6758_v2, %v6469_v54  ;;  %v6474_v52 = vpop.f32.mrb[11].mxu0  ;;  %v6760_v27 = vpop.f32.mrb[9].mxu1 }
 0x61a   :  { %v6761_v9 = vpop.f32.mrb[10].mxu1 }
 0x61b   :  { %v6921_v45 = vadd.f32 %v9124_v30, %v6759_v62  ;;  %v6762_v20 = vadd.f32 %v6761_v9, %v6472_v25  ;;  %v6763_v49 = vpop.f32.mrb[11].mxu1 }
 0x61d   :  { %6985 = vst [vmem:[#allocation10 + $0x120] sm:$0xff] %v6921_v45  ;;  %v6922_v28 = vadd.f32 %v9126_v0, %v6762_v20 }
 0x61e   :  { %v6477_v22 = vpop.f32.mrb[12].mxu0 }
 0x61f   :  { %6986 = vst [vmem:[#allocation10 + $0x128] sm:$0xff] %v6922_v28  ;;  %v6479_v10 = vpop.f32.mrb[13].mxu0 }
 0x620   :  { %v6480_v1 = vpop.f32.mrb[14].mxu0  ;;  %v6766_v46 = vpop.f32.mrb[12].mxu1 }
 0x621   :  { %v6767_v5 = vadd.f32 %v6766_v46, %v6477_v22  ;;  %v6482_v40 = vpop.f32.mrb[15].mxu0  ;;  %v6768_v3 = vpop.f32.mrb[13].mxu1 }
 0x622   :  { %v6769_v35 = vpop.f32.mrb[14].mxu1 }
 0x623   :  { %v6923_v23 = vadd.f32 %v9130_v29, %v6767_v5  ;;  %v6770_v4 = vadd.f32 %v6769_v35, %v6480_v1  ;;  %v6771_v48 = vpop.f32.mrb[15].mxu1 }
 0x625   :  { %6987 = vst [vmem:[#allocation10 + $0x130] sm:$0xff] %v6923_v23  ;;  %v6924_v39 = vadd.f32 %v9132_v51, %v6770_v4 }
 0x626   :  { %v6485_v19 = vpop.f32.mrb[16].mxu0 }
 0x627   :  { %6988 = vst [vmem:[#allocation10 + $0x138] sm:$0xff] %v6924_v39  ;;  %v6487_v17 = vpop.f32.mrb[17].mxu0 }
 0x628   :  { %v6488_v57 = vpop.f32.mrb[18].mxu0  ;;  %v6774_v37 = vpop.f32.mrb[16].mxu1 }
 0x629   :  { %v6775_v36 = vadd.f32 %v6774_v37, %v6485_v19  ;;  %v6490_v14 = vpop.f32.mrb[19].mxu0  ;;  %v6776_v44 = vpop.f32.mrb[17].mxu1 }
 0x62a   :  { %v6777_v6 = vpop.f32.mrb[18].mxu1 }
 0x62b   :  { %v6925_v13 = vadd.f32 %v9124_v30, %v6775_v36  ;;  %v6778_v24 = vadd.f32 %v6777_v6, %v6488_v57  ;;  %v6779_v53 = vpop.f32.mrb[19].mxu1 }
 0x62d   :  { %6989 = vst [vmem:[#allocation10 + $0x140] sm:$0xff] %v6925_v13  ;;  %v6926_v58 = vadd.f32 %v9126_v0, %v6778_v24 }
 0x62e   :  { %v6493_v12 = vpop.f32.mrb[20].mxu0 }
 0x62f   :  { %6990 = vst [vmem:[#allocation10 + $0x148] sm:$0xff] %v6926_v58  ;;  %v6495_v11 = vpop.f32.mrb[21].mxu0 }
 0x630   :  { %v6496_v43 = vpop.f32.mrb[22].mxu0  ;;  %v6782_v61 = vpop.f32.mrb[20].mxu1 }
 0x631   :  { %v6783_v8 = vadd.f32 %v6782_v61, %v6493_v12  ;;  %v6498_v21 = vpop.f32.mrb[23].mxu0  ;;  %v6784_v34 = vpop.f32.mrb[21].mxu1 }
 0x632   :  { %v6785_v15 = vpop.f32.mrb[22].mxu1 }
 0x633   :  { %v6927_v42 = vadd.f32 %v9130_v29, %v6783_v8  ;;  %v6786_v33 = vadd.f32 %v6785_v15, %v6496_v43  ;;  %v6787_v7 = vpop.f32.mrb[23].mxu1 }
 0x635   :  { %6991 = vst [vmem:[#allocation10 + $0x150] sm:$0xff] %v6927_v42  ;;  %v6928_v63 = vadd.f32 %v9132_v51, %v6786_v33 }
 0x636   :  { %v6501_v26 = vpop.f32.mrb[24].mxu0 }
 0x637   :  { %6992 = vst [vmem:[#allocation10 + $0x158] sm:$0xff] %v6928_v63  ;;  %v6503_v32 = vpop.f32.mrb[25].mxu0 }
 0x638   :  { %v6504_v41 = vpop.f32.mrb[26].mxu0  ;;  %v6790_v56 = vpop.f32.mrb[24].mxu1 }
 0x639   :  { %v6791_v59 = vadd.f32 %v6790_v56, %v6501_v26  ;;  %v6506_v18 = vpop.f32.mrb[27].mxu0  ;;  %v6792_v60 = vpop.f32.mrb[25].mxu1 }
 0x63a   :  { %v6793_v50 = vpop.f32.mrb[26].mxu1 }
 0x63b   :  { %v6929_v31 = vadd.f32 %v9124_v30, %v6791_v59  ;;  %v6794_v38 = vadd.f32 %v6793_v50, %v6504_v41  ;;  %v6795_v47 = vpop.f32.mrb[27].mxu1 }
 0x63d   :  { %6993 = vst [vmem:[#allocation10 + $0x160] sm:$0xff] %v6929_v31  ;;  %v6930_v16 = vadd.f32 %v9126_v0, %v6794_v38 }
 0x63e   :  { %v6509_v54 = vpop.f32.mrb[28].mxu0 }
 0x63f   :  { %6994 = vst [vmem:[#allocation10 + $0x168] sm:$0xff] %v6930_v16  ;;  %v6511_v55 = vpop.f32.mrb[29].mxu0 }
 0x640   :  { %v6512_v25 = vpop.f32.mrb[30].mxu0  ;;  %v6798_v2 = vpop.f32.mrb[28].mxu1 }
 0x641   :  { %v6799_v62 = vadd.f32 %v6798_v2, %v6509_v54  ;;  %v6514_v52 = vpop.f32.mrb[31].mxu0  ;;  %v6800_v27 = vpop.f32.mrb[29].mxu1 }
 0x642   :  { %v6801_v9 = vpop.f32.mrb[30].mxu1 }
 0x643   :  { %v6931_v45 = vadd.f32 %v9130_v29, %v6799_v62  ;;  %v6802_v20 = vadd.f32 %v6801_v9, %v6512_v25  ;;  %v6803_v49 = vpop.f32.mrb[31].mxu1 }
 0x645   :  { %6995 = vst [vmem:[#allocation10 + $0x170] sm:$0xff] %v6931_v45  ;;  %v6932_v28 = vadd.f32 %v9132_v51, %v6802_v20 }
 0x646   :  { %v6517_v22 = vpop.f32.mrb[32].mxu0 }
 0x647   :  { %6996 = vst [vmem:[#allocation10 + $0x178] sm:$0xff] %v6932_v28  ;;  %v6519_v10 = vpop.f32.mrb[33].mxu0 }
 0x648   :  { %v6520_v1 = vpop.f32.mrb[34].mxu0  ;;  %v6806_v46 = vpop.f32.mrb[32].mxu1 }
 0x649   :  { %v6807_v5 = vadd.f32 %v6806_v46, %v6517_v22  ;;  %v6522_v40 = vpop.f32.mrb[35].mxu0  ;;  %v6808_v3 = vpop.f32.mrb[33].mxu1 }
 0x64a   :  { %v6809_v35 = vpop.f32.mrb[34].mxu1 }
 0x64b   :  { %v6933_v23 = vadd.f32 %v9124_v30, %v6807_v5  ;;  %v6810_v4 = vadd.f32 %v6809_v35, %v6520_v1  ;;  %v6811_v48 = vpop.f32.mrb[35].mxu1 }
 0x64d   :  { %6997 = vst [vmem:[#allocation10 + $0x180] sm:$0xff] %v6933_v23  ;;  %v6934_v39 = vadd.f32 %v9126_v0, %v6810_v4 }
 0x64e   :  { %v6525_v19 = vpop.f32.mrb[36].mxu0 }
 0x64f   :  { %6998 = vst [vmem:[#allocation10 + $0x188] sm:$0xff] %v6934_v39  ;;  %v6527_v17 = vpop.f32.mrb[37].mxu0 }
 0x650   :  { %v6528_v57 = vpop.f32.mrb[38].mxu0  ;;  %v6814_v37 = vpop.f32.mrb[36].mxu1 }
 0x651   :  { %v6815_v36 = vadd.f32 %v6814_v37, %v6525_v19  ;;  %v6530_v14 = vpop.f32.mrb[39].mxu0  ;;  %v6816_v44 = vpop.f32.mrb[37].mxu1 }
 0x652   :  { %v6817_v6 = vpop.f32.mrb[38].mxu1 }
 0x653   :  { %v6935_v13 = vadd.f32 %v9130_v29, %v6815_v36  ;;  %v6818_v24 = vadd.f32 %v6817_v6, %v6528_v57  ;;  %v6819_v53 = vpop.f32.mrb[39].mxu1 }
 0x655   :  { %6999 = vst [vmem:[#allocation10 + $0x190] sm:$0xff] %v6935_v13  ;;  %v6936_v58 = vadd.f32 %v9132_v51, %v6818_v24 }
 0x656   :  { %v6533_v12 = vpop.f32.mrb[40].mxu0 }
 0x657   :  { %7000 = vst [vmem:[#allocation10 + $0x198] sm:$0xff] %v6936_v58  ;;  %v6535_v11 = vpop.f32.mrb[41].mxu0 }
 0x658   :  { %v6536_v43 = vpop.f32.mrb[42].mxu0  ;;  %v6822_v61 = vpop.f32.mrb[40].mxu1 }
 0x659   :  { %v6823_v8 = vadd.f32 %v6822_v61, %v6533_v12  ;;  %v6538_v21 = vpop.f32.mrb[43].mxu0  ;;  %v6824_v34 = vpop.f32.mrb[41].mxu1 }
 0x65a   :  { %v6825_v15 = vpop.f32.mrb[42].mxu1 }
 0x65b   :  { %v6937_v42 = vadd.f32 %v9124_v30, %v6823_v8  ;;  %v6826_v33 = vadd.f32 %v6825_v15, %v6536_v43  ;;  %v6827_v7 = vpop.f32.mrb[43].mxu1 }
 0x65d   :  { %7001 = vst [vmem:[#allocation10 + $0x1a0] sm:$0xff] %v6937_v42  ;;  %v6938_v63 = vadd.f32 %v9126_v0, %v6826_v33 }
 0x65e   :  { %v6541_v26 = vpop.f32.mrb[44].mxu0 }
 0x65f   :  { %7002 = vst [vmem:[#allocation10 + $0x1a8] sm:$0xff] %v6938_v63  ;;  %v6543_v32 = vpop.f32.mrb[45].mxu0 }
 0x660   :  { %v6544_v41 = vpop.f32.mrb[46].mxu0  ;;  %v6830_v56 = vpop.f32.mrb[44].mxu1 }
 0x661   :  { %v6831_v59 = vadd.f32 %v6830_v56, %v6541_v26  ;;  %v6546_v18 = vpop.f32.mrb[47].mxu0  ;;  %v6832_v60 = vpop.f32.mrb[45].mxu1 }
 0x662   :  { %v6833_v50 = vpop.f32.mrb[46].mxu1 }
 0x663   :  { %v6939_v31 = vadd.f32 %v9130_v29, %v6831_v59  ;;  %v6834_v38 = vadd.f32 %v6833_v50, %v6544_v41  ;;  %v6835_v47 = vpop.f32.mrb[47].mxu1 }
 0x665   :  { %7003 = vst [vmem:[#allocation10 + $0x1b0] sm:$0xff] %v6939_v31  ;;  %v6940_v16 = vadd.f32 %v9132_v51, %v6834_v38 }
 0x666   :  { %v6549_v54 = vpop.f32.mrb[48].mxu0 }
 0x667   :  { %7004 = vst [vmem:[#allocation10 + $0x1b8] sm:$0xff] %v6940_v16  ;;  %v6551_v55 = vpop.f32.mrb[49].mxu0 }
 0x668   :  { %v6552_v25 = vpop.f32.mrb[50].mxu0  ;;  %v6838_v2 = vpop.f32.mrb[48].mxu1 }
 0x669   :  { %v6839_v62 = vadd.f32 %v6838_v2, %v6549_v54  ;;  %v6554_v52 = vpop.f32.mrb[51].mxu0  ;;  %v6840_v27 = vpop.f32.mrb[49].mxu1 }
 0x66a   :  { %v6841_v9 = vpop.f32.mrb[50].mxu1 }
 0x66b   :  { %v6941_v45 = vadd.f32 %v9124_v30, %v6839_v62  ;;  %v6842_v20 = vadd.f32 %v6841_v9, %v6552_v25  ;;  %v6843_v49 = vpop.f32.mrb[51].mxu1 }
 0x66d   :  { %7005 = vst [vmem:[#allocation10 + $0x1c0] sm:$0xff] %v6941_v45  ;;  %v6942_v28 = vadd.f32 %v9126_v0, %v6842_v20 }
 0x66e   :  { %v6557_v22 = vpop.f32.mrb[52].mxu0 }
 0x66f   :  { %7006 = vst [vmem:[#allocation10 + $0x1c8] sm:$0xff] %v6942_v28  ;;  %v6559_v10 = vpop.f32.mrb[53].mxu0 }
 0x670   :  { %v6560_v1 = vpop.f32.mrb[54].mxu0  ;;  %v6846_v46 = vpop.f32.mrb[52].mxu1 }
 0x671   :  { %v6847_v5 = vadd.f32 %v6846_v46, %v6557_v22  ;;  %v6562_v40 = vpop.f32.mrb[55].mxu0  ;;  %v6848_v3 = vpop.f32.mrb[53].mxu1 }
 0x672   :  { %v6849_v35 = vpop.f32.mrb[54].mxu1 }
 0x673   :  { %v6943_v23 = vadd.f32 %v9130_v29, %v6847_v5  ;;  %v6850_v4 = vadd.f32 %v6849_v35, %v6560_v1  ;;  %v6851_v48 = vpop.f32.mrb[55].mxu1 }
 0x675   :  { %7007 = vst [vmem:[#allocation10 + $0x1d0] sm:$0xff] %v6943_v23  ;;  %v6944_v39 = vadd.f32 %v9132_v51, %v6850_v4 }
 0x676   :  { %v6565_v19 = vpop.f32.mrb[56].mxu0 }
 0x677   :  { %7008 = vst [vmem:[#allocation10 + $0x1d8] sm:$0xff] %v6944_v39  ;;  %v6567_v17 = vpop.f32.mrb[57].mxu0 }
 0x678   :  { %v6568_v57 = vpop.f32.mrb[58].mxu0  ;;  %v6854_v37 = vpop.f32.mrb[56].mxu1 }
 0x679   :  { %v6855_v36 = vadd.f32 %v6854_v37, %v6565_v19  ;;  %v6570_v14 = vpop.f32.mrb[59].mxu0  ;;  %v6856_v44 = vpop.f32.mrb[57].mxu1 }
 0x67a   :  { %v6857_v6 = vpop.f32.mrb[58].mxu1 }
 0x67b   :  { %v6945_v13 = vadd.f32 %v9124_v30, %v6855_v36  ;;  %v6858_v24 = vadd.f32 %v6857_v6, %v6568_v57  ;;  %v6859_v53 = vpop.f32.mrb[59].mxu1 }
 0x67d   :  { %7009 = vst [vmem:[#allocation10 + $0x1e0] sm:$0xff] %v6945_v13  ;;  %v6946_v58 = vadd.f32 %v9126_v0, %v6858_v24 }
 0x67e   :  { %v6573_v12 = vpop.f32.mrb[60].mxu0 }
 0x67f   :  { %7010 = vst [vmem:[#allocation10 + $0x1e8] sm:$0xff] %v6946_v58  ;;  %v6575_v11 = vpop.f32.mrb[61].mxu0 }
 0x680   :  { %v6576_v43 = vpop.f32.mrb[62].mxu0  ;;  %v6862_v61 = vpop.f32.mrb[60].mxu1 }
 0x681   :  { %v6863_v8 = vadd.f32 %v6862_v61, %v6573_v12  ;;  %v6578_v21 = vpop.f32.mrb[63].mxu0  ;;  %v6864_v34 = vpop.f32.mrb[61].mxu1 }
 0x682   :  { %v6865_v15 = vpop.f32.mrb[62].mxu1 }
 0x683   :  { %v6947_v42 = vadd.f32 %v9130_v29, %v6863_v8  ;;  %v6866_v33 = vadd.f32 %v6865_v15, %v6576_v43  ;;  %v6867_v30 = vpop.f32.mrb[63].mxu1 }
 0x685   :  { %7011 = vst [vmem:[#allocation10 + $0x1f0] sm:$0xff] %v6947_v42  ;;  %v6948_v7 = vadd.f32 %v9132_v51, %v6866_v33 }
 0x687   :  { %7012 = vst [vmem:[#allocation10 + $0x1f8] sm:$0xff] %v6948_v7 }
 0x688   :  { %8132 = shalt.err (!%p8129_p8)
}
 0x689   :  { %s8133_s19 = scalar_lea.hbm %s9216_s5, 8192 }
 0x68a   :  { %p8134_p9 = scmp.ne.s32.totalorder %s9216_s5, %s8133_s19  ;;  %p8137_p10 = scmp.lt.u32.totalorder %s8133_s19, %s9216_s5 }
 0x68c   :  { %p8139_p11 = pnand %p8137_p10, %p8134_p9 }
 0x68e   :  { %8142 = shalt.err (!%p8139_p11)
}
 0x68f   :  { %7024 = dma.vmem_to_hbm [thread:$0]  %s7019_s14, 8192, %s9216_s5, [#allocation4], %s8155_s1, %s8155_s1, %s8156_s17  }
 0x690   :  { %8149 = dma.done.wait [#allocation4], 8192  }
 0x691   :  { %8150 = vsyncadd [#allocation4], 4294959104 }
 0x692   :  { %7028 = vsyncpa [#allocation3], 1 }
 0x693   :  { %7029 = vsyncpa [#allocation6], 1 }
 0x694   :  { %7030 = vsyncpa [#allocation9], 1 }
 0x695   :  { %7031 = vsyncpa [#allocation4], 1 }

</bundles_post_ra>
